<compile_context>
chip_gen: v7x
topology: tpu7x:2x2x1
jax: 0.10.0
libtpu: 0.0.40
codegen_flags: <defaults>
</compile_context>

<pallas_src>
import functools
import math

import jax
import jax.numpy as jnp
from jax import lax
from jax.experimental import pallas as pl
from jax.experimental.pallas import tpu as pltpu


# ----------------------------------------------------------------------------
# Config constants
# ----------------------------------------------------------------------------

LN_EPS_ATT = 1e-8      # BertAttOutput / BertOutput (per reference)
LN_EPS_VIS = 1e-9      # VisualFeatEncoder (per reference)
LN_EPS_EMB = 1e-12     # TODO(synk): BertEmbeddings is not defined in the reference file;
                       # standard BERT embeddings (word+pos+type, LN eps=1e-12) are used.

PARAM_DTYPE = jnp.bfloat16   # matmul weights / embedding tables
ACT_DTYPE = jnp.bfloat16     # activations between kernels

_TM_CAP = 256                          # row (sublane) tile cap
_TN_CAP = 512                          # output-column tile cap (tiled fallback)
_TK_CAP = 512                          # contraction tile cap (tiled fallback)
_WEIGHT_RESIDENT_BYTES = 8 * 1024 * 1024   # weights below this stay fully VMEM-resident


@functools.lru_cache(maxsize=None)
def _vmem_limit():
    """Generation-aware scoped-VMEM budget: ~48 MiB on v7x (64 MiB phys), 96 MiB on v5e/v6e."""
    cap = 128 * 1024 * 1024
    try:
        cap = int(getattr(pltpu.get_tpu_info(), "vmem_capacity_bytes", cap))
    except Exception:
        pass
    return int(min(96 * 1024 * 1024, cap * 3 // 4))


def _row_tile(m, cap):
    """Largest divisor of m that is a multiple of 8 and <= cap; prefers a tile giving
    >= 2 grid blocks so both v7x TensorCores get work."""
    if m <= 8:
        return m
    best = None
    t = min(cap, m)
    t -= t % 8
    while t >= 8:
        if m % t == 0:
            if best is None:
                best = t
            if m // t >= 2:
                return t
        t -= 8
    return best if best is not None else m


def _pick_tile(dim, cap):
    """Lane-axis tile: prefer 256-aligned (full MXU panel on v6e/v7x), else 128."""
    if dim <= cap:
        return dim
    for align in (256, 128):
        t = (cap // align) * align
        while t >= align:
            if dim % t == 0:
                return t
            t -= align
    return dim


def _batch_tile(b):
    """Attention batch tile: amortize per-step overhead while keeping >= 2 grid blocks."""
    if b <= 1:
        return 1
    for bb in (4, 3, 2, 1):
        if b % bb == 0 and b // bb >= 2:
            return bb
    return 1


# ----------------------------------------------------------------------------
# Linear (+ GELU) kernels
# ----------------------------------------------------------------------------

def _gelu(y):
    # exact erf GELU, matching the PyTorch reference
    return y * 0.5 * (1.0 + lax.erf(y * (1.0 / math.sqrt(2.0))))


def _linear_resident_kernel(x_ref, w_ref, b_ref, o_ref, *, activation):
    """Weight-resident matmul: full K, full N per step. Grid: (M//tm,)."""
    y = jnp.dot(x_ref[...], w_ref[...], preferred_element_type=jnp.float32)
    y = y + b_ref[...].astype(jnp.float32)
    if activation == "gelu":
        y = _gelu(y)
    o_ref[...] = y.astype(o_ref.dtype)


def _linear_tiled_kernel(x_ref, w_ref, b_ref, o_ref, acc_ref, *, activation):
    """Tiled matmul with f32 accumulator. Grid: (M, N, K)."""
    @pl.when(pl.program_id(2) == 0)
    def _():
        acc_ref[...] = jnp.zeros_like(acc_ref)

    acc_ref[...] += jnp.dot(x_ref[...], w_ref[...],
                            preferred_element_type=jnp.float32)

    @pl.when(pl.program_id(2) == pl.num_programs(2) - 1)
    def _():
        y = acc_ref[...] + b_ref[...].astype(jnp.float32)
        if activation == "gelu":
            y = _gelu(y)
        o_ref[...] = y.astype(o_ref.dtype)


def pallas_linear(x, w, b, activation=None):
    """x: (M, K) bf16, w: (K, N) bf16, b: (N,) f32 -> (M, N) in x.dtype."""
    M, K = x.shape
    N = w.shape[1]
    limit = _vmem_limit()
    w_bytes = K * N * jnp.dtype(w.dtype).itemsize

    if w_bytes <= _WEIGHT_RESIDENT_BYTES:
        tm = _row_tile(M, _TM_CAP)
        return pl.pallas_call(
            functools.partial(_linear_resident_kernel, activation=activation),
            out_shape=jax.ShapeDtypeStruct((M, N), x.dtype),
            grid=(M // tm,),
            in_specs=[
                pl.BlockSpec((tm, K), lambda i: (i, 0)),
                pl.BlockSpec((K, N), lambda i: (0, 0)),   # weight DMAed once, stays resident
                pl.BlockSpec((1, N), lambda i: (0, 0)),
            ],
            out_specs=pl.BlockSpec((tm, N), lambda i: (i, 0)),
            compiler_params=pltpu.CompilerParams(
                dimension_semantics=("parallel",),
                vmem_limit_bytes=limit),
        )(x, w, b.reshape(1, N))

    # Fallback: large weight, tiled with 256-aligned MXU panels.
    tm = _row_tile(M, _TM_CAP)
    tn = _pick_tile(N, _TN_CAP)
    tk = _pick_tile(K, _TK_CAP)
    return pl.pallas_call(
        functools.partial(_linear_tiled_kernel, activation=activation),
        out_shape=jax.ShapeDtypeStruct((M, N), x.dtype),
        grid=(M // tm, N // tn, K // tk),
        in_specs=[
            pl.BlockSpec((tm, tk), lambda i, j, k: (i, k)),
            pl.BlockSpec((tk, tn), lambda i, j, k: (k, j)),
            pl.BlockSpec((1, tn), lambda i, j, k: (0, j)),
        ],
        out_specs=pl.BlockSpec((tm, tn), lambda i, j, k: (i, j)),
        scratch_shapes=[pltpu.VMEM((tm, tn), jnp.float32)],
        compiler_params=pltpu.CompilerParams(
            dimension_semantics=("parallel", "parallel", "arbitrary"),
            vmem_limit_bytes=limit),
    )(x, w, b.reshape(1, N))


# ----------------------------------------------------------------------------
# Fused matmul + bias (+ residual) + LayerNorm kernels
# ----------------------------------------------------------------------------

def _ln_epilogue(y, p_ref, eps):
    mean = jnp.mean(y, axis=-1, keepdims=True)
    var = jnp.mean((y - mean) ** 2, axis=-1, keepdims=True)
    y = (y - mean) * lax.rsqrt(var + eps)
    return y * p_ref[1:2, :] + p_ref[2:3, :]


def _linear_ln_resident_kernel(*refs, eps, with_residual):
    """Full-K matmul + bias (+ residual) + LN. Grid: (M//tm,). p_ref=(3,N)=(bias,gamma,beta)."""
    if with_residual:
        x_ref, w_ref, p_ref, res_ref, o_ref = refs
    else:
        x_ref, w_ref, p_ref, o_ref = refs
        res_ref = None
    y = jnp.dot(x_ref[...], w_ref[...], preferred_element_type=jnp.float32)
    y = y + p_ref[0:1, :]
    if with_residual:
        y = y + res_ref[...].astype(jnp.float32)
    o_ref[...] = _ln_epilogue(y, p_ref, eps).astype(o_ref.dtype)


def _linear_ln_tiled_kernel(*refs, eps, with_residual):
    """K-tiled matmul + bias (+ residual) + LN with f32 accumulator. Grid: (M, K)."""
    if with_residual:
        x_ref, w_ref, p_ref, res_ref, o_ref, acc_ref = refs
    else:
        x_ref, w_ref, p_ref, o_ref, acc_ref = refs
        res_ref = None

    @pl.when(pl.program_id(1) == 0)
    def _():
        acc_ref[...] = jnp.zeros_like(acc_ref)

    acc_ref[...] += jnp.dot(x_ref[...], w_ref[...],
                            preferred_element_type=jnp.float32)

    @pl.when(pl.program_id(1) == pl.num_programs(1) - 1)
    def _():
        y = acc_ref[...] + p_ref[0:1, :]
        if with_residual:
            y = y + res_ref[...].astype(jnp.float32)
        o_ref[...] = _ln_epilogue(y, p_ref, eps).astype(o_ref.dtype)


def pallas_linear_ln(x, w, pack, eps, residual=None):
    """LayerNorm(x @ w + bias [+ residual]); pack = stacked (bias, gamma, beta) of shape (3, N)."""
    M, K = x.shape
    N = w.shape[1]
    with_residual = residual is not None
    limit = _vmem_limit()
    tm = _row_tile(M, _TM_CAP)
    w_bytes = K * N * jnp.dtype(w.dtype).itemsize

    if w_bytes <= _WEIGHT_RESIDENT_BYTES:
        in_specs = [
            pl.BlockSpec((tm, K), lambda i: (i, 0)),
            pl.BlockSpec((K, N), lambda i: (0, 0)),
            pl.BlockSpec((3, N), lambda i: (0, 0)),
        ]
        args = [x, w, pack]
        if with_residual:
            in_specs.append(pl.BlockSpec((tm, N), lambda i: (i, 0)))
            args.append(residual)
        return pl.pallas_call(
            functools.partial(_linear_ln_resident_kernel, eps=eps,
                              with_residual=with_residual),
            out_shape=jax.ShapeDtypeStruct((M, N), x.dtype),
            grid=(M // tm,),
            in_specs=in_specs,
            out_specs=pl.BlockSpec((tm, N), lambda i: (i, 0)),
            compiler_params=pltpu.CompilerParams(
                dimension_semantics=("parallel",),
                vmem_limit_bytes=limit),
        )(*args)

    tk = _pick_tile(K, _TK_CAP)
    in_specs = [
        pl.BlockSpec((tm, tk), lambda i, k: (i, k)),
        pl.BlockSpec((tk, N), lambda i, k: (k, 0)),
        pl.BlockSpec((3, N), lambda i, k: (0, 0)),
    ]
    args = [x, w, pack]
    if with_residual:
        in_specs.append(pl.BlockSpec((tm, N), lambda i, k: (i, 0)))
        args.append(residual)
    return pl.pallas_call(
        functools.partial(_linear_ln_tiled_kernel, eps=eps,
                          with_residual=with_residual),
        out_shape=jax.ShapeDtypeStruct((M, N), x.dtype),
        grid=(M // tm, K // tk),
        in_specs=in_specs,
        out_specs=pl.BlockSpec((tm, N), lambda i, k: (i, 0)),
        scratch_shapes=[pltpu.VMEM((tm, N), jnp.float32)],
        compiler_params=pltpu.CompilerParams(
            dimension_semantics=("parallel", "arbitrary"),
            vmem_limit_bytes=limit),
    )(*args)


# ----------------------------------------------------------------------------
# Residual-free LayerNorm (embeddings)
# ----------------------------------------------------------------------------

def _layernorm_kernel(x_ref, p_ref, o_ref, *, eps):
    x = x_ref[...].astype(jnp.float32)
    mean = jnp.mean(x, axis=-1, keepdims=True)
    var = jnp.mean((x - mean) ** 2, axis=-1, keepdims=True)
    y = (x - mean) * lax.rsqrt(var + eps)
    y = y * p_ref[0:1, :] + p_ref[1:2, :]
    o_ref[...] = y.astype(o_ref.dtype)


def pallas_layernorm(x, pack, eps):
    """LayerNorm over last dim. x: (M, H); pack: (2, H) = (gamma, beta)."""
    M, H = x.shape
    tm = _row_tile(M, 512)
    return pl.pallas_call(
        functools.partial(_layernorm_kernel, eps=eps),
        out_shape=jax.ShapeDtypeStruct((M, H), x.dtype),
        grid=(M // tm,),
        in_specs=[
            pl.BlockSpec((tm, H), lambda i: (i, 0)),
            pl.BlockSpec((2, H), lambda i: (0, 0)),
        ],
        out_specs=pl.BlockSpec((tm, H), lambda i: (i, 0)),
        compiler_params=pltpu.CompilerParams(
            dimension_semantics=("parallel",),
            vmem_limit_bytes=_vmem_limit()),
    )(x, pack)


# ----------------------------------------------------------------------------
# Multi-head attention kernels (lane-dense slabs, batched over bb batch elems)
# ----------------------------------------------------------------------------

def _attend_head(q, k, v, m, scale):
    """q:(bb,Sq,d) k,v:(bb,Sk,d) bf16; m:(bb,1,Sk) f32 additive mask -> (bb,Sq,d) f32."""
    s = jnp.einsum('bqd,bkd->bqk', q, k,
                   preferred_element_type=jnp.float32) * scale
    s = s + m
    s = s - jnp.max(s, axis=-1, keepdims=True)
    p = jnp.exp(s)
    denom = jnp.sum(p, axis=-1, keepdims=True)
    p = p * pl.reciprocal(denom, approx=True)          # EUP slot, off the VPU
    return jnp.einsum('bqk,bkd->bqd', p.astype(v.dtype), v,
                      preferred_element_type=jnp.float32)


def _self_attention_kernel(qkv_ref, m_ref, o_ref, acc_ref, *, num_heads, scale):
    """qkv_ref: (bb, S, 3H) [Q | K | V]; o_ref: (bb, S, H); acc_ref: (bb, S, H) f32 scratch."""
    H = o_ref.shape[-1]
    d = H // num_heads
    m = m_ref[...].astype(jnp.float32)
    for h in range(num_heads):                         # static head loop; one head live at a time
        q = qkv_ref[:, :, h * d:(h + 1) * d]
        k = qkv_ref[:, :, H + h * d:H + (h + 1) * d]
        v = qkv_ref[:, :, 2 * H + h * d:2 * H + (h + 1) * d]
        acc_ref[:, :, h * d:(h + 1) * d] = _attend_head(q, k, v, m, scale)
    o_ref[...] = acc_ref[...].astype(o_ref.dtype)      # single lane-dense store


def _cross_attention_kernel(q_ref, kv_ref, m_ref, o_ref, acc_ref, *, num_heads, scale):
    """q_ref: (bb, Sq, H); kv_ref: (bb, Sk, 2H) [K | V]; o_ref: (bb, Sq, H)."""
    H = o_ref.shape[-1]
    d = H // num_heads
    m = m_ref[...].astype(jnp.float32)
    for h in range(num_heads):
        q = q_ref[:, :, h * d:(h + 1) * d]
        k = kv_ref[:, :, h * d:(h + 1) * d]
        v = kv_ref[:, :, H + h * d:H + (h + 1) * d]
        acc_ref[:, :, h * d:(h + 1) * d] = _attend_head(q, k, v, m, scale)
    o_ref[...] = acc_ref[...].astype(o_ref.dtype)


def pallas_self_attention(qkv, mask, num_heads):
    """qkv: (B, S, 3H), mask: (B, 1, S) additive -> (B, S, H)."""
    B, S, H3 = qkv.shape
    H = H3 // 3
    bb = _batch_tile(B)
    scale = 1.0 / math.sqrt(H // num_heads)
    return pl.pallas_call(
        functools.partial(_self_attention_kernel, num_heads=num_heads, scale=scale),
        out_shape=jax.ShapeDtypeStruct((B, S, H), qkv.dtype),
        grid=(B // bb,),
        in_specs=[
            pl.BlockSpec((bb, S, H3), lambda b: (b, 0, 0)),
            pl.BlockSpec((bb, 1, S), lambda b: (b, 0, 0)),
        ],
        out_specs=pl.BlockSpec((bb, S, H), lambda b: (b, 0, 0)),
        scratch_shapes=[pltpu.VMEM((bb, S, H), jnp.float32)],
        compiler_params=pltpu.CompilerParams(
            dimension_semantics=("parallel",),
            vmem_limit_bytes=_vmem_limit()),
    )(qkv, mask)


def pallas_cross_attention(q, kv, mask, num_heads):
    """q: (B, Sq, H), kv: (B, Sk, 2H), mask: (B, 1, Sk) additive -> (B, Sq, H)."""
    B, Sq, H = q.shape
    Sk = kv.shape[1]
    bb = _batch_tile(B)
    scale = 1.0 / math.sqrt(H // num_heads)
    return pl.pallas_call(
        functools.partial(_cross_attention_kernel, num_heads=num_heads, scale=scale),
        out_shape=jax.ShapeDtypeStruct((B, Sq, H), q.dtype),
        grid=(B // bb,),
        in_specs=[
            pl.BlockSpec((bb, Sq, H), lambda b: (b, 0, 0)),
            pl.BlockSpec((bb, Sk, 2 * H), lambda b: (b, 0, 0)),
            pl.BlockSpec((bb, 1, Sk), lambda b: (b, 0, 0)),
        ],
        out_specs=pl.BlockSpec((bb, Sq, H), lambda b: (b, 0, 0)),
        scratch_shapes=[pltpu.VMEM((bb, Sq, H), jnp.float32)],
        compiler_params=pltpu.CompilerParams(
            dimension_semantics=("parallel",),
            vmem_limit_bytes=_vmem_limit()),
    )(q, kv, mask)


# ----------------------------------------------------------------------------
# Model building blocks (glue around the kernels)
# ----------------------------------------------------------------------------

def attention_block(p_att, p_out, hidden, context, mask, num_heads):
    """BertAttention + BertAttOutput (dense -> add & LayerNorm, fused epilogue)."""
    B, Sq, H = hidden.shape
    hf = hidden.reshape(-1, H)
    if "wqkv" in p_att:
        # self-attention (query == context): single fused QKV projection
        qkv = pallas_linear(hf, p_att["wqkv"], p_att["bqkv"]).reshape(B, Sq, 3 * H)
        ctx = pallas_self_attention(qkv, mask, num_heads)
    else:
        # cross-attention: Q from hidden, fused K/V from context
        Sk = context.shape[1]
        cf = context.reshape(-1, H)
        q = pallas_linear(hf, p_att["wq"], p_att["bq"]).reshape(B, Sq, H)
        kv = pallas_linear(cf, p_att["wkv"], p_att["bkv"]).reshape(B, Sk, 2 * H)
        ctx = pallas_cross_attention(q, kv, mask, num_heads)
    out = pallas_linear_ln(ctx.reshape(-1, H), p_out["w"], p_out["pack"],
                           LN_EPS_ATT, residual=hf)
    return out.reshape(B, Sq, H)


def ffn_block(p_inter, p_output, x):
    """BertIntermediate (dense + GELU) + BertOutput (dense -> add & LayerNorm, fused)."""
    B, S, H = x.shape
    xf = x.reshape(-1, H)
    inter = pallas_linear(xf, p_inter["w"], p_inter["b"], activation="gelu")
    out = pallas_linear_ln(inter, p_output["w"], p_output["pack"],
                           LN_EPS_ATT, residual=xf)
    return out.reshape(B, S, H)


def bert_layer(p, h, mask, num_heads):
    att = attention_block(p["attn"]["att"], p["attn"]["out"], h, h, mask, num_heads)
    return ffn_block(p["inter"], p["output"], att)


def lxrt_x_layer(p, lang, lmask, visn, vmask, num_heads):
    # cross attention: the SAME visual_attention module is used in both directions
    va = p["visual_attention"]
    lang_x = attention_block(va["att"], va["out"], lang, visn, vmask, num_heads)
    visn_x = attention_block(va["att"], va["out"], visn, lang, lmask, num_heads)
    # self attention
    lsa = p["lang_self_att"]
    vsa = p["visn_self_att"]
    lang_s = attention_block(lsa["att"], lsa["out"], lang_x, lang_x, lmask, num_heads)
    visn_s = attention_block(vsa["att"], vsa["out"], visn_x, visn_x, vmask, num_heads)
    # FFN
    lang_o = ffn_block(p["lang_inter"], p["lang_output"], lang_s)
    visn_o = ffn_block(p["visn_inter"], p["visn_output"], visn_s)
    return lang_o, visn_o


def bert_embeddings(p, input_ids, token_type_ids):
    B, L = input_ids.shape
    pos_ids = jnp.arange(L, dtype=jnp.int32)
    we = jnp.take(p["word"], input_ids, axis=0)
    pe = jnp.take(p["pos"], pos_ids, axis=0)[None, :, :]
    te = jnp.take(p["type"], token_type_ids, axis=0)
    emb = we + pe + te
    H = emb.shape[-1]
    out = pallas_layernorm(emb.reshape(-1, H), p["ln_pack"], LN_EPS_EMB)
    return out.reshape(B, L, H)


def visual_feat_encoder(p, feats, boxes):
    B, V, F = feats.shape
    P = boxes.shape[-1]
    H = p["visn_fc"]["w"].shape[1]
    x = pallas_linear_ln(feats.reshape(-1, F).astype(ACT_DTYPE),
                         p["visn_fc"]["w"], p["visn_fc"]["pack"], LN_EPS_VIS)
    y = pallas_linear_ln(boxes.reshape(-1, P).astype(ACT_DTYPE),
                         p["box_fc"]["w"], p["box_fc"]["pack"], LN_EPS_VIS)
    return ((x + y) * 0.5).astype(ACT_DTYPE).reshape(B, V, H)


def bert_pooler(p, lang_feats):
    # Tiny (B, H) x (H, H) matmul: launch-overhead dominated -> plain jnp.
    first = lang_feats[:, 0].astype(jnp.float32)
    w = p["dense"]["w"].astype(jnp.float32)
    return jnp.tanh(first @ w + p["dense"]["b"])


def lxrt_model_forward(params, input_ids, token_type_ids=None, attention_mask=None,
                       visual_feats=None, visual_attention_mask=None, num_heads=4):
    B, L = input_ids.shape
    if attention_mask is None:
        attention_mask = jnp.ones_like(input_ids)
    if token_type_ids is None:
        token_type_ids = jnp.zeros_like(input_ids)

    # additive masks, shape (B, 1, Sk) — broadcast over heads/queries inside the kernel
    ext_mask = (1.0 - attention_mask.astype(jnp.float32))[:, None, :] * -10000.0

    feats, boxes = visual_feats
    V = feats.shape[1]
    if visual_attention_mask is not None:
        ext_vmask = (1.0 - visual_attention_mask.astype(jnp.float32))[:, None, :] * -10000.0
    else:
        ext_vmask = jnp.zeros((B, 1, V), jnp.float32)    # None mask == additive zeros

    # embeddings + visual feature encoder
    lang = bert_embeddings(params["embeddings"], input_ids, token_type_ids)
    visn = visual_feat_encoder(params["visn_fc"], feats, boxes)

    # language self-attention layers
    for lp in params["l_layers"]:
        lang = bert_layer(lp, lang, ext_mask, num_heads)
    # vision self-attention layers
    for rp in params["r_layers"]:
        visn = bert_layer(rp, visn, ext_vmask, num_heads)
    # cross-modality layers
    for xp in params["x_layers"]:
        lang, visn = lxrt_x_layer(xp, lang, ext_mask, visn, ext_vmask, num_heads)

    pooled = bert_pooler(params["pooler"], lang)
    return (lang, visn), pooled


# ----------------------------------------------------------------------------
# Parameter initialization (init_bert_weights: N(0, 0.02), LN=1/0, bias=0)
# ----------------------------------------------------------------------------

def init_dense(key, din, dout):
    w = jax.random.normal(key, (din, dout), jnp.float32) * 0.02
    b = jnp.zeros((dout,), jnp.float32)
    return {"w": w, "b": b}


def init_ln(h):
    return {"g": jnp.ones((h,), jnp.float32), "b": jnp.zeros((h,), jnp.float32)}


def init_attention(key, h):
    kq, kk, kv = jax.random.split(key, 3)
    return {"q": init_dense(kq, h, h), "k": init_dense(kk, h, h), "v": init_dense(kv, h, h)}


def init_att_output(key, h):
    return {"dense": init_dense(key, h, h), "ln": init_ln(h)}


def init_selfatt_layer(key, h):
    k1, k2 = jax.random.split(key, 2)
    return {"att": init_attention(k1, h), "out": init_att_output(k2, h)}


def init_bert_layer(key, h, inter):
    k1, k2, k3 = jax.random.split(key, 3)
    return {"attn": init_selfatt_layer(k1, h),
            "inter": init_dense(k2, h, inter),
            "output": {"dense": init_dense(k3, inter, h), "ln": init_ln(h)}}


def init_x_layer(key, h, inter):
    ks = jax.random.split(key, 7)
    return {"visual_attention": init_selfatt_layer(ks[0], h),
            "lang_self_att": init_selfatt_layer(ks[1], h),
            "visn_self_att": init_selfatt_layer(ks[2], h),
            "lang_inter": init_dense(ks[3], h, inter),
            "lang_output": {"dense": init_dense(ks[4], inter, h), "ln": init_ln(h)},
            "visn_inter": init_dense(ks[5], h, inter),
            "visn_output": {"dense": init_dense(ks[6], inter, h), "ln": init_ln(h)}}


def init_lxrt_params(key, *, vocab, max_pos, type_vocab, hidden, inter,
                     vfeat_dim, vpos_dim, l_layers, r_layers, x_layers):
    keys = jax.random.split(key, 8 + l_layers + r_layers + x_layers)
    it = iter(keys)
    params = {}
    params["embeddings"] = {
        "word": jax.random.normal(next(it), (vocab, hidden), jnp.float32) * 0.02,
        "pos": jax.random.normal(next(it), (max_pos, hidden), jnp.float32) * 0.02,
        "type": jax.random.normal(next(it), (type_vocab, hidden), jnp.float32) * 0.02,
        "ln": init_ln(hidden),
    }
    params["visn_fc"] = {
        "visn_fc": init_dense(next(it), vfeat_dim, hidden),
        "visn_ln": init_ln(hidden),
        "box_fc": init_dense(next(it), vpos_dim, hidden),
        "box_ln": init_ln(hidden),
    }
    params["l_layers"] = [init_bert_layer(next(it), hidden, inter) for _ in range(l_layers)]
    params["r_layers"] = [init_bert_layer(next(it), hidden, inter) for _ in range(r_layers)]
    params["x_layers"] = [init_x_layer(next(it), hidden, inter) for _ in range(x_layers)]
    params["pooler"] = {"dense": init_dense(next(it), hidden, hidden)}
    return params


# ----------------------------------------------------------------------------
# Parameter preparation: bf16 weights, fused QKV/KV matrices, packed LN params
# ----------------------------------------------------------------------------

def _prep_dense(p):
    return {"w": p["w"].astype(PARAM_DTYPE), "b": p["b"].astype(jnp.float32)}


def _prep_dense_ln(dense, ln):
    # pack (bias, gamma, beta) into one (3, N) f32 array -> single DMA in the fused kernel
    return {"w": dense["w"].astype(PARAM_DTYPE),
            "pack": jnp.stack([dense["b"], ln["g"], ln["b"]]).astype(jnp.float32)}


def _prep_attention_self(p):
    # fused QKV: one (H, 3H) matmul for self-attention (query == context)
    return {"wqkv": jnp.concatenate([p["q"]["w"], p["k"]["w"], p["v"]["w"]],
                                    axis=1).astype(PARAM_DTYPE),
            "bqkv": jnp.concatenate([p["q"]["b"], p["k"]["b"], p["v"]["b"]]).astype(jnp.float32)}


def _prep_attention_cross(p):
    # Q stays separate (hidden side), K/V fused (context side)
    return {"wq": p["q"]["w"].astype(PARAM_DTYPE),
            "bq": p["q"]["b"].astype(jnp.float32),
            "wkv": jnp.concatenate([p["k"]["w"], p["v"]["w"]], axis=1).astype(PARAM_DTYPE),
            "bkv": jnp.concatenate([p["k"]["b"], p["v"]["b"]]).astype(jnp.float32)}


def _prep_selfatt(p):
    return {"att": _prep_attention_self(p["att"]),
            "out": _prep_dense_ln(p["out"]["dense"], p["out"]["ln"])}


def _prep_crossatt(p):
    return {"att": _prep_attention_cross(p["att"]),
            "out": _prep_dense_ln(p["out"]["dense"], p["out"]["ln"])}


def _prep_bert_layer(p):
    return {"attn": _prep_selfatt(p["attn"]),
            "inter": _prep_dense(p["inter"]),
            "output": _prep_dense_ln(p["output"]["dense"], p["output"]["ln"])}


def _prep_x_layer(p):
    return {"visual_attention": _prep_crossatt(p["visual_attention"]),
            "lang_self_att": _prep_selfatt(p["lang_self_att"]),
            "visn_self_att": _prep_selfatt(p["visn_self_att"]),
            "lang_inter": _prep_dense(p["lang_inter"]),
            "lang_output": _prep_dense_ln(p["lang_output"]["dense"], p["lang_output"]["ln"]),
            "visn_inter": _prep_dense(p["visn_inter"]),
            "visn_output": _prep_dense_ln(p["visn_output"]["dense"], p["visn_output"]["ln"])}


def prepare_params(params):
    emb = params["embeddings"]
    vfc = params["visn_fc"]
    return {
        "embeddings": {
            "word": emb["word"].astype(PARAM_DTYPE),
            "pos": emb["pos"].astype(PARAM_DTYPE),
            "type": emb["type"].astype(PARAM_DTYPE),
            "ln_pack": jnp.stack([emb["ln"]["g"], emb["ln"]["b"]]).astype(jnp.float32),
        },
        "visn_fc": {
            "visn_fc": _prep_dense_ln(vfc["visn_fc"], vfc["visn_ln"]),
            "box_fc": _prep_dense_ln(vfc["box_fc"], vfc["box_ln"]),
        },
        "l_layers": [_prep_bert_layer(p) for p in params["l_layers"]],
        "r_layers": [_prep_bert_layer(p) for p in params["r_layers"]],
        "x_layers": [_prep_x_layer(p) for p in params["x_layers"]],
        "pooler": {"dense": {"w": params["pooler"]["dense"]["w"].astype(jnp.float32),
                             "b": params["pooler"]["dense"]["b"].astype(jnp.float32)}},
    }


# ----------------------------------------------------------------------------
# Main
# ----------------------------------------------------------------------------

if __name__ == "__main__":
    # Small, module-consistent config (scaled down from hidden=3072 / heads=4 / inter=384).
    B, L, V = 2, 8, 8             # batch, lang seq, vision regions
    HIDDEN, HEADS, INTER = 64, 4, 32
    VOCAB, MAX_POS, TYPE_VOCAB = 100, 16, 2
    VFEAT_DIM, VPOS_DIM = 32, 8
    L_LAYERS, R_LAYERS, X_LAYERS = 2, 1, 1

    root = jax.random.PRNGKey(0)
    kp, k_ids, k_feat, k_box = jax.random.split(root, 4)

    raw_params = init_lxrt_params(
        kp, vocab=VOCAB, max_pos=MAX_POS, type_vocab=TYPE_VOCAB,
        hidden=HIDDEN, inter=INTER, vfeat_dim=VFEAT_DIM, vpos_dim=VPOS_DIM,
        l_layers=L_LAYERS, r_layers=R_LAYERS, x_layers=X_LAYERS)
    params = prepare_params(raw_params)

    input_ids = jax.random.randint(k_ids, (B, L), 0, VOCAB, dtype=jnp.int32)
    token_type_ids = jnp.zeros((B, L), jnp.int32)
    attention_mask = jnp.ones((B, L), jnp.int32).at[:, -2:].set(0)   # mask last 2 tokens
    visual_feats = jax.random.normal(k_feat, (B, V, VFEAT_DIM), jnp.float32)
    visual_pos = jax.random.uniform(k_box, (B, V, VPOS_DIM), jnp.float32)

    fwd = jax.jit(functools.partial(lxrt_model_forward, num_heads=HEADS))
    (lang_out, visn_out), pooled = fwd(
        params, input_ids, token_type_ids=token_type_ids,
        attention_mask=attention_mask,
        visual_feats=(visual_feats, visual_pos),
        visual_attention_mask=None)

    jax.block_until_ready((lang_out, visn_out, pooled))
    assert lang_out.shape == (B, L, HIDDEN)
    assert visn_out.shape == (B, V, HIDDEN)
    assert pooled.shape == (B, HIDDEN)
    print("KERNEL_OK")
</pallas_src>

<mosaic_0001>
module attributes {stable_mosaic.version = 11 : i64} {
  func.func @_layernorm_kernel(%arg0: i32, %arg1: memref<8x64xbf16, #tpu.memory_space<vmem>>, %arg2: memref<2x64xf32, #tpu.memory_space<vmem>>, %arg3: memref<8x64xbf16, #tpu.memory_space<vmem>>) attributes {dimension_semantics = [#tpu.dimension_semantics<parallel>], iteration_bounds = array<i64: 2>, scalar_prefetch = 0 : i64, scratch_operands = 0 : i64, tpu.core_type = #tpu.core_type<tc>, window_params = [{transform_indices = @transform_0, window_bounds = array<i64: 8, 64>}, {pipeline_mode = #tpu.pipeline_mode<synchronous>, transform_indices = @transform_1, window_bounds = array<i64: 2, 64>}, {transform_indices = @transform_2, window_bounds = array<i64: 8, 64>}]} {
    %c0 = arith.constant 0 : index
    %c0_0 = arith.constant 0 : index
    %0 = vector.load %arg1[%c0, %c0_0] : memref<8x64xbf16, #tpu.memory_space<vmem>>, vector<8x64xbf16>
    %1 = arith.extf %0 : vector<8x64xbf16> to vector<8x64xf32>
    %cst = arith.constant dense<0.000000e+00> : vector<8xf32>
    %2 = vector.multi_reduction <add>, %1, %cst [1] : vector<8x64xf32> to vector<8xf32>
    %3 = vector.shape_cast %2 : vector<8xf32> to vector<8x1xf32>
    %cst_1 = arith.constant 6.400000e+01 : f32
    %4 = vector.broadcast %cst_1 : f32 to vector<8x1xf32>
    %5 = arith.divf %3, %4 : vector<8x1xf32>
    %6 = vector.broadcast %5 : vector<8x1xf32> to vector<8x64xf32>
    %7 = arith.subf %1, %6 : vector<8x64xf32>
    %8 = arith.mulf %7, %7 : vector<8x64xf32>
    %cst_2 = arith.constant dense<0.000000e+00> : vector<8xf32>
    %9 = vector.multi_reduction <add>, %8, %cst_2 [1] : vector<8x64xf32> to vector<8xf32>
    %10 = vector.shape_cast %9 : vector<8xf32> to vector<8x1xf32>
    %cst_3 = arith.constant 6.400000e+01 : f32
    %11 = vector.broadcast %cst_3 : f32 to vector<8x1xf32>
    %12 = arith.divf %10, %11 : vector<8x1xf32>
    %13 = vector.broadcast %5 : vector<8x1xf32> to vector<8x64xf32>
    %14 = arith.subf %1, %13 : vector<8x64xf32>
    %cst_4 = arith.constant 9.99999996E-13 : f32
    %15 = vector.broadcast %cst_4 : f32 to vector<8x1xf32>
    %16 = arith.addf %12, %15 : vector<8x1xf32>
    %17 = math.rsqrt %16 : vector<8x1xf32>
    %18 = vector.broadcast %17 : vector<8x1xf32> to vector<8x64xf32>
    %19 = arith.mulf %14, %18 : vector<8x64xf32>
    %c0_5 = arith.constant 0 : index
    %c0_6 = arith.constant 0 : index
    %20 = vector.load %arg2[%c0_5, %c0_6] : memref<2x64xf32, #tpu.memory_space<vmem>>, vector<1x64xf32>
    %21 = vector.broadcast %20 : vector<1x64xf32> to vector<8x64xf32>
    %22 = arith.mulf %19, %21 : vector<8x64xf32>
    %c1 = arith.constant 1 : index
    %c0_7 = arith.constant 0 : index
    %23 = vector.load %arg2[%c1, %c0_7] : memref<2x64xf32, #tpu.memory_space<vmem>>, vector<1x64xf32>
    %24 = vector.broadcast %23 : vector<1x64xf32> to vector<8x64xf32>
    %25 = arith.addf %22, %24 : vector<8x64xf32>
    %26 = arith.truncf %25 : vector<8x64xf32> to vector<8x64xbf16>
    %c0_8 = arith.constant 0 : index
    %c0_9 = arith.constant 0 : index
    %27 = vector.load %arg3[%c0_8, %c0_9] : memref<8x64xbf16, #tpu.memory_space<vmem>>, vector<8x64xbf16>
    tpu.vector_store %arg3[%c0_8, %c0_9], %26 {strides = array<i32>} : memref<8x64xbf16, #tpu.memory_space<vmem>>, vector<8x64xbf16>,
    return
  }
  func.func @transform_0(%arg0: i32) -> (i32, i32) {
    %c0_i32 = arith.constant 0 : i32
    %c0_i32_0 = arith.constant 0 : i32
    return %arg0, %c0_i32 : i32, i32
  }
  func.func @transform_1(%arg0: i32) -> (i32, i32) {
    %c0_i32 = arith.constant 0 : i32
    %c0_i32_0 = arith.constant 0 : i32
    %c0_i32_1 = arith.constant 0 : i32
    return %c0_i32, %c0_i32_0 : i32, i32
  }
  func.func @transform_2(%arg0: i32) -> (i32, i32) {
    %c0_i32 = arith.constant 0 : i32
    %c0_i32_0 = arith.constant 0 : i32
    return %arg0, %c0_i32 : i32, i32
  }
}

module attributes {stable_mosaic.version = 11 : i64} {
  func.func @_linear_resident_kernel(%arg0: i32, %arg1: memref<8x64xbf16, #tpu.memory_space<vmem>>, %arg2: memref<64x192xbf16, #tpu.memory_space<vmem>>, %arg3: memref<1x192xf32, #tpu.memory_space<vmem>>, %arg4: memref<8x192xbf16, #tpu.memory_space<vmem>>) attributes {dimension_semantics = [#tpu.dimension_semantics<parallel>], iteration_bounds = array<i64: 2>, scalar_prefetch = 0 : i64, scratch_operands = 0 : i64, tpu.core_type = #tpu.core_type<tc>, window_params = [{transform_indices = @transform_0, window_bounds = array<i64: 8, 64>}, {pipeline_mode = #tpu.pipeline_mode<synchronous>, transform_indices = @transform_1, window_bounds = array<i64: 64, 192>}, {pipeline_mode = #tpu.pipeline_mode<synchronous>, transform_indices = @transform_2, window_bounds = array<i64: 1, 192>}, {transform_indices = @transform_3, window_bounds = array<i64: 8, 192>}]} {
    %c0 = arith.constant 0 : index
    %c0_0 = arith.constant 0 : index
    %0 = vector.load %arg1[%c0, %c0_0] : memref<8x64xbf16, #tpu.memory_space<vmem>>, vector<8x64xbf16>
    %c0_1 = arith.constant 0 : index
    %c0_2 = arith.constant 0 : index
    %1 = vector.load %arg2[%c0_1, %c0_2] : memref<64x192xbf16, #tpu.memory_space<vmem>>, vector<64x192xbf16>
    %cst = arith.constant dense<0.000000e+00> : vector<8x192xf32>
    %2 = tpu.matmul %0, %1, %cst {dimension_numbers = #tpu.dot_dimension_numbers<[1], [0], [0], [1], [0, 0, 1, 1], [], []>} : vector<8x64xbf16>, vector<64x192xbf16>, vector<8x192xf32> -> vector<8x192xf32>
    %c0_3 = arith.constant 0 : index
    %c0_4 = arith.constant 0 : index
    %3 = vector.load %arg3[%c0_3, %c0_4] : memref<1x192xf32, #tpu.memory_space<vmem>>, vector<1x192xf32>
    %4 = vector.broadcast %3 : vector<1x192xf32> to vector<8x192xf32>
    %5 = arith.addf %2, %4 : vector<8x192xf32>
    %6 = arith.truncf %5 : vector<8x192xf32> to vector<8x192xbf16>
    %c0_5 = arith.constant 0 : index
    %c0_6 = arith.constant 0 : index
    %7 = vector.load %arg4[%c0_5, %c0_6] : memref<8x192xbf16, #tpu.memory_space<vmem>>, vector<8x192xbf16>
    tpu.vector_store %arg4[%c0_5, %c0_6], %6 {strides = array<i32>} : memref<8x192xbf16, #tpu.memory_space<vmem>>, vector<8x192xbf16>,
    return
  }
  func.func @transform_0(%arg0: i32) -> (i32, i32) {
    %c0_i32 = arith.constant 0 : i32
    %c0_i32_0 = arith.constant 0 : i32
    return %arg0, %c0_i32 : i32, i32
  }
  func.func @transform_1(%arg0: i32) -> (i32, i32) {
    %c0_i32 = arith.constant 0 : i32
    %c0_i32_0 = arith.constant 0 : i32
    %c0_i32_1 = arith.constant 0 : i32
    return %c0_i32, %c0_i32_0 : i32, i32
  }
  func.func @transform_2(%arg0: i32) -> (i32, i32) {
    %c0_i32 = arith.constant 0 : i32
    %c0_i32_0 = arith.constant 0 : i32
    %c0_i32_1 = arith.constant 0 : i32
    return %c0_i32, %c0_i32_0 : i32, i32
  }
  func.func @transform_3(%arg0: i32) -> (i32, i32) {
    %c0_i32 = arith.constant 0 : i32
    %c0_i32_0 = arith.constant 0 : i32
    return %arg0, %c0_i32 : i32, i32
  }
}

module attributes {stable_mosaic.version = 11 : i64} {
  func.func @_self_attention_kernel(%arg0: i32, %arg1: memref<1x8x192xbf16, #tpu.memory_space<vmem>>, %arg2: memref<1x1x8xf32, #tpu.memory_space<vmem>>, %arg3: memref<1x8x64xbf16, #tpu.memory_space<vmem>>, %arg4: memref<1x8x64xf32, #tpu.memory_space<vmem>>) attributes {dimension_semantics = [#tpu.dimension_semantics<parallel>], iteration_bounds = array<i64: 2>, scalar_prefetch = 0 : i64, scratch_operands = 1 : i64, tpu.core_type = #tpu.core_type<tc>, window_params = [{transform_indices = @transform_0, window_bounds = array<i64: 1, 8, 192>}, {transform_indices = @transform_1, window_bounds = array<i64: 1, 1, 8>}, {transform_indices = @transform_2, window_bounds = array<i64: 1, 8, 64>}]} {
    %c0 = arith.constant 0 : index
    %c0_0 = arith.constant 0 : index
    %c0_1 = arith.constant 0 : index
    %0 = vector.load %arg2[%c0, %c0_0, %c0_1] : memref<1x1x8xf32, #tpu.memory_space<vmem>>, vector<1x1x8xf32>
    %c0_2 = arith.constant 0 : index
    %c0_3 = arith.constant 0 : index
    %c0_4 = arith.constant 0 : index
    %1 = vector.load %arg1[%c0_2, %c0_3, %c0_4] : memref<1x8x192xbf16, #tpu.memory_space<vmem>>, vector<1x8x16xbf16>
    %c0_5 = arith.constant 0 : index
    %c0_6 = arith.constant 0 : index
    %c64 = arith.constant 64 : index
    %2 = vector.load %arg1[%c0_5, %c0_6, %c64] : memref<1x8x192xbf16, #tpu.memory_space<vmem>>, vector<1x8x16xbf16>
    %c0_7 = arith.constant 0 : index
    %c0_8 = arith.constant 0 : index
    %c128 = arith.constant 128 : index
    %3 = vector.load %arg1[%c0_7, %c0_8, %c128] : memref<1x8x192xbf16, #tpu.memory_space<vmem>>, vector<1x8x16xbf16>
    "tpu.trace_start"() <{level = 10 : i32, message = "bqd,bkd->bqk"}> : () -> ()
    %cst = arith.constant dense<0.000000e+00> : vector<1x8x8xf32>
    %4 = tpu.matmul %1, %2, %cst {dimension_numbers = #tpu.dot_dimension_numbers<[2], [2], [1], [1], [0, 0, 0, 1, 1, 1], [0], [0]>} : vector<1x8x16xbf16>, vector<1x8x16xbf16>, vector<1x8x8xf32> -> vector<1x8x8xf32>
    "tpu.trace_stop"() : () -> ()
    %cst_9 = arith.constant 2.500000e-01 : f32
    %5 = vector.broadcast %cst_9 : f32 to vector<1x8x8xf32>
    %6 = arith.mulf %4, %5 : vector<1x8x8xf32>
    %7 = vector.broadcast %0 : vector<1x1x8xf32> to vector<1x8x8xf32>
    %8 = arith.addf %6, %7 : vector<1x8x8xf32>
    %cst_10 = arith.constant dense<0xFF800000> : vector<1x8xf32>
    %9 = vector.multi_reduction <maximumf>, %8, %cst_10 [2] : vector<1x8x8xf32> to vector<1x8xf32>
    %10 = vector.shape_cast %9 : vector<1x8xf32> to vector<1x8x1xf32>
    %11 = vector.broadcast %10 : vector<1x8x1xf32> to vector<1x8x8xf32>
    %12 = arith.subf %8, %11 : vector<1x8x8xf32>
    %13 = math.exp %12 : vector<1x8x8xf32>
    %cst_11 = arith.constant dense<0.000000e+00> : vector<1x8xf32>
    %14 = vector.multi_reduction <add>, %13, %cst_11 [2] : vector<1x8x8xf32> to vector<1x8xf32>
    %15 = vector.shape_cast %14 : vector<1x8xf32> to vector<1x8x1xf32>
    %16 = tpu.reciprocal %15 {approx = true} : vector<1x8x1xf32> -> vector<1x8x1xf32>
    %17 = vector.broadcast %16 : vector<1x8x1xf32> to vector<1x8x8xf32>
    %18 = arith.mulf %13, %17 : vector<1x8x8xf32>
    %19 = arith.truncf %18 : vector<1x8x8xf32> to vector<1x8x8xbf16>
    "tpu.trace_start"() <{level = 10 : i32, message = "bqk,bkd->bqd"}> : () -> ()
    %cst_12 = arith.constant dense<0.000000e+00> : vector<1x8x16xf32>
    %20 = tpu.matmul %19, %3, %cst_12 {dimension_numbers = #tpu.dot_dimension_numbers<[2], [1], [1], [2], [0, 0, 0, 1, 1, 2], [0], [0]>} : vector<1x8x8xbf16>, vector<1x8x16xbf16>, vector<1x8x16xf32> -> vector<1x8x16xf32>
    "tpu.trace_stop"() : () -> ()
    %c0_13 = arith.constant 0 : index
    %c0_14 = arith.constant 0 : index
    %c0_15 = arith.constant 0 : index
    %21 = vector.load %arg4[%c0_13, %c0_14, %c0_15] : memref<1x8x64xf32, #tpu.memory_space<vmem>>, vector<1x8x16xf32>
    tpu.vector_store %arg4[%c0_13, %c0_14, %c0_15], %20 {strides = array<i32>} : memref<1x8x64xf32, #tpu.memory_space<vmem>>, vector<1x8x16xf32>,
    %c0_16 = arith.constant 0 : index
    %c0_17 = arith.constant 0 : index
    %c16 = arith.constant 16 : index
    %22 = vector.load %arg1[%c0_16, %c0_17, %c16] : memref<1x8x192xbf16, #tpu.memory_space<vmem>>, vector<1x8x16xbf16>
    %c0_18 = arith.constant 0 : index
    %c0_19 = arith.constant 0 : index
    %c80 = arith.constant 80 : index
    %23 = vector.load %arg1[%c0_18, %c0_19, %c80] : memref<1x8x192xbf16, #tpu.memory_space<vmem>>, vector<1x8x16xbf16>
    %c0_20 = arith.constant 0 : index
    %c0_21 = arith.constant 0 : index
    %c144 = arith.constant 144 : index
    %24 = vector.load %arg1[%c0_20, %c0_21, %c144] : memref<1x8x192xbf16, #tpu.memory_space<vmem>>, vector<1x8x16xbf16>
    "tpu.trace_start"() <{level = 10 : i32, message = "bqd,bkd->bqk"}> : () -> ()
    %cst_22 = arith.constant dense<0.000000e+00> : vector<1x8x8xf32>
    %25 = tpu.matmul %22, %23, %cst_22 {dimension_numbers = #tpu.dot_dimension_numbers<[2], [2], [1], [1], [0, 0, 0, 1, 1, 1], [0], [0]>} : vector<1x8x16xbf16>, vector<1x8x16xbf16>, vector<1x8x8xf32> -> vector<1x8x8xf32>
    "tpu.trace_stop"() : () -> ()
    %cst_23 = arith.constant 2.500000e-01 : f32
    %26 = vector.broadcast %cst_23 : f32 to vector<1x8x8xf32>
    %27 = arith.mulf %25, %26 : vector<1x8x8xf32>
    %28 = vector.broadcast %0 : vector<1x1x8xf32> to vector<1x8x8xf32>
    %29 = arith.addf %27, %28 : vector<1x8x8xf32>
    %cst_24 = arith.constant dense<0xFF800000> : vector<1x8xf32>
    %30 = vector.multi_reduction <maximumf>, %29, %cst_24 [2] : vector<1x8x8xf32> to vector<1x8xf32>
    %31 = vector.shape_cast %30 : vector<1x8xf32> to vector<1x8x1xf32>
    %32 = vector.broadcast %31 : vector<1x8x1xf32> to vector<1x8x8xf32>
    %33 = arith.subf %29, %32 : vector<1x8x8xf32>
    %34 = math.exp %33 : vector<1x8x8xf32>
    %cst_25 = arith.constant dense<0.000000e+00> : vector<1x8xf32>
    %35 = vector.multi_reduction <add>, %34, %cst_25 [2] : vector<1x8x8xf32> to vector<1x8xf32>
    %36 = vector.shape_cast %35 : vector<1x8xf32> to vector<1x8x1xf32>
    %37 = tpu.reciprocal %36 {approx = true} : vector<1x8x1xf32> -> vector<1x8x1xf32>
    %38 = vector.broadcast %37 : vector<1x8x1xf32> to vector<1x8x8xf32>
    %39 = arith.mulf %34, %38 : vector<1x8x8xf32>
    %40 = arith.truncf %39 : vector<1x8x8xf32> to vector<1x8x8xbf16>
    "tpu.trace_start"() <{level = 10 : i32, message = "bqk,bkd->bqd"}> : () -> ()
    %cst_26 = arith.constant dense<0.000000e+00> : vector<1x8x16xf32>
    %41 = tpu.matmul %40, %24, %cst_26 {dimension_numbers = #tpu.dot_dimension_numbers<[2], [1], [1], [2], [0, 0, 0, 1, 1, 2], [0], [0]>} : vector<1x8x8xbf16>, vector<1x8x16xbf16>, vector<1x8x16xf32> -> vector<1x8x16xf32>
    "tpu.trace_stop"() : () -> ()
    %c0_27 = arith.constant 0 : index
    %c0_28 = arith.constant 0 : index
    %c16_29 = arith.constant 16 : index
    %42 = vector.load %arg4[%c0_27, %c0_28, %c16_29] : memref<1x8x64xf32, #tpu.memory_space<vmem>>, vector<1x8x16xf32>
    tpu.vector_store %arg4[%c0_27, %c0_28, %c16_29], %41 {strides = array<i32>} : memref<1x8x64xf32, #tpu.memory_space<vmem>>, vector<1x8x16xf32>,
    %c0_30 = arith.constant 0 : index
    %c0_31 = arith.constant 0 : index
    %c32 = arith.constant 32 : index
    %43 = vector.load %arg1[%c0_30, %c0_31, %c32] : memref<1x8x192xbf16, #tpu.memory_space<vmem>>, vector<1x8x16xbf16>
    %c0_32 = arith.constant 0 : index
    %c0_33 = arith.constant 0 : index
    %c96 = arith.constant 96 : index
    %44 = vector.load %arg1[%c0_32, %c0_33, %c96] : memref<1x8x192xbf16, #tpu.memory_space<vmem>>, vector<1x8x16xbf16>
    %c0_34 = arith.constant 0 : index
    %c0_35 = arith.constant 0 : index
    %c160 = arith.constant 160 : index
    %45 = vector.load %arg1[%c0_34, %c0_35, %c160] : memref<1x8x192xbf16, #tpu.memory_space<vmem>>, vector<1x8x16xbf16>
    "tpu.trace_start"() <{level = 10 : i32, message = "bqd,bkd->bqk"}> : () -> ()
    %cst_36 = arith.constant dense<0.000000e+00> : vector<1x8x8xf32>
    %46 = tpu.matmul %43, %44, %cst_36 {dimension_numbers = #tpu.dot_dimension_numbers<[2], [2], [1], [1], [0, 0, 0, 1, 1, 1], [0], [0]>} : vector<1x8x16xbf16>, vector<1x8x16xbf16>, vector<1x8x8xf32> -> vector<1x8x8xf32>
    "tpu.trace_stop"() : () -> ()
    %cst_37 = arith.constant 2.500000e-01 : f32
    %47 = vector.broadcast %cst_37 : f32 to vector<1x8x8xf32>
    %48 = arith.mulf %46, %47 : vector<1x8x8xf32>
    %49 = vector.broadcast %0 : vector<1x1x8xf32> to vector<1x8x8xf32>
    %50 = arith.addf %48, %49 : vector<1x8x8xf32>
    %cst_38 = arith.constant dense<0xFF800000> : vector<1x8xf32>
    %51 = vector.multi_reduction <maximumf>, %50, %cst_38 [2] : vector<1x8x8xf32> to vector<1x8xf32>
    %52 = vector.shape_cast %51 : vector<1x8xf32> to vector<1x8x1xf32>
    %53 = vector.broadcast %52 : vector<1x8x1xf32> to vector<1x8x8xf32>
    %54 = arith.subf %50, %53 : vector<1x8x8xf32>
    %55 = math.exp %54 : vector<1x8x8xf32>
    %cst_39 = arith.constant dense<0.000000e+00> : vector<1x8xf32>
    %56 = vector.multi_reduction <add>, %55, %cst_39 [2] : vector<1x8x8xf32> to vector<1x8xf32>
    %57 = vector.shape_cast %56 : vector<1x8xf32> to vector<1x8x1xf32>
    %58 = tpu.reciprocal %57 {approx = true} : vector<1x8x1xf32> -> vector<1x8x1xf32>
    %59 = vector.broadcast %58 : vector<1x8x1xf32> to vector<1x8x8xf32>
    %60 = arith.mulf %55, %59 : vector<1x8x8xf32>
    %61 = arith.truncf %60 : vector<1x8x8xf32> to vector<1x8x8xbf16>
    "tpu.trace_start"() <{level = 10 : i32, message = "bqk,bkd->bqd"}> : () -> ()
    %cst_40 = arith.constant dense<0.000000e+00> : vector<1x8x16xf32>
    %62 = tpu.matmul %61, %45, %cst_40 {dimension_numbers = #tpu.dot_dimension_numbers<[2], [1], [1], [2], [0, 0, 0, 1, 1, 2], [0], [0]>} : vector<1x8x8xbf16>, vector<1x8x16xbf16>, vector<1x8x16xf32> -> vector<1x8x16xf32>
    "tpu.trace_stop"() : () -> ()
    %c0_41 = arith.constant 0 : index
    %c0_42 = arith.constant 0 : index
    %c32_43 = arith.constant 32 : index
    %63 = vector.load %arg4[%c0_41, %c0_42, %c32_43] : memref<1x8x64xf32, #tpu.memory_space<vmem>>, vector<1x8x16xf32>
    tpu.vector_store %arg4[%c0_41, %c0_42, %c32_43], %62 {strides = array<i32>} : memref<1x8x64xf32, #tpu.memory_space<vmem>>, vector<1x8x16xf32>,
    %c0_44 = arith.constant 0 : index
    %c0_45 = arith.constant 0 : index
    %c48 = arith.constant 48 : index
    %64 = vector.load %arg1[%c0_44, %c0_45, %c48] : memref<1x8x192xbf16, #tpu.memory_space<vmem>>, vector<1x8x16xbf16>
    %c0_46 = arith.constant 0 : index
    %c0_47 = arith.constant 0 : index
    %c112 = arith.constant 112 : index
    %65 = vector.load %arg1[%c0_46, %c0_47, %c112] : memref<1x8x192xbf16, #tpu.memory_space<vmem>>, vector<1x8x16xbf16>
    %c0_48 = arith.constant 0 : index
    %c0_49 = arith.constant 0 : index
    %c176 = arith.constant 176 : index
    %66 = vector.load %arg1[%c0_48, %c0_49, %c176] : memref<1x8x192xbf16, #tpu.memory_space<vmem>>, vector<1x8x16xbf16>
    "tpu.trace_start"() <{level = 10 : i32, message = "bqd,bkd->bqk"}> : () -> ()
    %cst_50 = arith.constant dense<0.000000e+00> : vector<1x8x8xf32>
    %67 = tpu.matmul %64, %65, %cst_50 {dimension_numbers = #tpu.dot_dimension_numbers<[2], [2], [1], [1], [0, 0, 0, 1, 1, 1], [0], [0]>} : vector<1x8x16xbf16>, vector<1x8x16xbf16>, vector<1x8x8xf32> -> vector<1x8x8xf32>
    "tpu.trace_stop"() : () -> ()
    %cst_51 = arith.constant 2.500000e-01 : f32
    %68 = vector.broadcast %cst_51 : f32 to vector<1x8x8xf32>
    %69 = arith.mulf %67, %68 : vector<1x8x8xf32>
    %70 = vector.broadcast %0 : vector<1x1x8xf32> to vector<1x8x8xf32>
    %71 = arith.addf %69, %70 : vector<1x8x8xf32>
    %cst_52 = arith.constant dense<0xFF800000> : vector<1x8xf32>
    %72 = vector.multi_reduction <maximumf>, %71, %cst_52 [2] : vector<1x8x8xf32> to vector<1x8xf32>
    %73 = vector.shape_cast %72 : vector<1x8xf32> to vector<1x8x1xf32>
    %74 = vector.broadcast %73 : vector<1x8x1xf32> to vector<1x8x8xf32>
    %75 = arith.subf %71, %74 : vector<1x8x8xf32>
    %76 = math.exp %75 : vector<1x8x8xf32>
    %cst_53 = arith.constant dense<0.000000e+00> : vector<1x8xf32>
    %77 = vector.multi_reduction <add>, %76, %cst_53 [2] : vector<1x8x8xf32> to vector<1x8xf32>
    %78 = vector.shape_cast %77 : vector<1x8xf32> to vector<1x8x1xf32>
    %79 = tpu.reciprocal %78 {approx = true} : vector<1x8x1xf32> -> vector<1x8x1xf32>
    %80 = vector.broadcast %79 : vector<1x8x1xf32> to vector<1x8x8xf32>
    %81 = arith.mulf %76, %80 : vector<1x8x8xf32>
    %82 = arith.truncf %81 : vector<1x8x8xf32> to vector<1x8x8xbf16>
    "tpu.trace_start"() <{level = 10 : i32, message = "bqk,bkd->bqd"}> : () -> ()
    %cst_54 = arith.constant dense<0.000000e+00> : vector<1x8x16xf32>
    %83 = tpu.matmul %82, %66, %cst_54 {dimension_numbers = #tpu.dot_dimension_numbers<[2], [1], [1], [2], [0, 0, 0, 1, 1, 2], [0], [0]>} : vector<1x8x8xbf16>, vector<1x8x16xbf16>, vector<1x8x16xf32> -> vector<1x8x16xf32>
    "tpu.trace_stop"() : () -> ()
    %c0_55 = arith.constant 0 : index
    %c0_56 = arith.constant 0 : index
    %c48_57 = arith.constant 48 : index
    %84 = vector.load %arg4[%c0_55, %c0_56, %c48_57] : memref<1x8x64xf32, #tpu.memory_space<vmem>>, vector<1x8x16xf32>
    tpu.vector_store %arg4[%c0_55, %c0_56, %c48_57], %83 {strides = array<i32>} : memref<1x8x64xf32, #tpu.memory_space<vmem>>, vector<1x8x16xf32>,
    %c0_58 = arith.constant 0 : index
    %c0_59 = arith.constant 0 : index
    %c0_60 = arith.constant 0 : index
    %85 = vector.load %arg4[%c0_58, %c0_59, %c0_60] : memref<1x8x64xf32, #tpu.memory_space<vmem>>, vector<1x8x64xf32>
    %86 = arith.truncf %85 : vector<1x8x64xf32> to vector<1x8x64xbf16>
    %c0_61 = arith.constant 0 : index
    %c0_62 = arith.constant 0 : index
    %c0_63 = arith.constant 0 : index
    %87 = vector.load %arg3[%c0_61, %c0_62, %c0_63] : memref<1x8x64xbf16, #tpu.memory_space<vmem>>, vector<1x8x64xbf16>
    tpu.vector_store %arg3[%c0_61, %c0_62, %c0_63], %86 {strides = array<i32>} : memref<1x8x64xbf16, #tpu.memory_space<vmem>>, vector<1x8x64xbf16>,
    return
  }
  func.func @transform_0(%arg0: i32) -> (i32, i32, i32) {
    %c0_i32 = arith.constant 0 : i32
    %c0_i32_0 = arith.constant 0 : i32
    %c0_i32_1 = arith.constant 0 : i32
    return %arg0, %c0_i32, %c0_i32_0 : i32, i32, i32
  }
  func.func @transform_1(%arg0: i32) -> (i32, i32, i32) {
    %c0_i32 = arith.constant 0 : i32
    %c0_i32_0 = arith.constant 0 : i32
    %c0_i32_1 = arith.constant 0 : i32
    return %arg0, %c0_i32, %c0_i32_0 : i32, i32, i32
  }
  func.func @transform_2(%arg0: i32) -> (i32, i32, i32) {
    %c0_i32 = arith.constant 0 : i32
    %c0_i32_0 = arith.constant 0 : i32
    %c0_i32_1 = arith.constant 0 : i32
    return %arg0, %c0_i32, %c0_i32_0 : i32, i32, i32
  }
}

module attributes {stable_mosaic.version = 11 : i64} {
  func.func @_linear_ln_resident_kernel(%arg0: i32, %arg1: memref<8x64xbf16, #tpu.memory_space<vmem>>, %arg2: memref<64x64xbf16, #tpu.memory_space<vmem>>, %arg3: memref<3x64xf32, #tpu.memory_space<vmem>>, %arg4: memref<8x64xbf16, #tpu.memory_space<vmem>>, %arg5: memref<8x64xbf16, #tpu.memory_space<vmem>>) attributes {dimension_semantics = [#tpu.dimension_semantics<parallel>], iteration_bounds = array<i64: 2>, scalar_prefetch = 0 : i64, scratch_operands = 0 : i64, tpu.core_type = #tpu.core_type<tc>, window_params = [{transform_indices = @transform_0, window_bounds = array<i64: 8, 64>}, {pipeline_mode = #tpu.pipeline_mode<synchronous>, transform_indices = @transform_1, window_bounds = array<i64: 64, 64>}, {pipeline_mode = #tpu.pipeline_mode<synchronous>, transform_indices = @transform_2, window_bounds = array<i64: 3, 64>}, {transform_indices = @transform_3, window_bounds = array<i64: 8, 64>}, {transform_indices = @transform_4, window_bounds = array<i64: 8, 64>}]} {
    %c0 = arith.constant 0 : index
    %c0_0 = arith.constant 0 : index
    %0 = vector.load %arg1[%c0, %c0_0] : memref<8x64xbf16, #tpu.memory_space<vmem>>, vector<8x64xbf16>
    %c0_1 = arith.constant 0 : index
    %c0_2 = arith.constant 0 : index
    %1 = vector.load %arg2[%c0_1, %c0_2] : memref<64x64xbf16, #tpu.memory_space<vmem>>, vector<64x64xbf16>
    %cst = arith.constant dense<0.000000e+00> : vector<8x64xf32>
    %2 = tpu.matmul %0, %1, %cst {dimension_numbers = #tpu.dot_dimension_numbers<[1], [0], [0], [1], [0, 0, 1, 1], [], []>} : vector<8x64xbf16>, vector<64x64xbf16>, vector<8x64xf32> -> vector<8x64xf32>
    %c0_3 = arith.constant 0 : index
    %c0_4 = arith.constant 0 : index
    %3 = vector.load %arg3[%c0_3, %c0_4] : memref<3x64xf32, #tpu.memory_space<vmem>>, vector<1x64xf32>
    %4 = vector.broadcast %3 : vector<1x64xf32> to vector<8x64xf32>
    %5 = arith.addf %2, %4 : vector<8x64xf32>
    %c0_5 = arith.constant 0 : index
    %c0_6 = arith.constant 0 : index
    %6 = vector.load %arg4[%c0_5, %c0_6] : memref<8x64xbf16, #tpu.memory_space<vmem>>, vector<8x64xbf16>
    %7 = arith.extf %6 : vector<8x64xbf16> to vector<8x64xf32>
    %8 = arith.addf %5, %7 : vector<8x64xf32>
    %cst_7 = arith.constant dense<0.000000e+00> : vector<8xf32>
    %9 = vector.multi_reduction <add>, %8, %cst_7 [1] : vector<8x64xf32> to vector<8xf32>
    %10 = vector.shape_cast %9 : vector<8xf32> to vector<8x1xf32>
    %cst_8 = arith.constant 6.400000e+01 : f32
    %11 = vector.broadcast %cst_8 : f32 to vector<8x1xf32>
    %12 = arith.divf %10, %11 : vector<8x1xf32>
    %13 = vector.broadcast %12 : vector<8x1xf32> to vector<8x64xf32>
    %14 = arith.subf %8, %13 : vector<8x64xf32>
    %15 = arith.mulf %14, %14 : vector<8x64xf32>
    %cst_9 = arith.constant dense<0.000000e+00> : vector<8xf32>
    %16 = vector.multi_reduction <add>, %15, %cst_9 [1] : vector<8x64xf32> to vector<8xf32>
    %17 = vector.shape_cast %16 : vector<8xf32> to vector<8x1xf32>
    %cst_10 = arith.constant 6.400000e+01 : f32
    %18 = vector.broadcast %cst_10 : f32 to vector<8x1xf32>
    %19 = arith.divf %17, %18 : vector<8x1xf32>
    %20 = vector.broadcast %12 : vector<8x1xf32> to vector<8x64xf32>
    %21 = arith.subf %8, %20 : vector<8x64xf32>
    %cst_11 = arith.constant 9.99999993E-9 : f32
    %22 = vector.broadcast %cst_11 : f32 to vector<8x1xf32>
    %23 = arith.addf %19, %22 : vector<8x1xf32>
    %24 = math.rsqrt %23 : vector<8x1xf32>
    %25 = vector.broadcast %24 : vector<8x1xf32> to vector<8x64xf32>
    %26 = arith.mulf %21, %25 : vector<8x64xf32>
    %c1 = arith.constant 1 : index
    %c0_12 = arith.constant 0 : index
    %27 = vector.load %arg3[%c1, %c0_12] : memref<3x64xf32, #tpu.memory_space<vmem>>, vector<1x64xf32>
    %28 = vector.broadcast %27 : vector<1x64xf32> to vector<8x64xf32>
    %29 = arith.mulf %26, %28 : vector<8x64xf32>
    %c2 = arith.constant 2 : index
    %c0_13 = arith.constant 0 : index
    %30 = vector.load %arg3[%c2, %c0_13] : memref<3x64xf32, #tpu.memory_space<vmem>>, vector<1x64xf32>
    %31 = vector.broadcast %30 : vector<1x64xf32> to vector<8x64xf32>
    %32 = arith.addf %29, %31 : vector<8x64xf32>
    %33 = arith.truncf %32 : vector<8x64xf32> to vector<8x64xbf16>
    %c0_14 = arith.constant 0 : index
    %c0_15 = arith.constant 0 : index
    %34 = vector.load %arg5[%c0_14, %c0_15] : memref<8x64xbf16, #tpu.memory_space<vmem>>, vector<8x64xbf16>
    tpu.vector_store %arg5[%c0_14, %c0_15], %33 {strides = array<i32>} : memref<8x64xbf16, #tpu.memory_space<vmem>>, vector<8x64xbf16>,
    return
  }
  func.func @transform_0(%arg0: i32) -> (i32, i32) {
    %c0_i32 = arith.constant 0 : i32
    %c0_i32_0 = arith.constant 0 : i32
    return %arg0, %c0_i32 : i32, i32
  }
  func.func @transform_1(%arg0: i32) -> (i32, i32) {
    %c0_i32 = arith.constant 0 : i32
    %c0_i32_0 = arith.constant 0 : i32
    %c0_i32_1 = arith.constant 0 : i32
    return %c0_i32, %c0_i32_0 : i32, i32
  }
  func.func @transform_2(%arg0: i32) -> (i32, i32) {
    %c0_i32 = arith.constant 0 : i32
    %c0_i32_0 = arith.constant 0 : i32
    %c0_i32_1 = arith.constant 0 : i32
    return %c0_i32, %c0_i32_0 : i32, i32
  }
  func.func @transform_3(%arg0: i32) -> (i32, i32) {
    %c0_i32 = arith.constant 0 : i32
    %c0_i32_0 = arith.constant 0 : i32
    return %arg0, %c0_i32 : i32, i32
  }
  func.func @transform_4(%arg0: i32) -> (i32, i32) {
    %c0_i32 = arith.constant 0 : i32
    %c0_i32_0 = arith.constant 0 : i32
    return %arg0, %c0_i32 : i32, i32
  }
}

module attributes {stable_mosaic.version = 11 : i64} {
  func.func @_linear_resident_kernel(%arg0: i32, %arg1: memref<8x64xbf16, #tpu.memory_space<vmem>>, %arg2: memref<64x32xbf16, #tpu.memory_space<vmem>>, %arg3: memref<1x32xf32, #tpu.memory_space<vmem>>, %arg4: memref<8x32xbf16, #tpu.memory_space<vmem>>) attributes {dimension_semantics = [#tpu.dimension_semantics<parallel>], iteration_bounds = array<i64: 2>, scalar_prefetch = 0 : i64, scratch_operands = 0 : i64, tpu.core_type = #tpu.core_type<tc>, window_params = [{transform_indices = @transform_0, window_bounds = array<i64: 8, 64>}, {pipeline_mode = #tpu.pipeline_mode<synchronous>, transform_indices = @transform_1, window_bounds = array<i64: 64, 32>}, {pipeline_mode = #tpu.pipeline_mode<synchronous>, transform_indices = @transform_2, window_bounds = array<i64: 1, 32>}, {transform_indices = @transform_3, window_bounds = array<i64: 8, 32>}]} {
    %c0 = arith.constant 0 : index
    %c0_0 = arith.constant 0 : index
    %0 = vector.load %arg1[%c0, %c0_0] : memref<8x64xbf16, #tpu.memory_space<vmem>>, vector<8x64xbf16>
    %c0_1 = arith.constant 0 : index
    %c0_2 = arith.constant 0 : index
    %1 = vector.load %arg2[%c0_1, %c0_2] : memref<64x32xbf16, #tpu.memory_space<vmem>>, vector<64x32xbf16>
    %cst = arith.constant dense<0.000000e+00> : vector<8x32xf32>
    %2 = tpu.matmul %0, %1, %cst {dimension_numbers = #tpu.dot_dimension_numbers<[1], [0], [0], [1], [0, 0, 1, 1], [], []>} : vector<8x64xbf16>, vector<64x32xbf16>, vector<8x32xf32> -> vector<8x32xf32>
    %c0_3 = arith.constant 0 : index
    %c0_4 = arith.constant 0 : index
    %3 = vector.load %arg3[%c0_3, %c0_4] : memref<1x32xf32, #tpu.memory_space<vmem>>, vector<1x32xf32>
    %4 = vector.broadcast %3 : vector<1x32xf32> to vector<8x32xf32>
    %5 = arith.addf %2, %4 : vector<8x32xf32>
    %cst_5 = arith.constant 5.000000e-01 : f32
    %6 = vector.broadcast %cst_5 : f32 to vector<8x32xf32>
    %7 = arith.mulf %5, %6 : vector<8x32xf32>
    %cst_6 = arith.constant 0.707106769 : f32
    %8 = vector.broadcast %cst_6 : f32 to vector<8x32xf32>
    %9 = arith.mulf %5, %8 : vector<8x32xf32>
    %10 = math.erf %9 : vector<8x32xf32>
    %cst_7 = arith.constant 1.000000e+00 : f32
    %11 = vector.broadcast %cst_7 : f32 to vector<8x32xf32>
    %12 = arith.addf %11, %10 : vector<8x32xf32>
    %13 = arith.mulf %7, %12 : vector<8x32xf32>
    %14 = arith.truncf %13 : vector<8x32xf32> to vector<8x32xbf16>
    %c0_8 = arith.constant 0 : index
    %c0_9 = arith.constant 0 : index
    %15 = vector.load %arg4[%c0_8, %c0_9] : memref<8x32xbf16, #tpu.memory_space<vmem>>, vector<8x32xbf16>
    tpu.vector_store %arg4[%c0_8, %c0_9], %14 {strides = array<i32>} : memref<8x32xbf16, #tpu.memory_space<vmem>>, vector<8x32xbf16>,
    return
  }
  func.func @transform_0(%arg0: i32) -> (i32, i32) {
    %c0_i32 = arith.constant 0 : i32
    %c0_i32_0 = arith.constant 0 : i32
    return %arg0, %c0_i32 : i32, i32
  }
  func.func @transform_1(%arg0: i32) -> (i32, i32) {
    %c0_i32 = arith.constant 0 : i32
    %c0_i32_0 = arith.constant 0 : i32
    %c0_i32_1 = arith.constant 0 : i32
    return %c0_i32, %c0_i32_0 : i32, i32
  }
  func.func @transform_2(%arg0: i32) -> (i32, i32) {
    %c0_i32 = arith.constant 0 : i32
    %c0_i32_0 = arith.constant 0 : i32
    %c0_i32_1 = arith.constant 0 : i32
    return %c0_i32, %c0_i32_0 : i32, i32
  }
  func.func @transform_3(%arg0: i32) -> (i32, i32) {
    %c0_i32 = arith.constant 0 : i32
    %c0_i32_0 = arith.constant 0 : i32
    return %arg0, %c0_i32 : i32, i32
  }
}

module attributes {stable_mosaic.version = 11 : i64} {
  func.func @_linear_ln_resident_kernel(%arg0: i32, %arg1: memref<8x32xbf16, #tpu.memory_space<vmem>>, %arg2: memref<32x64xbf16, #tpu.memory_space<vmem>>, %arg3: memref<3x64xf32, #tpu.memory_space<vmem>>, %arg4: memref<8x64xbf16, #tpu.memory_space<vmem>>, %arg5: memref<8x64xbf16, #tpu.memory_space<vmem>>) attributes {dimension_semantics = [#tpu.dimension_semantics<parallel>], iteration_bounds = array<i64: 2>, scalar_prefetch = 0 : i64, scratch_operands = 0 : i64, tpu.core_type = #tpu.core_type<tc>, window_params = [{transform_indices = @transform_0, window_bounds = array<i64: 8, 32>}, {pipeline_mode = #tpu.pipeline_mode<synchronous>, transform_indices = @transform_1, window_bounds = array<i64: 32, 64>}, {pipeline_mode = #tpu.pipeline_mode<synchronous>, transform_indices = @transform_2, window_bounds = array<i64: 3, 64>}, {transform_indices = @transform_3, window_bounds = array<i64: 8, 64>}, {transform_indices = @transform_4, window_bounds = array<i64: 8, 64>}]} {
    %c0 = arith.constant 0 : index
    %c0_0 = arith.constant 0 : index
    %0 = vector.load %arg1[%c0, %c0_0] : memref<8x32xbf16, #tpu.memory_space<vmem>>, vector<8x32xbf16>
    %c0_1 = arith.constant 0 : index
    %c0_2 = arith.constant 0 : index
    %1 = vector.load %arg2[%c0_1, %c0_2] : memref<32x64xbf16, #tpu.memory_space<vmem>>, vector<32x64xbf16>
    %cst = arith.constant dense<0.000000e+00> : vector<8x64xf32>
    %2 = tpu.matmul %0, %1, %cst {dimension_numbers = #tpu.dot_dimension_numbers<[1], [0], [0], [1], [0, 0, 1, 1], [], []>} : vector<8x32xbf16>, vector<32x64xbf16>, vector<8x64xf32> -> vector<8x64xf32>
    %c0_3 = arith.constant 0 : index
    %c0_4 = arith.constant 0 : index
    %3 = vector.load %arg3[%c0_3, %c0_4] : memref<3x64xf32, #tpu.memory_space<vmem>>, vector<1x64xf32>
    %4 = vector.broadcast %3 : vector<1x64xf32> to vector<8x64xf32>
    %5 = arith.addf %2, %4 : vector<8x64xf32>
    %c0_5 = arith.constant 0 : index
    %c0_6 = arith.constant 0 : index
    %6 = vector.load %arg4[%c0_5, %c0_6] : memref<8x64xbf16, #tpu.memory_space<vmem>>, vector<8x64xbf16>
    %7 = arith.extf %6 : vector<8x64xbf16> to vector<8x64xf32>
    %8 = arith.addf %5, %7 : vector<8x64xf32>
    %cst_7 = arith.constant dense<0.000000e+00> : vector<8xf32>
    %9 = vector.multi_reduction <add>, %8, %cst_7 [1] : vector<8x64xf32> to vector<8xf32>
    %10 = vector.shape_cast %9 : vector<8xf32> to vector<8x1xf32>
    %cst_8 = arith.constant 6.400000e+01 : f32
    %11 = vector.broadcast %cst_8 : f32 to vector<8x1xf32>
    %12 = arith.divf %10, %11 : vector<8x1xf32>
    %13 = vector.broadcast %12 : vector<8x1xf32> to vector<8x64xf32>
    %14 = arith.subf %8, %13 : vector<8x64xf32>
    %15 = arith.mulf %14, %14 : vector<8x64xf32>
    %cst_9 = arith.constant dense<0.000000e+00> : vector<8xf32>
    %16 = vector.multi_reduction <add>, %15, %cst_9 [1] : vector<8x64xf32> to vector<8xf32>
    %17 = vector.shape_cast %16 : vector<8xf32> to vector<8x1xf32>
    %cst_10 = arith.constant 6.400000e+01 : f32
    %18 = vector.broadcast %cst_10 : f32 to vector<8x1xf32>
    %19 = arith.divf %17, %18 : vector<8x1xf32>
    %20 = vector.broadcast %12 : vector<8x1xf32> to vector<8x64xf32>
    %21 = arith.subf %8, %20 : vector<8x64xf32>
    %cst_11 = arith.constant 9.99999993E-9 : f32
    %22 = vector.broadcast %cst_11 : f32 to vector<8x1xf32>
    %23 = arith.addf %19, %22 : vector<8x1xf32>
    %24 = math.rsqrt %23 : vector<8x1xf32>
    %25 = vector.broadcast %24 : vector<8x1xf32> to vector<8x64xf32>
    %26 = arith.mulf %21, %25 : vector<8x64xf32>
    %c1 = arith.constant 1 : index
    %c0_12 = arith.constant 0 : index
    %27 = vector.load %arg3[%c1, %c0_12] : memref<3x64xf32, #tpu.memory_space<vmem>>, vector<1x64xf32>
    %28 = vector.broadcast %27 : vector<1x64xf32> to vector<8x64xf32>
    %29 = arith.mulf %26, %28 : vector<8x64xf32>
    %c2 = arith.constant 2 : index
    %c0_13 = arith.constant 0 : index
    %30 = vector.load %arg3[%c2, %c0_13] : memref<3x64xf32, #tpu.memory_space<vmem>>, vector<1x64xf32>
    %31 = vector.broadcast %30 : vector<1x64xf32> to vector<8x64xf32>
    %32 = arith.addf %29, %31 : vector<8x64xf32>
    %33 = arith.truncf %32 : vector<8x64xf32> to vector<8x64xbf16>
    %c0_14 = arith.constant 0 : index
    %c0_15 = arith.constant 0 : index
    %34 = vector.load %arg5[%c0_14, %c0_15] : memref<8x64xbf16, #tpu.memory_space<vmem>>, vector<8x64xbf16>
    tpu.vector_store %arg5[%c0_14, %c0_15], %33 {strides = array<i32>} : memref<8x64xbf16, #tpu.memory_space<vmem>>, vector<8x64xbf16>,
    return
  }
  func.func @transform_0(%arg0: i32) -> (i32, i32) {
    %c0_i32 = arith.constant 0 : i32
    %c0_i32_0 = arith.constant 0 : i32
    return %arg0, %c0_i32 : i32, i32
  }
  func.func @transform_1(%arg0: i32) -> (i32, i32) {
    %c0_i32 = arith.constant 0 : i32
    %c0_i32_0 = arith.constant 0 : i32
    %c0_i32_1 = arith.constant 0 : i32
    return %c0_i32, %c0_i32_0 : i32, i32
  }
  func.func @transform_2(%arg0: i32) -> (i32, i32) {
    %c0_i32 = arith.constant 0 : i32
    %c0_i32_0 = arith.constant 0 : i32
    %c0_i32_1 = arith.constant 0 : i32
    return %c0_i32, %c0_i32_0 : i32, i32
  }
  func.func @transform_3(%arg0: i32) -> (i32, i32) {
    %c0_i32 = arith.constant 0 : i32
    %c0_i32_0 = arith.constant 0 : i32
    return %arg0, %c0_i32 : i32, i32
  }
  func.func @transform_4(%arg0: i32) -> (i32, i32) {
    %c0_i32 = arith.constant 0 : i32
    %c0_i32_0 = arith.constant 0 : i32
    return %arg0, %c0_i32 : i32, i32
  }
}

module attributes {stable_mosaic.version = 11 : i64} {
  func.func @_linear_resident_kernel(%arg0: i32, %arg1: memref<8x64xbf16, #tpu.memory_space<vmem>>, %arg2: memref<64x128xbf16, #tpu.memory_space<vmem>>, %arg3: memref<1x128xf32, #tpu.memory_space<vmem>>, %arg4: memref<8x128xbf16, #tpu.memory_space<vmem>>) attributes {dimension_semantics = [#tpu.dimension_semantics<parallel>], iteration_bounds = array<i64: 2>, scalar_prefetch = 0 : i64, scratch_operands = 0 : i64, tpu.core_type = #tpu.core_type<tc>, window_params = [{transform_indices = @transform_0, window_bounds = array<i64: 8, 64>}, {pipeline_mode = #tpu.pipeline_mode<synchronous>, transform_indices = @transform_1, window_bounds = array<i64: 64, 128>}, {pipeline_mode = #tpu.pipeline_mode<synchronous>, transform_indices = @transform_2, window_bounds = array<i64: 1, 128>}, {transform_indices = @transform_3, window_bounds = array<i64: 8, 128>}]} {
    %c0 = arith.constant 0 : index
    %c0_0 = arith.constant 0 : index
    %0 = vector.load %arg1[%c0, %c0_0] : memref<8x64xbf16, #tpu.memory_space<vmem>>, vector<8x64xbf16>
    %c0_1 = arith.constant 0 : index
    %c0_2 = arith.constant 0 : index
    %1 = vector.load %arg2[%c0_1, %c0_2] : memref<64x128xbf16, #tpu.memory_space<vmem>>, vector<64x128xbf16>
    %cst = arith.constant dense<0.000000e+00> : vector<8x128xf32>
    %2 = tpu.matmul %0, %1, %cst {dimension_numbers = #tpu.dot_dimension_numbers<[1], [0], [0], [1], [0, 0, 1, 1], [], []>} : vector<8x64xbf16>, vector<64x128xbf16>, vector<8x128xf32> -> vector<8x128xf32>
    %c0_3 = arith.constant 0 : index
    %c0_4 = arith.constant 0 : index
    %3 = vector.load %arg3[%c0_3, %c0_4] : memref<1x128xf32, #tpu.memory_space<vmem>>, vector<1x128xf32>
    %4 = vector.broadcast %3 : vector<1x128xf32> to vector<8x128xf32>
    %5 = arith.addf %2, %4 : vector<8x128xf32>
    %6 = arith.truncf %5 : vector<8x128xf32> to vector<8x128xbf16>
    %c0_5 = arith.constant 0 : index
    %c0_6 = arith.constant 0 : index
    %7 = vector.load %arg4[%c0_5, %c0_6] : memref<8x128xbf16, #tpu.memory_space<vmem>>, vector<8x128xbf16>
    tpu.vector_store %arg4[%c0_5, %c0_6], %6 {strides = array<i32>} : memref<8x128xbf16, #tpu.memory_space<vmem>>, vector<8x128xbf16>,
    return
  }
  func.func @transform_0(%arg0: i32) -> (i32, i32) {
    %c0_i32 = arith.constant 0 : i32
    %c0_i32_0 = arith.constant 0 : i32
    return %arg0, %c0_i32 : i32, i32
  }
  func.func @transform_1(%arg0: i32) -> (i32, i32) {
    %c0_i32 = arith.constant 0 : i32
    %c0_i32_0 = arith.constant 0 : i32
    %c0_i32_1 = arith.constant 0 : i32
    return %c0_i32, %c0_i32_0 : i32, i32
  }
  func.func @transform_2(%arg0: i32) -> (i32, i32) {
    %c0_i32 = arith.constant 0 : i32
    %c0_i32_0 = arith.constant 0 : i32
    %c0_i32_1 = arith.constant 0 : i32
    return %c0_i32, %c0_i32_0 : i32, i32
  }
  func.func @transform_3(%arg0: i32) -> (i32, i32) {
    %c0_i32 = arith.constant 0 : i32
    %c0_i32_0 = arith.constant 0 : i32
    return %arg0, %c0_i32 : i32, i32
  }
}

module attributes {stable_mosaic.version = 11 : i64} {
  func.func @_linear_ln_resident_kernel(%arg0: i32, %arg1: memref<8x32xbf16, #tpu.memory_space<vmem>>, %arg2: memref<32x64xbf16, #tpu.memory_space<vmem>>, %arg3: memref<3x64xf32, #tpu.memory_space<vmem>>, %arg4: memref<8x64xbf16, #tpu.memory_space<vmem>>) attributes {dimension_semantics = [#tpu.dimension_semantics<parallel>], iteration_bounds = array<i64: 2>, scalar_prefetch = 0 : i64, scratch_operands = 0 : i64, tpu.core_type = #tpu.core_type<tc>, window_params = [{transform_indices = @transform_0, window_bounds = array<i64: 8, 32>}, {pipeline_mode = #tpu.pipeline_mode<synchronous>, transform_indices = @transform_1, window_bounds = array<i64: 32, 64>}, {pipeline_mode = #tpu.pipeline_mode<synchronous>, transform_indices = @transform_2, window_bounds = array<i64: 3, 64>}, {transform_indices = @transform_3, window_bounds = array<i64: 8, 64>}]} {
    %c0 = arith.constant 0 : index
    %c0_0 = arith.constant 0 : index
    %0 = vector.load %arg1[%c0, %c0_0] : memref<8x32xbf16, #tpu.memory_space<vmem>>, vector<8x32xbf16>
    %c0_1 = arith.constant 0 : index
    %c0_2 = arith.constant 0 : index
    %1 = vector.load %arg2[%c0_1, %c0_2] : memref<32x64xbf16, #tpu.memory_space<vmem>>, vector<32x64xbf16>
    %cst = arith.constant dense<0.000000e+00> : vector<8x64xf32>
    %2 = tpu.matmul %0, %1, %cst {dimension_numbers = #tpu.dot_dimension_numbers<[1], [0], [0], [1], [0, 0, 1, 1], [], []>} : vector<8x32xbf16>, vector<32x64xbf16>, vector<8x64xf32> -> vector<8x64xf32>
    %c0_3 = arith.constant 0 : index
    %c0_4 = arith.constant 0 : index
    %3 = vector.load %arg3[%c0_3, %c0_4] : memref<3x64xf32, #tpu.memory_space<vmem>>, vector<1x64xf32>
    %4 = vector.broadcast %3 : vector<1x64xf32> to vector<8x64xf32>
    %5 = arith.addf %2, %4 : vector<8x64xf32>
    %cst_5 = arith.constant dense<0.000000e+00> : vector<8xf32>
    %6 = vector.multi_reduction <add>, %5, %cst_5 [1] : vector<8x64xf32> to vector<8xf32>
    %7 = vector.shape_cast %6 : vector<8xf32> to vector<8x1xf32>
    %cst_6 = arith.constant 6.400000e+01 : f32
    %8 = vector.broadcast %cst_6 : f32 to vector<8x1xf32>
    %9 = arith.divf %7, %8 : vector<8x1xf32>
    %10 = vector.broadcast %9 : vector<8x1xf32> to vector<8x64xf32>
    %11 = arith.subf %5, %10 : vector<8x64xf32>
    %12 = arith.mulf %11, %11 : vector<8x64xf32>
    %cst_7 = arith.constant dense<0.000000e+00> : vector<8xf32>
    %13 = vector.multi_reduction <add>, %12, %cst_7 [1] : vector<8x64xf32> to vector<8xf32>
    %14 = vector.shape_cast %13 : vector<8xf32> to vector<8x1xf32>
    %cst_8 = arith.constant 6.400000e+01 : f32
    %15 = vector.broadcast %cst_8 : f32 to vector<8x1xf32>
    %16 = arith.divf %14, %15 : vector<8x1xf32>
    %17 = vector.broadcast %9 : vector<8x1xf32> to vector<8x64xf32>
    %18 = arith.subf %5, %17 : vector<8x64xf32>
    %cst_9 = arith.constant 9.99999971E-10 : f32
    %19 = vector.broadcast %cst_9 : f32 to vector<8x1xf32>
    %20 = arith.addf %16, %19 : vector<8x1xf32>
    %21 = math.rsqrt %20 : vector<8x1xf32>
    %22 = vector.broadcast %21 : vector<8x1xf32> to vector<8x64xf32>
    %23 = arith.mulf %18, %22 : vector<8x64xf32>
    %c1 = arith.constant 1 : index
    %c0_10 = arith.constant 0 : index
    %24 = vector.load %arg3[%c1, %c0_10] : memref<3x64xf32, #tpu.memory_space<vmem>>, vector<1x64xf32>
    %25 = vector.broadcast %24 : vector<1x64xf32> to vector<8x64xf32>
    %26 = arith.mulf %23, %25 : vector<8x64xf32>
    %c2 = arith.constant 2 : index
    %c0_11 = arith.constant 0 : index
    %27 = vector.load %arg3[%c2, %c0_11] : memref<3x64xf32, #tpu.memory_space<vmem>>, vector<1x64xf32>
    %28 = vector.broadcast %27 : vector<1x64xf32> to vector<8x64xf32>
    %29 = arith.addf %26, %28 : vector<8x64xf32>
    %30 = arith.truncf %29 : vector<8x64xf32> to vector<8x64xbf16>
    %c0_12 = arith.constant 0 : index
    %c0_13 = arith.constant 0 : index
    %31 = vector.load %arg4[%c0_12, %c0_13] : memref<8x64xbf16, #tpu.memory_space<vmem>>, vector<8x64xbf16>
    tpu.vector_store %arg4[%c0_12, %c0_13], %30 {strides = array<i32>} : memref<8x64xbf16, #tpu.memory_space<vmem>>, vector<8x64xbf16>,
    return
  }
  func.func @transform_0(%arg0: i32) -> (i32, i32) {
    %c0_i32 = arith.constant 0 : i32
    %c0_i32_0 = arith.constant 0 : i32
    return %arg0, %c0_i32 : i32, i32
  }
  func.func @transform_1(%arg0: i32) -> (i32, i32) {
    %c0_i32 = arith.constant 0 : i32
    %c0_i32_0 = arith.constant 0 : i32
    %c0_i32_1 = arith.constant 0 : i32
    return %c0_i32, %c0_i32_0 : i32, i32
  }
  func.func @transform_2(%arg0: i32) -> (i32, i32) {
    %c0_i32 = arith.constant 0 : i32
    %c0_i32_0 = arith.constant 0 : i32
    %c0_i32_1 = arith.constant 0 : i32
    return %c0_i32, %c0_i32_0 : i32, i32
  }
  func.func @transform_3(%arg0: i32) -> (i32, i32) {
    %c0_i32 = arith.constant 0 : i32
    %c0_i32_0 = arith.constant 0 : i32
    return %arg0, %c0_i32 : i32, i32
  }
}

module attributes {stable_mosaic.version = 11 : i64} {
  func.func @_linear_resident_kernel(%arg0: i32, %arg1: memref<8x64xbf16, #tpu.memory_space<vmem>>, %arg2: memref<64x64xbf16, #tpu.memory_space<vmem>>, %arg3: memref<1x64xf32, #tpu.memory_space<vmem>>, %arg4: memref<8x64xbf16, #tpu.memory_space<vmem>>) attributes {dimension_semantics = [#tpu.dimension_semantics<parallel>], iteration_bounds = array<i64: 2>, scalar_prefetch = 0 : i64, scratch_operands = 0 : i64, tpu.core_type = #tpu.core_type<tc>, window_params = [{transform_indices = @transform_0, window_bounds = array<i64: 8, 64>}, {pipeline_mode = #tpu.pipeline_mode<synchronous>, transform_indices = @transform_1, window_bounds = array<i64: 64, 64>}, {pipeline_mode = #tpu.pipeline_mode<synchronous>, transform_indices = @transform_2, window_bounds = array<i64: 1, 64>}, {transform_indices = @transform_3, window_bounds = array<i64: 8, 64>}]} {
    %c0 = arith.constant 0 : index
    %c0_0 = arith.constant 0 : index
    %0 = vector.load %arg1[%c0, %c0_0] : memref<8x64xbf16, #tpu.memory_space<vmem>>, vector<8x64xbf16>
    %c0_1 = arith.constant 0 : index
    %c0_2 = arith.constant 0 : index
    %1 = vector.load %arg2[%c0_1, %c0_2] : memref<64x64xbf16, #tpu.memory_space<vmem>>, vector<64x64xbf16>
    %cst = arith.constant dense<0.000000e+00> : vector<8x64xf32>
    %2 = tpu.matmul %0, %1, %cst {dimension_numbers = #tpu.dot_dimension_numbers<[1], [0], [0], [1], [0, 0, 1, 1], [], []>} : vector<8x64xbf16>, vector<64x64xbf16>, vector<8x64xf32> -> vector<8x64xf32>
    %c0_3 = arith.constant 0 : index
    %c0_4 = arith.constant 0 : index
    %3 = vector.load %arg3[%c0_3, %c0_4] : memref<1x64xf32, #tpu.memory_space<vmem>>, vector<1x64xf32>
    %4 = vector.broadcast %3 : vector<1x64xf32> to vector<8x64xf32>
    %5 = arith.addf %2, %4 : vector<8x64xf32>
    %6 = arith.truncf %5 : vector<8x64xf32> to vector<8x64xbf16>
    %c0_5 = arith.constant 0 : index
    %c0_6 = arith.constant 0 : index
    %7 = vector.load %arg4[%c0_5, %c0_6] : memref<8x64xbf16, #tpu.memory_space<vmem>>, vector<8x64xbf16>
    tpu.vector_store %arg4[%c0_5, %c0_6], %6 {strides = array<i32>} : memref<8x64xbf16, #tpu.memory_space<vmem>>, vector<8x64xbf16>,
    return
  }
  func.func @transform_0(%arg0: i32) -> (i32, i32) {
    %c0_i32 = arith.constant 0 : i32
    %c0_i32_0 = arith.constant 0 : i32
    return %arg0, %c0_i32 : i32, i32
  }
  func.func @transform_1(%arg0: i32) -> (i32, i32) {
    %c0_i32 = arith.constant 0 : i32
    %c0_i32_0 = arith.constant 0 : i32
    %c0_i32_1 = arith.constant 0 : i32
    return %c0_i32, %c0_i32_0 : i32, i32
  }
  func.func @transform_2(%arg0: i32) -> (i32, i32) {
    %c0_i32 = arith.constant 0 : i32
    %c0_i32_0 = arith.constant 0 : i32
    %c0_i32_1 = arith.constant 0 : i32
    return %c0_i32, %c0_i32_0 : i32, i32
  }
  func.func @transform_3(%arg0: i32) -> (i32, i32) {
    %c0_i32 = arith.constant 0 : i32
    %c0_i32_0 = arith.constant 0 : i32
    return %arg0, %c0_i32 : i32, i32
  }
}

module attributes {stable_mosaic.version = 11 : i64} {
  func.func @_linear_ln_resident_kernel(%arg0: i32, %arg1: memref<8x8xbf16, #tpu.memory_space<vmem>>, %arg2: memref<8x64xbf16, #tpu.memory_space<vmem>>, %arg3: memref<3x64xf32, #tpu.memory_space<vmem>>, %arg4: memref<8x64xbf16, #tpu.memory_space<vmem>>) attributes {dimension_semantics = [#tpu.dimension_semantics<parallel>], iteration_bounds = array<i64: 2>, scalar_prefetch = 0 : i64, scratch_operands = 0 : i64, tpu.core_type = #tpu.core_type<tc>, window_params = [{transform_indices = @transform_0, window_bounds = array<i64: 8, 8>}, {pipeline_mode = #tpu.pipeline_mode<synchronous>, transform_indices = @transform_1, window_bounds = array<i64: 8, 64>}, {pipeline_mode = #tpu.pipeline_mode<synchronous>, transform_indices = @transform_2, window_bounds = array<i64: 3, 64>}, {transform_indices = @transform_3, window_bounds = array<i64: 8, 64>}]} {
    %c0 = arith.constant 0 : index
    %c0_0 = arith.constant 0 : index
    %0 = vector.load %arg1[%c0, %c0_0] : memref<8x8xbf16, #tpu.memory_space<vmem>>, vector<8x8xbf16>
    %c0_1 = arith.constant 0 : index
    %c0_2 = arith.constant 0 : index
    %1 = vector.load %arg2[%c0_1, %c0_2] : memref<8x64xbf16, #tpu.memory_space<vmem>>, vector<8x64xbf16>
    %cst = arith.constant dense<0.000000e+00> : vector<8x64xf32>
    %2 = tpu.matmul %0, %1, %cst {dimension_numbers = #tpu.dot_dimension_numbers<[1], [0], [0], [1], [0, 0, 1, 1], [], []>} : vector<8x8xbf16>, vector<8x64xbf16>, vector<8x64xf32> -> vector<8x64xf32>
    %c0_3 = arith.constant 0 : index
    %c0_4 = arith.constant 0 : index
    %3 = vector.load %arg3[%c0_3, %c0_4] : memref<3x64xf32, #tpu.memory_space<vmem>>, vector<1x64xf32>
    %4 = vector.broadcast %3 : vector<1x64xf32> to vector<8x64xf32>
    %5 = arith.addf %2, %4 : vector<8x64xf32>
    %cst_5 = arith.constant dense<0.000000e+00> : vector<8xf32>
    %6 = vector.multi_reduction <add>, %5, %cst_5 [1] : vector<8x64xf32> to vector<8xf32>
    %7 = vector.shape_cast %6 : vector<8xf32> to vector<8x1xf32>
    %cst_6 = arith.constant 6.400000e+01 : f32
    %8 = vector.broadcast %cst_6 : f32 to vector<8x1xf32>
    %9 = arith.divf %7, %8 : vector<8x1xf32>
    %10 = vector.broadcast %9 : vector<8x1xf32> to vector<8x64xf32>
    %11 = arith.subf %5, %10 : vector<8x64xf32>
    %12 = arith.mulf %11, %11 : vector<8x64xf32>
    %cst_7 = arith.constant dense<0.000000e+00> : vector<8xf32>
    %13 = vector.multi_reduction <add>, %12, %cst_7 [1] : vector<8x64xf32> to vector<8xf32>
    %14 = vector.shape_cast %13 : vector<8xf32> to vector<8x1xf32>
    %cst_8 = arith.constant 6.400000e+01 : f32
    %15 = vector.broadcast %cst_8 : f32 to vector<8x1xf32>
    %16 = arith.divf %14, %15 : vector<8x1xf32>
    %17 = vector.broadcast %9 : vector<8x1xf32> to vector<8x64xf32>
    %18 = arith.subf %5, %17 : vector<8x64xf32>
    %cst_9 = arith.constant 9.99999971E-10 : f32
    %19 = vector.broadcast %cst_9 : f32 to vector<8x1xf32>
    %20 = arith.addf %16, %19 : vector<8x1xf32>
    %21 = math.rsqrt %20 : vector<8x1xf32>
    %22 = vector.broadcast %21 : vector<8x1xf32> to vector<8x64xf32>
    %23 = arith.mulf %18, %22 : vector<8x64xf32>
    %c1 = arith.constant 1 : index
    %c0_10 = arith.constant 0 : index
    %24 = vector.load %arg3[%c1, %c0_10] : memref<3x64xf32, #tpu.memory_space<vmem>>, vector<1x64xf32>
    %25 = vector.broadcast %24 : vector<1x64xf32> to vector<8x64xf32>
    %26 = arith.mulf %23, %25 : vector<8x64xf32>
    %c2 = arith.constant 2 : index
    %c0_11 = arith.constant 0 : index
    %27 = vector.load %arg3[%c2, %c0_11] : memref<3x64xf32, #tpu.memory_space<vmem>>, vector<1x64xf32>
    %28 = vector.broadcast %27 : vector<1x64xf32> to vector<8x64xf32>
    %29 = arith.addf %26, %28 : vector<8x64xf32>
    %30 = arith.truncf %29 : vector<8x64xf32> to vector<8x64xbf16>
    %c0_12 = arith.constant 0 : index
    %c0_13 = arith.constant 0 : index
    %31 = vector.load %arg4[%c0_12, %c0_13] : memref<8x64xbf16, #tpu.memory_space<vmem>>, vector<8x64xbf16>
    tpu.vector_store %arg4[%c0_12, %c0_13], %30 {strides = array<i32>} : memref<8x64xbf16, #tpu.memory_space<vmem>>, vector<8x64xbf16>,
    return
  }
  func.func @transform_0(%arg0: i32) -> (i32, i32) {
    %c0_i32 = arith.constant 0 : i32
    %c0_i32_0 = arith.constant 0 : i32
    return %arg0, %c0_i32 : i32, i32
  }
  func.func @transform_1(%arg0: i32) -> (i32, i32) {
    %c0_i32 = arith.constant 0 : i32
    %c0_i32_0 = arith.constant 0 : i32
    %c0_i32_1 = arith.constant 0 : i32
    return %c0_i32, %c0_i32_0 : i32, i32
  }
  func.func @transform_2(%arg0: i32) -> (i32, i32) {
    %c0_i32 = arith.constant 0 : i32
    %c0_i32_0 = arith.constant 0 : i32
    %c0_i32_1 = arith.constant 0 : i32
    return %c0_i32, %c0_i32_0 : i32, i32
  }
  func.func @transform_3(%arg0: i32) -> (i32, i32) {
    %c0_i32 = arith.constant 0 : i32
    %c0_i32_0 = arith.constant 0 : i32
    return %arg0, %c0_i32 : i32, i32
  }
}

module attributes {stable_mosaic.version = 11 : i64} {
  func.func @_cross_attention_kernel(%arg0: i32, %arg1: memref<1x8x64xbf16, #tpu.memory_space<vmem>>, %arg2: memref<1x8x128xbf16, #tpu.memory_space<vmem>>, %arg3: memref<1x1x8xf32, #tpu.memory_space<vmem>>, %arg4: memref<1x8x64xbf16, #tpu.memory_space<vmem>>, %arg5: memref<1x8x64xf32, #tpu.memory_space<vmem>>) attributes {dimension_semantics = [#tpu.dimension_semantics<parallel>], iteration_bounds = array<i64: 2>, scalar_prefetch = 0 : i64, scratch_operands = 1 : i64, tpu.core_type = #tpu.core_type<tc>, window_params = [{transform_indices = @transform_0, window_bounds = array<i64: 1, 8, 64>}, {transform_indices = @transform_1, window_bounds = array<i64: 1, 8, 128>}, {transform_indices = @transform_2, window_bounds = array<i64: 1, 1, 8>}, {transform_indices = @transform_3, window_bounds = array<i64: 1, 8, 64>}]} {
    %c0 = arith.constant 0 : index
    %c0_0 = arith.constant 0 : index
    %c0_1 = arith.constant 0 : index
    %0 = vector.load %arg3[%c0, %c0_0, %c0_1] : memref<1x1x8xf32, #tpu.memory_space<vmem>>, vector<1x1x8xf32>
    %c0_2 = arith.constant 0 : index
    %c0_3 = arith.constant 0 : index
    %c0_4 = arith.constant 0 : index
    %1 = vector.load %arg1[%c0_2, %c0_3, %c0_4] : memref<1x8x64xbf16, #tpu.memory_space<vmem>>, vector<1x8x16xbf16>
    %c0_5 = arith.constant 0 : index
    %c0_6 = arith.constant 0 : index
    %c0_7 = arith.constant 0 : index
    %2 = vector.load %arg2[%c0_5, %c0_6, %c0_7] : memref<1x8x128xbf16, #tpu.memory_space<vmem>>, vector<1x8x16xbf16>
    %c0_8 = arith.constant 0 : index
    %c0_9 = arith.constant 0 : index
    %c64 = arith.constant 64 : index
    %3 = vector.load %arg2[%c0_8, %c0_9, %c64] : memref<1x8x128xbf16, #tpu.memory_space<vmem>>, vector<1x8x16xbf16>
    "tpu.trace_start"() <{level = 10 : i32, message = "bqd,bkd->bqk"}> : () -> ()
    %cst = arith.constant dense<0.000000e+00> : vector<1x8x8xf32>
    %4 = tpu.matmul %1, %2, %cst {dimension_numbers = #tpu.dot_dimension_numbers<[2], [2], [1], [1], [0, 0, 0, 1, 1, 1], [0], [0]>} : vector<1x8x16xbf16>, vector<1x8x16xbf16>, vector<1x8x8xf32> -> vector<1x8x8xf32>
    "tpu.trace_stop"() : () -> ()
    %cst_10 = arith.constant 2.500000e-01 : f32
    %5 = vector.broadcast %cst_10 : f32 to vector<1x8x8xf32>
    %6 = arith.mulf %4, %5 : vector<1x8x8xf32>
    %7 = vector.broadcast %0 : vector<1x1x8xf32> to vector<1x8x8xf32>
    %8 = arith.addf %6, %7 : vector<1x8x8xf32>
    %cst_11 = arith.constant dense<0xFF800000> : vector<1x8xf32>
    %9 = vector.multi_reduction <maximumf>, %8, %cst_11 [2] : vector<1x8x8xf32> to vector<1x8xf32>
    %10 = vector.shape_cast %9 : vector<1x8xf32> to vector<1x8x1xf32>
    %11 = vector.broadcast %10 : vector<1x8x1xf32> to vector<1x8x8xf32>
    %12 = arith.subf %8, %11 : vector<1x8x8xf32>
    %13 = math.exp %12 : vector<1x8x8xf32>
    %cst_12 = arith.constant dense<0.000000e+00> : vector<1x8xf32>
    %14 = vector.multi_reduction <add>, %13, %cst_12 [2] : vector<1x8x8xf32> to vector<1x8xf32>
    %15 = vector.shape_cast %14 : vector<1x8xf32> to vector<1x8x1xf32>
    %16 = tpu.reciprocal %15 {approx = true} : vector<1x8x1xf32> -> vector<1x8x1xf32>
    %17 = vector.broadcast %16 : vector<1x8x1xf32> to vector<1x8x8xf32>
    %18 = arith.mulf %13, %17 : vector<1x8x8xf32>
    %19 = arith.truncf %18 : vector<1x8x8xf32> to vector<1x8x8xbf16>
    "tpu.trace_start"() <{level = 10 : i32, message = "bqk,bkd->bqd"}> : () -> ()
    %cst_13 = arith.constant dense<0.000000e+00> : vector<1x8x16xf32>
    %20 = tpu.matmul %19, %3, %cst_13 {dimension_numbers = #tpu.dot_dimension_numbers<[2], [1], [1], [2], [0, 0, 0, 1, 1, 2], [0], [0]>} : vector<1x8x8xbf16>, vector<1x8x16xbf16>, vector<1x8x16xf32> -> vector<1x8x16xf32>
    "tpu.trace_stop"() : () -> ()
    %c0_14 = arith.constant 0 : index
    %c0_15 = arith.constant 0 : index
    %c0_16 = arith.constant 0 : index
    %21 = vector.load %arg5[%c0_14, %c0_15, %c0_16] : memref<1x8x64xf32, #tpu.memory_space<vmem>>, vector<1x8x16xf32>
    tpu.vector_store %arg5[%c0_14, %c0_15, %c0_16], %20 {strides = array<i32>} : memref<1x8x64xf32, #tpu.memory_space<vmem>>, vector<1x8x16xf32>,
    %c0_17 = arith.constant 0 : index
    %c0_18 = arith.constant 0 : index
    %c16 = arith.constant 16 : index
    %22 = vector.load %arg1[%c0_17, %c0_18, %c16] : memref<1x8x64xbf16, #tpu.memory_space<vmem>>, vector<1x8x16xbf16>
    %c0_19 = arith.constant 0 : index
    %c0_20 = arith.constant 0 : index
    %c16_21 = arith.constant 16 : index
    %23 = vector.load %arg2[%c0_19, %c0_20, %c16_21] : memref<1x8x128xbf16, #tpu.memory_space<vmem>>, vector<1x8x16xbf16>
    %c0_22 = arith.constant 0 : index
    %c0_23 = arith.constant 0 : index
    %c80 = arith.constant 80 : index
    %24 = vector.load %arg2[%c0_22, %c0_23, %c80] : memref<1x8x128xbf16, #tpu.memory_space<vmem>>, vector<1x8x16xbf16>
    "tpu.trace_start"() <{level = 10 : i32, message = "bqd,bkd->bqk"}> : () -> ()
    %cst_24 = arith.constant dense<0.000000e+00> : vector<1x8x8xf32>
    %25 = tpu.matmul %22, %23, %cst_24 {dimension_numbers = #tpu.dot_dimension_numbers<[2], [2], [1], [1], [0, 0, 0, 1, 1, 1], [0], [0]>} : vector<1x8x16xbf16>, vector<1x8x16xbf16>, vector<1x8x8xf32> -> vector<1x8x8xf32>
    "tpu.trace_stop"() : () -> ()
    %cst_25 = arith.constant 2.500000e-01 : f32
    %26 = vector.broadcast %cst_25 : f32 to vector<1x8x8xf32>
    %27 = arith.mulf %25, %26 : vector<1x8x8xf32>
    %28 = vector.broadcast %0 : vector<1x1x8xf32> to vector<1x8x8xf32>
    %29 = arith.addf %27, %28 : vector<1x8x8xf32>
    %cst_26 = arith.constant dense<0xFF800000> : vector<1x8xf32>
    %30 = vector.multi_reduction <maximumf>, %29, %cst_26 [2] : vector<1x8x8xf32> to vector<1x8xf32>
    %31 = vector.shape_cast %30 : vector<1x8xf32> to vector<1x8x1xf32>
    %32 = vector.broadcast %31 : vector<1x8x1xf32> to vector<1x8x8xf32>
    %33 = arith.subf %29, %32 : vector<1x8x8xf32>
    %34 = math.exp %33 : vector<1x8x8xf32>
    %cst_27 = arith.constant dense<0.000000e+00> : vector<1x8xf32>
    %35 = vector.multi_reduction <add>, %34, %cst_27 [2] : vector<1x8x8xf32> to vector<1x8xf32>
    %36 = vector.shape_cast %35 : vector<1x8xf32> to vector<1x8x1xf32>
    %37 = tpu.reciprocal %36 {approx = true} : vector<1x8x1xf32> -> vector<1x8x1xf32>
    %38 = vector.broadcast %37 : vector<1x8x1xf32> to vector<1x8x8xf32>
    %39 = arith.mulf %34, %38 : vector<1x8x8xf32>
    %40 = arith.truncf %39 : vector<1x8x8xf32> to vector<1x8x8xbf16>
    "tpu.trace_start"() <{level = 10 : i32, message = "bqk,bkd->bqd"}> : () -> ()
    %cst_28 = arith.constant dense<0.000000e+00> : vector<1x8x16xf32>
    %41 = tpu.matmul %40, %24, %cst_28 {dimension_numbers = #tpu.dot_dimension_numbers<[2], [1], [1], [2], [0, 0, 0, 1, 1, 2], [0], [0]>} : vector<1x8x8xbf16>, vector<1x8x16xbf16>, vector<1x8x16xf32> -> vector<1x8x16xf32>
    "tpu.trace_stop"() : () -> ()
    %c0_29 = arith.constant 0 : index
    %c0_30 = arith.constant 0 : index
    %c16_31 = arith.constant 16 : index
    %42 = vector.load %arg5[%c0_29, %c0_30, %c16_31] : memref<1x8x64xf32, #tpu.memory_space<vmem>>, vector<1x8x16xf32>
    tpu.vector_store %arg5[%c0_29, %c0_30, %c16_31], %41 {strides = array<i32>} : memref<1x8x64xf32, #tpu.memory_space<vmem>>, vector<1x8x16xf32>,
    %c0_32 = arith.constant 0 : index
    %c0_33 = arith.constant 0 : index
    %c32 = arith.constant 32 : index
    %43 = vector.load %arg1[%c0_32, %c0_33, %c32] : memref<1x8x64xbf16, #tpu.memory_space<vmem>>, vector<1x8x16xbf16>
    %c0_34 = arith.constant 0 : index
    %c0_35 = arith.constant 0 : index
    %c32_36 = arith.constant 32 : index
    %44 = vector.load %arg2[%c0_34, %c0_35, %c32_36] : memref<1x8x128xbf16, #tpu.memory_space<vmem>>, vector<1x8x16xbf16>
    %c0_37 = arith.constant 0 : index
    %c0_38 = arith.constant 0 : index
    %c96 = arith.constant 96 : index
    %45 = vector.load %arg2[%c0_37, %c0_38, %c96] : memref<1x8x128xbf16, #tpu.memory_space<vmem>>, vector<1x8x16xbf16>
    "tpu.trace_start"() <{level = 10 : i32, message = "bqd,bkd->bqk"}> : () -> ()
    %cst_39 = arith.constant dense<0.000000e+00> : vector<1x8x8xf32>
    %46 = tpu.matmul %43, %44, %cst_39 {dimension_numbers = #tpu.dot_dimension_numbers<[2], [2], [1], [1], [0, 0, 0, 1, 1, 1], [0], [0]>} : vector<1x8x16xbf16>, vector<1x8x16xbf16>, vector<1x8x8xf32> -> vector<1x8x8xf32>
    "tpu.trace_stop"() : () -> ()
    %cst_40 = arith.constant 2.500000e-01 : f32
    %47 = vector.broadcast %cst_40 : f32 to vector<1x8x8xf32>
    %48 = arith.mulf %46, %47 : vector<1x8x8xf32>
    %49 = vector.broadcast %0 : vector<1x1x8xf32> to vector<1x8x8xf32>
    %50 = arith.addf %48, %49 : vector<1x8x8xf32>
    %cst_41 = arith.constant dense<0xFF800000> : vector<1x8xf32>
    %51 = vector.multi_reduction <maximumf>, %50, %cst_41 [2] : vector<1x8x8xf32> to vector<1x8xf32>
    %52 = vector.shape_cast %51 : vector<1x8xf32> to vector<1x8x1xf32>
    %53 = vector.broadcast %52 : vector<1x8x1xf32> to vector<1x8x8xf32>
    %54 = arith.subf %50, %53 : vector<1x8x8xf32>
    %55 = math.exp %54 : vector<1x8x8xf32>
    %cst_42 = arith.constant dense<0.000000e+00> : vector<1x8xf32>
    %56 = vector.multi_reduction <add>, %55, %cst_42 [2] : vector<1x8x8xf32> to vector<1x8xf32>
    %57 = vector.shape_cast %56 : vector<1x8xf32> to vector<1x8x1xf32>
    %58 = tpu.reciprocal %57 {approx = true} : vector<1x8x1xf32> -> vector<1x8x1xf32>
    %59 = vector.broadcast %58 : vector<1x8x1xf32> to vector<1x8x8xf32>
    %60 = arith.mulf %55, %59 : vector<1x8x8xf32>
    %61 = arith.truncf %60 : vector<1x8x8xf32> to vector<1x8x8xbf16>
    "tpu.trace_start"() <{level = 10 : i32, message = "bqk,bkd->bqd"}> : () -> ()
    %cst_43 = arith.constant dense<0.000000e+00> : vector<1x8x16xf32>
    %62 = tpu.matmul %61, %45, %cst_43 {dimension_numbers = #tpu.dot_dimension_numbers<[2], [1], [1], [2], [0, 0, 0, 1, 1, 2], [0], [0]>} : vector<1x8x8xbf16>, vector<1x8x16xbf16>, vector<1x8x16xf32> -> vector<1x8x16xf32>
    "tpu.trace_stop"() : () -> ()
    %c0_44 = arith.constant 0 : index
    %c0_45 = arith.constant 0 : index
    %c32_46 = arith.constant 32 : index
    %63 = vector.load %arg5[%c0_44, %c0_45, %c32_46] : memref<1x8x64xf32, #tpu.memory_space<vmem>>, vector<1x8x16xf32>
    tpu.vector_store %arg5[%c0_44, %c0_45, %c32_46], %62 {strides = array<i32>} : memref<1x8x64xf32, #tpu.memory_space<vmem>>, vector<1x8x16xf32>,
    %c0_47 = arith.constant 0 : index
    %c0_48 = arith.constant 0 : index
    %c48 = arith.constant 48 : index
    %64 = vector.load %arg1[%c0_47, %c0_48, %c48] : memref<1x8x64xbf16, #tpu.memory_space<vmem>>, vector<1x8x16xbf16>
    %c0_49 = arith.constant 0 : index
    %c0_50 = arith.constant 0 : index
    %c48_51 = arith.constant 48 : index
    %65 = vector.load %arg2[%c0_49, %c0_50, %c48_51] : memref<1x8x128xbf16, #tpu.memory_space<vmem>>, vector<1x8x16xbf16>
    %c0_52 = arith.constant 0 : index
    %c0_53 = arith.constant 0 : index
    %c112 = arith.constant 112 : index
    %66 = vector.load %arg2[%c0_52, %c0_53, %c112] : memref<1x8x128xbf16, #tpu.memory_space<vmem>>, vector<1x8x16xbf16>
    "tpu.trace_start"() <{level = 10 : i32, message = "bqd,bkd->bqk"}> : () -> ()
    %cst_54 = arith.constant dense<0.000000e+00> : vector<1x8x8xf32>
    %67 = tpu.matmul %64, %65, %cst_54 {dimension_numbers = #tpu.dot_dimension_numbers<[2], [2], [1], [1], [0, 0, 0, 1, 1, 1], [0], [0]>} : vector<1x8x16xbf16>, vector<1x8x16xbf16>, vector<1x8x8xf32> -> vector<1x8x8xf32>
    "tpu.trace_stop"() : () -> ()
    %cst_55 = arith.constant 2.500000e-01 : f32
    %68 = vector.broadcast %cst_55 : f32 to vector<1x8x8xf32>
    %69 = arith.mulf %67, %68 : vector<1x8x8xf32>
    %70 = vector.broadcast %0 : vector<1x1x8xf32> to vector<1x8x8xf32>
    %71 = arith.addf %69, %70 : vector<1x8x8xf32>
    %cst_56 = arith.constant dense<0xFF800000> : vector<1x8xf32>
    %72 = vector.multi_reduction <maximumf>, %71, %cst_56 [2] : vector<1x8x8xf32> to vector<1x8xf32>
    %73 = vector.shape_cast %72 : vector<1x8xf32> to vector<1x8x1xf32>
    %74 = vector.broadcast %73 : vector<1x8x1xf32> to vector<1x8x8xf32>
    %75 = arith.subf %71, %74 : vector<1x8x8xf32>
    %76 = math.exp %75 : vector<1x8x8xf32>
    %cst_57 = arith.constant dense<0.000000e+00> : vector<1x8xf32>
    %77 = vector.multi_reduction <add>, %76, %cst_57 [2] : vector<1x8x8xf32> to vector<1x8xf32>
    %78 = vector.shape_cast %77 : vector<1x8xf32> to vector<1x8x1xf32>
    %79 = tpu.reciprocal %78 {approx = true} : vector<1x8x1xf32> -> vector<1x8x1xf32>
    %80 = vector.broadcast %79 : vector<1x8x1xf32> to vector<1x8x8xf32>
    %81 = arith.mulf %76, %80 : vector<1x8x8xf32>
    %82 = arith.truncf %81 : vector<1x8x8xf32> to vector<1x8x8xbf16>
    "tpu.trace_start"() <{level = 10 : i32, message = "bqk,bkd->bqd"}> : () -> ()
    %cst_58 = arith.constant dense<0.000000e+00> : vector<1x8x16xf32>
    %83 = tpu.matmul %82, %66, %cst_58 {dimension_numbers = #tpu.dot_dimension_numbers<[2], [1], [1], [2], [0, 0, 0, 1, 1, 2], [0], [0]>} : vector<1x8x8xbf16>, vector<1x8x16xbf16>, vector<1x8x16xf32> -> vector<1x8x16xf32>
    "tpu.trace_stop"() : () -> ()
    %c0_59 = arith.constant 0 : index
    %c0_60 = arith.constant 0 : index
    %c48_61 = arith.constant 48 : index
    %84 = vector.load %arg5[%c0_59, %c0_60, %c48_61] : memref<1x8x64xf32, #tpu.memory_space<vmem>>, vector<1x8x16xf32>
    tpu.vector_store %arg5[%c0_59, %c0_60, %c48_61], %83 {strides = array<i32>} : memref<1x8x64xf32, #tpu.memory_space<vmem>>, vector<1x8x16xf32>,
    %c0_62 = arith.constant 0 : index
    %c0_63 = arith.constant 0 : index
    %c0_64 = arith.constant 0 : index
    %85 = vector.load %arg5[%c0_62, %c0_63, %c0_64] : memref<1x8x64xf32, #tpu.memory_space<vmem>>, vector<1x8x64xf32>
    %86 = arith.truncf %85 : vector<1x8x64xf32> to vector<1x8x64xbf16>
    %c0_65 = arith.constant 0 : index
    %c0_66 = arith.constant 0 : index
    %c0_67 = arith.constant 0 : index
    %87 = vector.load %arg4[%c0_65, %c0_66, %c0_67] : memref<1x8x64xbf16, #tpu.memory_space<vmem>>, vector<1x8x64xbf16>
    tpu.vector_store %arg4[%c0_65, %c0_66, %c0_67], %86 {strides = array<i32>} : memref<1x8x64xbf16, #tpu.memory_space<vmem>>, vector<1x8x64xbf16>,
    return
  }
  func.func @transform_0(%arg0: i32) -> (i32, i32, i32) {
    %c0_i32 = arith.constant 0 : i32
    %c0_i32_0 = arith.constant 0 : i32
    %c0_i32_1 = arith.constant 0 : i32
    return %arg0, %c0_i32, %c0_i32_0 : i32, i32, i32
  }
  func.func @transform_1(%arg0: i32) -> (i32, i32, i32) {
    %c0_i32 = arith.constant 0 : i32
    %c0_i32_0 = arith.constant 0 : i32
    %c0_i32_1 = arith.constant 0 : i32
    return %arg0, %c0_i32, %c0_i32_0 : i32, i32, i32
  }
  func.func @transform_2(%arg0: i32) -> (i32, i32, i32) {
    %c0_i32 = arith.constant 0 : i32
    %c0_i32_0 = arith.constant 0 : i32
    %c0_i32_1 = arith.constant 0 : i32
    return %arg0, %c0_i32, %c0_i32_0 : i32, i32, i32
  }
  func.func @transform_3(%arg0: i32) -> (i32, i32, i32) {
    %c0_i32 = arith.constant 0 : i32
    %c0_i32_0 = arith.constant 0 : i32
    %c0_i32_1 = arith.constant 0 : i32
    return %arg0, %c0_i32, %c0_i32_0 : i32, i32, i32
  }
}

</mosaic_0001>

<bundles_post_ra>
// kernel: lxrt_model_forward.36
= control target key start
LH: loop header
LB: loop body
LE: loop exit
PB: predicated region body
PF: predicated region fallthrough
CT: control target
= control target key end

     0   :  { %7 = vsyncpa [#allocation3], 0  ;;  %s722_s0 = inlined_call_operand.hbm [shape: bf16[16,64], index: 0, kind: input, shape index: {}]   ;;  %s723_s1 = inlined_call_operand.hbm [shape: f32[2,64], index: 1, kind: input, shape index: {}]   ;;  %s724_s2 = inlined_call_operand.hbm [shape: bf16[16,64], index: 2, kind: output, shape index: {}]  }
   0x1   :  { %9 = vsyncpa [#allocation3 + $0x1], 0 }
   0x2   :  { %10 = vsyncpa [#allocation6], 0 }
   0x3   :  { %11 = vsyncpa [#allocation4], 0 }
   0x4   :  { %13 = vsyncpa [#allocation4 + $0x1], 0  ;;  %s521_s9 = smov 0   ;;  %s523_s10 = smov 0  }
   0x5   :  { %s525_s11 = smov 0   ;;  %s527_s12 = smov 0  }
   0x6 LB: > { %s542_s13 = sadd.s32 4294967295, %s501_s12   ;;  %s298_s14 = sadd.s32 4294967294, %s501_s12   ;;  %s501_s12 = sphi %s527_s12, %s748_s12   ;;  %s497_s11 = sphi %s525_s11, %s747_s11   ;;  %s493_s10 = sphi %s523_s10, %s746_s10   ;;  %s489_s9 = sphi %s521_s9, %s745_s9  }
   0x7   : > { %p39_p0 = scmp.ne.s32.totalorder %s493_s10, %s489_s9  ;;  %p725_p1 = scmp.eq.s32.totalorder %s542_s13, 0 }
   0x8   : > { %p90_p3 = scmp.eq.s32.totalorder %s298_s14, 1  ;;  %p299_p5 = scmp.ge.s32.totalorder %s501_s12, 1 }
   0x9   : > { %p551_p4 = por %p725_p1, %p39_p0  ;;  %p97_p7 = scmp.lt.s32.totalorder %s501_s12, 3 }
   0xa   : > { %p556_p6 = por %p90_p3, %p39_p0  ;;  %s503_s18 = smov [#allocation5]  }
   0xb   : > { %s728_s15 = scalar_select %p551_p4, 1, 0 }
   0xc   : > { %s729_s16 = scalar_select %p556_p6, 1, 0 }
   0xd   : > { %p561_p8 = pnand %p299_p5, %p97_p7  ;;  %s110_s19 = sshll.u32 %s503_s18, 4  ;;  %s111_s19 = int_to_ptr.vmem [resolvable:$true] %s110_s19 }
   0xe   : > { %s569_s20 = sadd.s32 1, %s501_s12   ;;  %s26_s24 = sadd.s32 1, %s497_s11 }
   0xf   : > { %s730_s17 = scalar_select %p561_p8, 1, 0 }
  0x10   : > { %p322_p10 = pneg %p561_p8  ;;  %s23_s22 = ssub.s32 %s501_s12, %s569_s20 }
  0x11   : > { %p579_p12 = scmp.eq.s32.totalorder %s23_s22, 0  ;;  %s373_s27 = scalar_lea.hbm %s723_s1, 32 }
  0x12   : > { %p573_p11 = pnand %p322_p10, %p725_p1  ;;  %p374_p0 = scmp.ne.s32.totalorder %s723_s1, %s373_s27 }
  0x13   : > { %s732_s23 = scalar_select %p579_p12, 1, 0 }
  0x14   : > { %p375_p3 = pneg %p573_p11  ;;  %p380_p10 = scmp.lt.u32.totalorder %s373_s27, %s723_s1 }
  0x16   : > { %p376_p5 = pnand %p375_p3, %p374_p0 }
  0x18   : > { %p377_p7 = pneg %p376_p5 }
  0x1a   : > { %p382_p9 = pnand %p380_p10, %p377_p7 }
  0x1c   : > { %385 = shalt.err (!%p382_p9)
}
  0x1d   : > { %s386_s4 = scalar_lea.vmem %s111_s19, 32  ;;  %p394_p6 = scmp.lt.s32.totalorder %s111_s19, %s111_s19 }
  0x1e   : > { %p387_p1 = scmp.ne.s32.totalorder %s111_s19, %s386_s4  ;;  %p395_p4 = scmp.lt.s32.totalorder %s386_s4, %s386_s4 }
  0x20   : > { %p389_p2 = pnand %p387_p1, %p375_p3  ;;  %p396_p8 = por %p395_p4, %p394_p6 }
  0x22   : > { %p390_p13 = pneg %p389_p2 }
  0x24   : > { %p397_p12 = pnand %p396_p8, %p390_p13 }
  0x26   : > { %400 = shalt.err (!%p397_p12)
}
  0x27   : > { %325 = dma.hbm_to_vmem [thread:$0]  (!%p573_p11), %s723_s1, 32, %s111_s19, [#allocation6]  }
  0x28   : > { %p733_p1 = scmp.ne.s32.totalorder %s732_s23, 0  ;;  %p34_p2 = scmp.eq.s32.totalorder %s501_s12, 0 }
  0x29   : > { %p734_p4 = scmp.ne.s32.totalorder %s497_s11, %s493_s10  ;;  %p735_p6 = scmp.eq.s32.totalorder %s542_s13, 1 }
  0x2a   : > { %s605_s7 = scalar_select %p733_p1, %s497_s11, %s26_s24  }
  0x2b   : > { %p613_p8 = por %p735_p6, %p734_p4  ;;  %p335_p9 = scmp.lt.s32.totalorder %s501_s12, 2 }
  0x2c   : > { %s121_s14 = sand.u32 1, %s497_s11   ;;  %p737_p12 = pmov %p734_p4 }
  0x2d   : > { %s302_s18 = sshll.u32 %s121_s14, 2  ;;  %s303_s21 = sshll.u32 %s501_s12, 6 }
  0x2e   : > { %p35_p13 = por %p34_p2, %p737_p12  ;;  %s626_s19 = scalar_lea.hbm %s722_s0, %s303_s21 }
  0x2f   : > { %s125_s23 = scalar_lea.vmem [#allocation2], %s302_s18  ;;  %s122_s27 = scalar_lea.sflag [#allocation3], %s121_s14 }
  0x30   : > { %s132_s24 = sshll.u32 %s125_s23, 4  ;;  %p628_p11 = pnand %p335_p9, %p35_p13  ;;  %s632_s24 = int_to_ptr.vmem [resolvable:$true] %s132_s24 }
  0x31   : > { %s401_s28 = scalar_lea.hbm %s626_s19, 64  ;;  %s406_s3 = scalar_lea.hbm %s722_s0, 128 }
  0x32   : > { %p402_p0 = scmp.ne.s32.totalorder %s626_s19, %s401_s28  ;;  %p403_p3 = pneg %p628_p11 }
  0x33   : > { %p407_p10 = scmp.lt.u32.totalorder %s626_s19, %s722_s0  ;;  %p408_p1 = scmp.lt.u32.totalorder %s406_s3, %s401_s28 }
  0x34   : > { %p404_p5 = pnand %p403_p3, %p402_p0  ;;  %p410_p4 = scmp.lt.u32.totalorder %s401_s28, %s626_s19 }
  0x35   : > { %p409_p2 = por %p408_p1, %p407_p10 }
  0x36   : > { %p405_p7 = pneg %p404_p5 }
  0x37   : > { %p411_p6 = por %p410_p4, %p409_p2 }
  0x39   : > { %p412_p9 = pnand %p411_p6, %p405_p7 }
  0x3b   : > { %415 = shalt.err (!%p412_p9)
}
  0x3c   : > { %s416_s6 = scalar_lea.vmem %s632_s24, 64  ;;  %s504_s14 = smov [#allocation2]  }
  0x3d   : > { %p417_p12 = scmp.ne.s32.totalorder %s632_s24, %s416_s6  ;;  %s421_s18 = sshll.u32 %s504_s14, 4  ;;  %s422_s18 = int_to_ptr.vmem [resolvable:$false] %s421_s18 }
  0x3e   : > { %s423_s21 = scalar_lea.vmem %s422_s18, 128  ;;  %p424_p5 = scmp.lt.s32.totalorder %s632_s24, %s422_s18 }
  0x3f   : > { %p419_p13 = pnand %p417_p12, %p403_p3  ;;  %p425_p10 = scmp.lt.s32.totalorder %s423_s21, %s416_s6 }
  0x41   : > { %p420_p0 = pneg %p419_p13  ;;  %p426_p1 = por %p425_p10, %p424_p5 }
  0x43   : > { %p427_p2 = pnand %p426_p1, %p420_p0 }
  0x45   : > { %430 = shalt.err (!%p427_p2)
}
  0x46   : > { %329 = dma.hbm_to_vmem [thread:$0]  (!%p628_p11), %s626_s19, 64, %s632_s24, %s122_s27  }
  0x47   : > { %p739_p7 = scmp.ne.s32.totalorder %s730_s17, 0 }
  0x48   : > { %s662_s22 = sand.u32 (!%p739_p7), 1, %s493_s10   ;;  %p740_p3 = scmp.ne.s32.totalorder (!%p739_p7), %s728_s15, 0 }
  0x49   : > { %141 = sbr.rel (%p739_p7) target bundleno = 416 (0x1a0), region = 28  ;;  %s305_s25 = sshll.u32 (!%p739_p7), %s662_s22, 2 }
  0x4a   : > { %s144_s23 = scalar_lea.sflag (!%p739_p7), [#allocation3], %s662_s22  ;;  %s147_s28 = scalar_lea.vmem (!%p739_p7), [#allocation2], %s305_s25 }
  0x50   : > { %476 = dma.done.wait (%p740_p3), %s144_s23, 64  }
  0x51   : > { %478 = vsyncadd (%p740_p3), %s144_s23, 4294967232  ;;  %p741_p4 = scmp.eq.s32.totalorder %s542_s13, 0 }
  0x53   : > { %480 = dma.done.wait (%p741_p4), [#allocation6], 32   ;;  %p742_p11 = pmov %p741_p4 }
  0x54   : > { %v172_v0 = vld [vmem:[%s147_s28] sm:$0xf]  ;;  %vm174_vm0 = vcmask 523264   ;;  %v308_v12 = vld [vmem:[#allocation5] ss:$0 sm:$0xff]  ;;  %s311_s15 = sshll.u32 %s542_s13, 6 }
  0x55   : > { %482 = vsyncadd (%p742_p11), [#allocation6], 4294967264  ;;  %v173_v1 = vunpack.c.l.bf16 %v172_v0  ;;  %v309_v14 = vld [vmem:[#allocation5 + $0x1] ss:$0 sm:$0xff]  ;;  %s171_s17 = scalar_lea.vmem [#allocation7], %s305_s25  ;;  %vm202_vm1 = vcmask 519168   ;;  %s678_s27 = scalar_lea.hbm %s724_s2, %s311_s15 }
  0x56   : > { %s218_s19 = sshll.u32 %s171_s17, 4  ;;  %s205_s29 = scalar_lea.sflag [#allocation4], %s662_s22  ;;  %s680_s19 = int_to_ptr.vmem [resolvable:$true] %s218_s19 }
  0x57   : > { %v175_v2 = vsel %vm174_vm0, %v173_v1, 0.0  ;;  %s431_s30 = scalar_lea.vmem %s680_s19, 64  ;;  %s505_s13 = smov [#allocation7]  }
  0x58   : > { %176 = vadd.xlane.f32.xlu0 %v175_v2  ;;  %p432_p6 = scmp.ne.s32.totalorder %s680_s19, %s431_s30  ;;  %s435_s3 = sshll.u32 %s505_s13, 4  ;;  %s436_s3 = int_to_ptr.vmem [resolvable:$false] %s435_s3 }
  0x59   : > { %s437_s4 = scalar_lea.vmem %s436_s3, 128  ;;  %p438_p13 = scmp.lt.s32.totalorder %s680_s19, %s436_s3 }
  0x5a   : > { %p433_p9 = pnand %p432_p6, %p613_p8  ;;  %p439_p0 = scmp.lt.s32.totalorder %s437_s4, %s431_s30 }
  0x5c   : > { %p434_p12 = pneg %p433_p9  ;;  %p440_p5 = por %p439_p0, %p438_p13 }
  0x5e   : > { %p441_p10 = pnand %p440_p5, %p434_p12 }
  0xe5   : > { %v177_v3 = vpop.xlane.xlu0 %176 }
  0xe6   : > { %v179_v4 = vmul.f32 0.015625, %v177_v3 }
  0xe8   : > { %v180_v5 = vsub.f32 %v173_v1, %v179_v4 }
  0xea   : > { %v181_v6 = vmul.f32 %v180_v5, %v180_v5 }
  0xec   : > { %v182_v7 = vsel %vm174_vm0, %v181_v6, 0.0 }
  0xed   : > { %183 = vadd.xlane.f32.xlu0 %v182_v7 }
 0x17a   : > { %v184_v8 = vpop.xlane.xlu0 %183 }
 0x17b   : > { %v185_v9 = vmul.f32 0.015625, %v184_v8 }
 0x17d   : > { %v186_v10 = vadd.f32 1e-12, %v185_v9 }
 0x17f   : > { %371 = vrsqrt.f32 %v186_v10 }
 0x189   : > { %v372_v11 = vpop.eup %371 }
 0x18a   : > { %v188_v13 = vmul.f32 %v372_v11, %v180_v5 }
 0x18c   : > { %v194_v15 = vmul.f32 %v308_v12, %v188_v13 }
 0x18e   : > { %v200_v16 = vadd.f32 %v309_v14, %v194_v15 }
 0x190   : > { %v201_v17 = vpack.c.bf16 %v200_v16, %v200_v16 }
 0x192   : > { %203 = vst.msk [vmem:[%s171_s17] sm:$0xf] %vm202_vm1, %v201_v17 }
 0x193   : > { %444 = shalt.err (!%p441_p10)
}
 0x194   : > { %s445_s5 = scalar_lea.hbm %s678_s27, 64  ;;  %s449_s18 = scalar_lea.hbm %s724_s2, 128 }
 0x195   : > { %p446_p1 = scmp.ne.s32.totalorder %s678_s27, %s445_s5  ;;  %p450_p3 = scmp.lt.u32.totalorder %s678_s27, %s724_s2 }
 0x196   : > { %p451_p4 = scmp.lt.u32.totalorder %s449_s18, %s445_s5  ;;  %p453_p6 = scmp.lt.u32.totalorder %s445_s5, %s678_s27 }
 0x197   : > { %p447_p2 = pnand %p446_p1, %p613_p8 }
 0x198   : > { %p452_p11 = por %p451_p4, %p450_p3 }
 0x199   : > { %p448_p7 = pneg %p447_p2 }
 0x19a   : > { %p454_p9 = por %p453_p6, %p452_p11 }
 0x19c   : > { %p455_p12 = pnand %p454_p9, %p448_p7 }
 0x19e   : > { %458 = shalt.err (!%p455_p12)
}
 0x19f   : > { %320 = dma.vmem_to_hbm [thread:$0]  (%p613_p8), %s680_s19, 64, %s678_s27, %s205_s29  }
 0x1a0 PF: > { %s230_s25 = sand.u32 1, %s489_s9   ;;  %p743_p13 = scmp.ne.s32.totalorder %s729_s16, 0 }
 0x1a1   : > { %p744_p0 = scmp.ge.s32.totalorder %s501_s12, 2  ;;  %s231_s23 = scalar_lea.sflag [#allocation4], %s230_s25 }
 0x1a3   : > { %p331_p5 = pnand %p744_p0, %p743_p13 }
 0x1a5   : > { %484 = dma.done.wait (!%p331_p5), %s231_s23, 64  }
 0x1a6   : > { %486 = vsyncadd (!%p331_p5), %s231_s23, 4294967232  ;;  %p16_p10 = scmp.ge.s32.totalorder %s569_s20, 4   ;;  %s745_s9 = smov %s493_s10 }
 0x1a7   : > { %s746_s10 = smov %s497_s11  ;;  %s747_s11 = smov %s605_s7 }
 0x1a8   : > { %s748_s12 = smov %s569_s20  ;;  %18 = sbr.rel (!%p16_p10) target bundleno = 6 (0x6), region = 77 }
 0x1af   :  { %236 = vsyncpa [#allocation3], 1 }
 0x1b0   :  { %238 = vsyncpa [#allocation3 + $0x1], 1 }
 0x1b1   :  { %239 = vsyncpa [#allocation6], 1 }
 0x1b2   :  { %240 = vsyncpa [#allocation4], 1 }
 0x1b3   :  { %242 = vsyncpa [#allocation4 + $0x1], 1 }

// kernel: lxrt_model_forward.41
= control target key start
LH: loop header
LB: loop body
LE: loop exit
PB: predicated region body
PF: predicated region fallthrough
CT: control target
= control target key end

     0   :  { %s1145_s0 = inlined_call_operand.hbm [shape: bf16[16,64], index: 0, kind: input, shape index: {}]   ;;  %s1146_s1 = inlined_call_operand.hbm [shape: bf16[64,64], index: 1, kind: input, shape index: {}]   ;;  %s1147_s2 = inlined_call_operand.hbm [shape: f32[3,64], index: 2, kind: input, shape index: {}]   ;;  %s1148_s3 = inlined_call_operand.hbm [shape: bf16[16,64], index: 3, kind: input, shape index: {}]   ;;  %s1149_s4 = inlined_call_operand.hbm [shape: bf16[16,64], index: 4, kind: output, shape index: {}]  }
   0x1   :  { %1155 = sst [smem:[#allocation15_spill]] %s1145_s0 }
   0x2   :  { %9 = vsyncpa [#allocation3], 0 }
   0x3   :  { %11 = vsyncpa [#allocation3 + $0x1], 0 }
   0x4   :  { %12 = vsyncpa [#allocation6], 0 }
   0x5   :  { %13 = vsyncpa [#allocation9], 0 }
   0x6   :  { %15 = vsyncpa [#allocation9 + $0x1], 0 }
   0x7   :  { %16 = vsyncpa [#allocation4], 0 }
   0x8   :  { %18 = vsyncpa [#allocation4 + $0x1], 0  ;;  %s870_s15 = smov 0   ;;  %s872_s16 = smov 0  }
   0x9   :  { %s874_s17 = smov 0   ;;  %s876_s18 = smov 0  }
   0xa LB: > { %s891_s19 = sadd.s32 4294967295, %s834_s18   ;;  %s518_s20 = sadd.s32 4294967294, %s834_s18   ;;  %s834_s18 = sphi %s876_s18, %s1175_s18   ;;  %s830_s17 = sphi %s874_s17, %s1174_s17   ;;  %s826_s16 = sphi %s872_s16, %s1173_s16   ;;  %s822_s15 = sphi %s870_s15, %s1172_s15  }
   0xb   : > { %p44_p0 = scmp.ne.s32.totalorder %s826_s16, %s822_s15  ;;  %p1150_p1 = scmp.eq.s32.totalorder %s891_s19, 0 }
   0xc   : > { %p142_p3 = scmp.eq.s32.totalorder %s518_s20, 1  ;;  %p519_p5 = scmp.ge.s32.totalorder %s834_s18, 1 }
   0xd   : > { %p900_p4 = por %p1150_p1, %p44_p0  ;;  %p149_p7 = scmp.lt.s32.totalorder %s834_s18, 3 }
   0xe   : > { %p905_p6 = por %p142_p3, %p44_p0  ;;  %s836_s24 = smov [#allocation5]  }
   0xf   : > { %s1156_s21 = scalar_select %p900_p4, 1, 0 }
  0x10   : > { %s1157_s22 = scalar_select %p905_p6, 1, 0 }
  0x11   : > { %p910_p8 = pnand %p519_p5, %p149_p7  ;;  %s161_s25 = sshll.u32 %s836_s24, 4  ;;  %s914_s25 = int_to_ptr.vmem [resolvable:$true] %s161_s25 }
  0x12   : > { %s837_s27 = smov [#allocation7]   ;;  %s644_s5 = scalar_lea.hbm %s1146_s1, 512 }
  0x13   : > { %s1158_s23 = scalar_select %p910_p8, 1, 0 }
  0x14   : > { %p576_p9 = pneg %p910_p8  ;;  %s175_s28 = sshll.u32 %s837_s27, 4  ;;  %s925_s28 = int_to_ptr.vmem [resolvable:$true] %s175_s28 }
  0x15   : > { %p645_p12 = scmp.ne.s32.totalorder %s1146_s1, %s644_s5  ;;  %p651_p5 = scmp.lt.u32.totalorder %s644_s5, %s1146_s1 }
  0x16   : > { %p921_p11 = pnand %p576_p9, %p1150_p1 }
  0x18   : > { %p646_p13 = pneg %p921_p11 }
  0x1a   : > { %p647_p0 = pnand %p646_p13, %p645_p12 }
  0x1c   : > { %p648_p3 = pneg %p647_p0 }
  0x1e   : > { %p653_p7 = pnand %p651_p5, %p648_p3 }
  0x20   : > { %656 = shalt.err (!%p653_p7)
}
  0x21   : > { %s657_s10 = scalar_lea.vmem %s914_s25, 512  ;;  %p665_p2 = scmp.lt.s32.totalorder %s914_s25, %s914_s25 }
  0x22   : > { %p658_p9 = scmp.ne.s32.totalorder %s914_s25, %s657_s10  ;;  %p666_p12 = scmp.lt.s32.totalorder %s657_s10, %s657_s10 }
  0x24   : > { %p660_p10 = pnand %p658_p9, %p646_p13  ;;  %p667_p0 = por %p666_p12, %p665_p2 }
  0x26   : > { %p661_p1 = pneg %p660_p10 }
  0x28   : > { %p668_p6 = pnand %p667_p0, %p661_p1 }
  0x2a   : > { %671 = shalt.err (!%p668_p6)
}
  0x2b   : > { %s838_s11 = smov 64   ;;  %s839_s12 = smov 4  }
  0x2c   : > { %579 = dma.hbm_to_vmem [thread:$0]  (!%p921_p11), %s1146_s1, 512, %s914_s25, [#allocation6], %s838_s11, %s838_s11, %s839_s12  }
  0x2d   : > { %s672_s27 = scalar_lea.hbm %s1147_s2, 64 }
  0x2e   : > { %p673_p2 = scmp.ne.s32.totalorder %s1147_s2, %s672_s27  ;;  %p679_p10 = scmp.lt.u32.totalorder %s672_s27, %s1147_s2 }
  0x30   : > { %p675_p1 = pnand %p673_p2, %p646_p13 }
  0x32   : > { %p676_p6 = pneg %p675_p1 }
  0x34   : > { %p681_p3 = pnand %p679_p10, %p676_p6 }
  0x36   : > { %684 = shalt.err (!%p681_p3)
}
  0x37   : > { %s685_s25 = scalar_lea.vmem %s925_s28, 64  ;;  %p693_p12 = scmp.lt.s32.totalorder %s925_s28, %s925_s28 }
  0x38   : > { %p686_p5 = scmp.ne.s32.totalorder %s925_s28, %s685_s25  ;;  %p694_p0 = scmp.lt.s32.totalorder %s685_s25, %s685_s25 }
  0x3a   : > { %p688_p7 = pnand %p686_p5, %p646_p13  ;;  %p695_p2 = por %p694_p0, %p693_p12 }
  0x3c   : > { %p689_p9 = pneg %p688_p7 }
  0x3e   : > { %p696_p1 = pnand %p695_p2, %p689_p9 }
  0x40   : > { %699 = shalt.err (!%p696_p1)
}
  0x41   : > { %582 = dma.hbm_to_vmem [thread:$0]  (!%p921_p11), %s1147_s2, 64, %s925_s28, [#allocation6]  }
  0x42   : > { %s980_s9 = sadd.s32 1, %s834_s18   ;;  %s31_s26 = sadd.s32 1, %s830_s17 }
  0x43   : > { %s28_s10 = ssub.s32 %s834_s18, %s980_s9  ;;  %p38_p13 = scmp.ne.s32.totalorder %s830_s17, %s826_s16 }
  0x44   : > { %p29_p6 = scmp.eq.s32.totalorder %s28_s10, 0  ;;  %p39_p10 = scmp.eq.s32.totalorder %s834_s18, 0 }
  0x45   : > { %p1160_p3 = scmp.eq.s32.totalorder %s891_s19, 1  ;;  %p596_p7 = scmp.lt.s32.totalorder %s834_s18, 2 }
  0x46   : > { %s996_s12 = scalar_select %p29_p6, %s830_s17, %s31_s26  }
  0x47   : > { %p990_p5 = por %p1160_p3, %p38_p13  ;;  %p40_p9 = por %p39_p10, %p38_p13 }
  0x48   : > { %s999_s13 = sand.u32 1, %s830_s17   ;;  %s524_s14 = sshll.u32 %s834_s18, 6 }
  0x49   : > { %s1161_s11 = scalar_select %p990_p5, 1, 0 }
  0x4a   : > { %s1151_s28 = sshll.u32 %s999_s13, 2  ;;  %s1162_s0 = sld [smem:[#allocation15_spill]] }
  0x4b   : > { %s190_s29 = scalar_lea.vmem [#allocation2], %s1151_s28  ;;  %p1012_p11 = pnand %p596_p7, %p40_p9 }
  0x4c   : > { %s197_s30 = sshll.u32 %s190_s29, 4  ;;  %s1019_s7 = scalar_lea.hbm %s1148_s3, %s524_s14  ;;  %s1010_s30 = int_to_ptr.vmem [resolvable:$true] %s197_s30 }
  0x4d   : > { %s187_s8 = scalar_lea.sflag [#allocation3], %s999_s13  ;;  %p702_p0 = pneg %p1012_p11 }
  0x50   : > { %s1006_s27 = scalar_lea.hbm %s1162_s0, %s524_s14  ;;  %s705_s24 = scalar_lea.hbm %s1162_s0, 128 }
  0x51   : > { %s700_s26 = scalar_lea.hbm %s1006_s27, 64  ;;  %p706_p13 = scmp.lt.u32.totalorder %s1006_s27, %s1162_s0 }
  0x52   : > { %p701_p12 = scmp.ne.s32.totalorder %s1006_s27, %s700_s26  ;;  %p707_p6 = scmp.lt.u32.totalorder %s705_s24, %s700_s26 }
  0x53   : > { %p709_p3 = scmp.lt.u32.totalorder %s700_s26, %s1006_s27 }
  0x54   : > { %p703_p2 = pnand %p702_p0, %p701_p12  ;;  %p708_p10 = por %p707_p6, %p706_p13 }
  0x56   : > { %p704_p1 = pneg %p703_p2  ;;  %p710_p7 = por %p709_p3, %p708_p10 }
  0x58   : > { %p711_p9 = pnand %p710_p7, %p704_p1 }
  0x5a   : > { %714 = shalt.err (!%p711_p9)
}
  0x5b   : > { %s715_s14 = scalar_lea.vmem %s1010_s30, 64  ;;  %s840_s6 = smov [#allocation2]  }
  0x5c   : > { %p716_p12 = scmp.ne.s32.totalorder %s1010_s30, %s715_s14  ;;  %s720_s25 = sshll.u32 %s840_s6, 4  ;;  %s721_s25 = int_to_ptr.vmem [resolvable:$false] %s720_s25 }
  0x5d   : > { %s722_s28 = scalar_lea.vmem %s721_s25, 128  ;;  %p723_p4 = scmp.lt.s32.totalorder %s1010_s30, %s721_s25 }
  0x5e   : > { %p718_p2 = pnand %p716_p12, %p702_p0  ;;  %p724_p13 = scmp.lt.s32.totalorder %s722_s28, %s715_s14 }
  0x60   : > { %p719_p5 = pneg %p718_p2  ;;  %p725_p6 = por %p724_p13, %p723_p4 }
  0x62   : > { %p726_p10 = pnand %p725_p6, %p719_p5 }
  0x64   : > { %729 = shalt.err (!%p726_p10)
}
  0x65   : > { %586 = dma.hbm_to_vmem [thread:$0]  (!%p1012_p11), %s1006_s27, 64, %s1010_s30, %s187_s8  }
  0x66   : > { %s1164_s26 = sshll.u32 %s999_s13, 2  ;;  %s205_s24 = scalar_lea.sflag [#allocation9], %s999_s13 }
  0x67   : > { %s208_s10 = scalar_lea.vmem [#allocation8], %s1164_s26  ;;  %s730_s29 = scalar_lea.hbm %s1019_s7, 64 }
  0x68   : > { %s215_s20 = sshll.u32 %s208_s10, 4  ;;  %p731_p4 = scmp.ne.s32.totalorder %s1019_s7, %s730_s29  ;;  %s216_s20 = int_to_ptr.vmem [resolvable:$true] %s215_s20 }
  0x69   : > { %s735_s25 = scalar_lea.hbm %s1148_s3, 128  ;;  %p736_p3 = scmp.lt.u32.totalorder %s1019_s7, %s1148_s3 }
  0x6a   : > { %p733_p5 = pnand %p731_p4, %p702_p0  ;;  %p737_p7 = scmp.lt.u32.totalorder %s735_s25, %s730_s29 }
  0x6b   : > { %p739_p12 = scmp.lt.u32.totalorder %s730_s29, %s1019_s7 }
  0x6c   : > { %p734_p1 = pneg %p733_p5  ;;  %p738_p9 = por %p737_p7, %p736_p3 }
  0x6e   : > { %p740_p2 = por %p739_p12, %p738_p9 }
  0x70   : > { %p741_p13 = pnand %p740_p2, %p734_p1 }
  0x72   : > { %744 = shalt.err (!%p741_p13)
}
  0x73   : > { %s745_s13 = scalar_lea.vmem %s216_s20, 64  ;;  %s841_s27 = smov [#allocation8]  }
  0x74   : > { %p746_p6 = scmp.ne.s32.totalorder %s216_s20, %s745_s13  ;;  %s750_s30 = sshll.u32 %s841_s27, 4  ;;  %s751_s30 = int_to_ptr.vmem [resolvable:$false] %s750_s30 }
  0x75   : > { %s752_s8 = scalar_lea.vmem %s751_s30, 128  ;;  %p753_p5 = scmp.lt.s32.totalorder %s216_s20, %s751_s30 }
  0x76   : > { %p748_p10 = pnand %p746_p6, %p702_p0  ;;  %p754_p8 = scmp.lt.s32.totalorder %s752_s8, %s745_s13 }
  0x78   : > { %p749_p4 = pneg %p748_p10  ;;  %p755_p3 = por %p754_p8, %p753_p5 }
  0x7a   : > { %p756_p7 = pnand %p755_p3, %p749_p4 }
  0x7c   : > { %759 = shalt.err (!%p756_p7)
}
  0x7d   : > { %589 = dma.hbm_to_vmem [thread:$0]  (!%p1012_p11), %s1019_s7, 64, %s216_s20, %s205_s24  }
  0x7e   : > { %p1165_p1 = scmp.ne.s32.totalorder %s1158_s23, 0 }
  0x7f   : > { %s1072_s0 = sand.u32 (!%p1165_p1), 1, %s826_s16   ;;  %p1166_p8 = scmp.ne.s32.totalorder (!%p1165_p1), %s1156_s21, 0 }
  0x80   : > { %224 = sbr.rel (%p1165_p1) target bundleno = 704 (0x2c0), region = 36  ;;  %s1075_s26 = sshll.u32 (!%p1165_p1), %s1072_s0, 2 }
  0x81   : > { %s227_s10 = scalar_lea.sflag (!%p1165_p1), [#allocation3], %s1072_s0  ;;  %s230_s29 = scalar_lea.vmem (!%p1165_p1), [#allocation2], %s1075_s26 }
  0x87   : > { %805 = dma.done.wait (%p1166_p8), %s227_s10, 64  }
  0x88   : > { %807 = vsyncadd (%p1166_p8), %s227_s10, 4294967232  ;;  %p1167_p11 = scmp.eq.s32.totalorder %s891_s19, 0 }
  0x8a   : > { %809 = dma.done.wait (%p1167_p11), [#allocation6], 576   ;;  %p1168_p0 = pmov %p1167_p11 }
  0x8b   : > { %s244_s23 = scalar_lea.sflag [#allocation9], %s1072_s0  ;;  %s247_s5 = scalar_lea.vmem [#allocation8], %s1075_s26 }
  0x8c   : > { %811 = vsyncadd (%p1168_p0), [#allocation6], 4294966720 }
  0x8d   : > { %813 = dma.done.wait (%p1166_p8), %s244_s23, 64  }
  0x8e   : > { %815 = vsyncadd (%p1166_p8), %s244_s23, 4294967232  ;;  %v842_v0 = vmov 0.0   ;;  %vm843_vm0 = vmmov 0   ;;  %v638_v1 = vld [vmem:[#allocation5] sm:$0xff]   ;;  %v639_v2 = vld [vmem:[#allocation5 + $0x8] sm:$0xff]   ;;  %vm316_vm1 = vcmask 523264  }
  0x8f   : > { %550 = vmatprep.subr.bf16.mxu0 %v842_v0  ;;  %558 = vmatprep.mubr.msk.bf16.mxu0 %vm843_vm0, %v842_v0  ;;  %v640_v3 = vld [vmem:[#allocation5 + $0x10] sm:$0xff]   ;;  %v641_v4 = vld [vmem:[#allocation5 + $0x18] sm:$0xff]   ;;  %v360_v6 = vld [vmem:[%s247_s5] sm:$0xf]  ;;  %s542_s21 = sshll.u32 %s891_s19, 6  ;;  %s276_s7 = scalar_lea.vmem [#allocation10], %s1075_s26 }
  0x90   : > { %551 = vmatpush3.bf16.msra.mxu0 %v638_v1  ;;  %v278_v5 = vld [vmem:[%s230_s29] sm:$0xf]  ;;  %v533_v7 = vld [vmem:[#allocation7] ss:$0 sm:$0xff]  ;;  %v361_v8 = vunpack.c.l.bf16 %v360_v6  ;;  %v539_v25 = vld [vmem:[#allocation7 + $0x1] ss:$0 sm:$0xff]  ;;  %s1101_s6 = scalar_lea.hbm %s1149_s4, %s542_s21 }
  0x91   : > { %552 = vmatprep.subr.bf16.mxu0 %v842_v0  ;;  %v540_v27 = vld [vmem:[#allocation7 + $0x2] ss:$0 sm:$0xff]  ;;  %s406_s20 = sshll.u32 %s276_s7, 4  ;;  %vm390_vm2 = vcmask 519168   ;;  %s393_s25 = scalar_lea.sflag [#allocation4], %s1072_s0  ;;  %s1103_s20 = int_to_ptr.vmem [resolvable:$true] %s406_s20 }
  0x92   : > { %s760_s28 = scalar_lea.vmem %s1103_s20, 64  ;;  %p1169_p12 = scmp.ne.s32.totalorder %s1161_s11, 0 }
  0x93   : > { %p761_p9 = scmp.ne.s32.totalorder %s1103_s20, %s760_s28  ;;  %s844_s19 = smov [#allocation10]  }
  0x94   : > { %553 = vmatpush3.bf16.msra.mxu0 %v639_v2  ;;  %s764_s13 = sshll.u32 %s844_s19, 4  ;;  %s765_s13 = int_to_ptr.vmem [resolvable:$false] %s764_s13 }
  0x95   : > { %554 = vmatprep.subr.bf16.mxu0 %v842_v0  ;;  %p762_p2 = pnand %p761_p9, %p1169_p12  ;;  %s766_s27 = scalar_lea.vmem %s765_s13, 128 }
  0x96   : > { %p767_p6 = scmp.lt.s32.totalorder %s1103_s20, %s765_s13  ;;  %p768_p10 = scmp.lt.s32.totalorder %s766_s27, %s760_s28 }
  0x97   : > { %p763_p13 = pneg %p762_p2 }
  0x98   : > { %555 = vmatpush3.bf16.msra.mxu0 %v640_v3  ;;  %p769_p4 = por %p768_p10, %p767_p6 }
  0x99   : > { %556 = vmatprep.subr.bf16.mxu0 %v842_v0 }
  0x9a   : > { %p770_p5 = pnand %p769_p4, %p763_p13 }
  0x9c   : > { %557 = vmatpush3.bf16.msra.mxu0 %v641_v4 }
  0x9f   : > { %559 = vmatmul.mubr.msk.bf16.vlgmr.msra.gmra.mrb[0].mxu0 %vm316_vm1, %v278_v5 }
 0x172   : > { %v354_v9 = vpop.f32.mrb[0].mxu0 }
 0x173   : > { %v355_v10 = vadd.f32 %v533_v7, %v354_v9  ;;  %v560_v11 = vpop.f32.mrb[1].mxu0 }
 0x174   : > { %v357_v12 = vpop.f32.mrb[2].mxu0 }
 0x175   : > { %v561_v13 = vpop.f32.mrb[3].mxu0  ;;  %v362_v14 = vadd.f32 %v361_v8, %v355_v10 }
 0x177   : > { %v363_v15 = vsel %vm316_vm1, %v362_v14, 0.0 }
 0x178   : > { %364 = vadd.xlane.f32.xlu0 %v363_v15 }
 0x205   : > { %v365_v16 = vpop.xlane.xlu0 %364 }
 0x206   : > { %v367_v17 = vmul.f32 0.015625, %v365_v16 }
 0x208   : > { %v368_v18 = vsub.f32 %v362_v14, %v367_v17 }
 0x20a   : > { %v369_v19 = vmul.f32 %v368_v18, %v368_v18 }
 0x20c   : > { %v370_v20 = vsel %vm316_vm1, %v369_v19, 0.0 }
 0x20d   : > { %371 = vadd.xlane.f32.xlu0 %v370_v20 }
 0x29a   : > { %v372_v21 = vpop.xlane.xlu0 %371 }
 0x29b   : > { %v373_v22 = vmul.f32 0.015625, %v372_v21 }
 0x29d   : > { %v374_v23 = vadd.f32 1e-08, %v373_v22 }
 0x29f   : > { %642 = vrsqrt.f32 %v374_v23 }
 0x2a9   : > { %v643_v24 = vpop.eup %642 }
 0x2aa   : > { %v376_v26 = vmul.f32 %v643_v24, %v368_v18 }
 0x2ac   : > { %v382_v28 = vmul.f32 %v539_v25, %v376_v26 }
 0x2ae   : > { %v388_v29 = vadd.f32 %v540_v27, %v382_v28 }
 0x2b0   : > { %v389_v30 = vpack.c.bf16 %v388_v29, %v388_v29 }
 0x2b2   : > { %391 = vst.msk [vmem:[%s276_s7] sm:$0xf] %vm390_vm2, %v389_v30 }
 0x2b3   : > { %773 = shalt.err (!%p770_p5)
}
 0x2b4   : > { %s774_s30 = scalar_lea.hbm %s1101_s6, 64  ;;  %s778_s26 = scalar_lea.hbm %s1149_s4, 128 }
 0x2b5   : > { %p775_p3 = scmp.ne.s32.totalorder %s1101_s6, %s774_s30  ;;  %p779_p8 = scmp.lt.u32.totalorder %s1101_s6, %s1149_s4 }
 0x2b6   : > { %p780_p11 = scmp.lt.u32.totalorder %s778_s26, %s774_s30  ;;  %p782_p9 = scmp.lt.u32.totalorder %s774_s30, %s1101_s6 }
 0x2b7   : > { %p776_p7 = pnand %p775_p3, %p1169_p12 }
 0x2b8   : > { %p781_p0 = por %p780_p11, %p779_p8 }
 0x2b9   : > { %p777_p1 = pneg %p776_p7 }
 0x2ba   : > { %p783_p2 = por %p782_p9, %p781_p0 }
 0x2bc   : > { %p784_p13 = pnand %p783_p2, %p777_p1 }
 0x2be   : > { %787 = shalt.err (!%p784_p13)
}
 0x2bf   : > { %574 = dma.vmem_to_hbm [thread:$0]  (%p1169_p12), %s1103_s20, 64, %s1101_s6, %s393_s25  }
 0x2c0 PF: > { %s418_s23 = sand.u32 1, %s822_s15   ;;  %p1170_p6 = scmp.ne.s32.totalorder %s1157_s22, 0 }
 0x2c1   : > { %p1171_p10 = scmp.ge.s32.totalorder %s834_s18, 2  ;;  %s419_s5 = scalar_lea.sflag [#allocation4], %s418_s23 }
 0x2c3   : > { %p591_p4 = pnand %p1171_p10, %p1170_p6 }
 0x2c5   : > { %817 = dma.done.wait (!%p591_p4), %s419_s5, 64  }
 0x2c6   : > { %819 = vsyncadd (!%p591_p4), %s419_s5, 4294967232  ;;  %p21_p5 = scmp.ge.s32.totalorder %s980_s9, 4   ;;  %s1172_s15 = smov %s826_s16 }
 0x2c7   : > { %s1173_s16 = smov %s830_s17  ;;  %s1174_s17 = smov %s996_s12 }
 0x2c8   : > { %s1175_s18 = smov %s980_s9  ;;  %23 = sbr.rel (!%p21_p5) target bundleno = 10 (0xa), region = 102 }
 0x2cf   :  { %424 = vsyncpa [#allocation3], 1 }
 0x2d0   :  { %426 = vsyncpa [#allocation3 + $0x1], 1 }
 0x2d1   :  { %427 = vsyncpa [#allocation6], 1 }
 0x2d2   :  { %428 = vsyncpa [#allocation9], 1 }
 0x2d3   :  { %430 = vsyncpa [#allocation9 + $0x1], 1 }
 0x2d4   :  { %431 = vsyncpa [#allocation4], 1 }
 0x2d5   :  { %433 = vsyncpa [#allocation4 + $0x1], 1 }

// kernel: lxrt_model_forward.39
= control target key start
LH: loop header
LB: loop body
LE: loop exit
PB: predicated region body
PF: predicated region fallthrough
CT: control target
= control target key end

     0   :  { %8 = vsyncpa [#allocation3], 0  ;;  %s962_s0 = inlined_call_operand.hbm [shape: bf16[16,64], index: 0, kind: input, shape index: {}]   ;;  %s963_s1 = inlined_call_operand.hbm [shape: bf16[64,192], index: 1, kind: input, shape index: {}]   ;;  %s964_s2 = inlined_call_operand.hbm [shape: f32[1,192], index: 2, kind: input, shape index: {}]   ;;  %s965_s3 = inlined_call_operand.hbm [shape: bf16[16,192], index: 3, kind: output, shape index: {}]  }
   0x1   :  { %10 = vsyncpa [#allocation3 + $0x1], 0 }
   0x2   :  { %11 = vsyncpa [#allocation6], 0 }
   0x3   :  { %12 = vsyncpa [#allocation4], 0 }
   0x4   :  { %14 = vsyncpa [#allocation4 + $0x1], 0  ;;  %s732_s12 = smov 0   ;;  %s734_s13 = smov 0  }
   0x5   :  { %s736_s14 = smov 0   ;;  %s738_s15 = smov 0  }
   0x6 LB: > { %s753_s16 = sadd.s32 4294967295, %s703_s15   ;;  %s436_s17 = sadd.s32 4294967294, %s703_s15   ;;  %s703_s15 = sphi %s738_s15, %s985_s15   ;;  %s699_s14 = sphi %s736_s14, %s984_s14   ;;  %s695_s13 = sphi %s734_s13, %s983_s13   ;;  %s691_s12 = sphi %s732_s12, %s982_s12  }
   0x7   : > { %p40_p0 = scmp.ne.s32.totalorder %s695_s13, %s691_s12  ;;  %p966_p1 = scmp.eq.s32.totalorder %s753_s16, 0 }
   0x8   : > { %p112_p3 = scmp.eq.s32.totalorder %s436_s17, 1  ;;  %p437_p5 = scmp.ge.s32.totalorder %s703_s15, 1 }
   0x9   : > { %p762_p4 = por %p966_p1, %p40_p0  ;;  %p119_p7 = scmp.lt.s32.totalorder %s703_s15, 3 }
   0xa   : > { %p767_p6 = por %p112_p3, %p40_p0  ;;  %s705_s21 = smov [#allocation5]  }
   0xb   : > { %s969_s18 = scalar_select %p762_p4, 1, 0 }
   0xc   : > { %s970_s19 = scalar_select %p767_p6, 1, 0 }
   0xd   : > { %p772_p8 = pnand %p437_p5, %p119_p7  ;;  %s131_s22 = sshll.u32 %s705_s21, 4  ;;  %s776_s22 = int_to_ptr.vmem [resolvable:$true] %s131_s22 }
   0xe   : > { %s706_s24 = smov [#allocation7]   ;;  %s547_s28 = scalar_lea.hbm %s963_s1, 1024 }
   0xf   : > { %p477_p9 = pneg %p772_p8  ;;  %s145_s25 = sshll.u32 %s706_s24, 4  ;;  %s787_s25 = int_to_ptr.vmem [resolvable:$true] %s145_s25 }
  0x10   : > { %p548_p12 = scmp.ne.s32.totalorder %s963_s1, %s547_s28  ;;  %p554_p5 = scmp.lt.u32.totalorder %s547_s28, %s963_s1 }
  0x11   : > { %p783_p11 = pnand %p477_p9, %p966_p1 }
  0x13   : > { %p549_p13 = pneg %p783_p11 }
  0x15   : > { %p550_p0 = pnand %p549_p13, %p548_p12 }
  0x17   : > { %p551_p3 = pneg %p550_p0 }
  0x19   : > { %p556_p7 = pnand %p554_p5, %p551_p3 }
  0x1b   : > { %559 = shalt.err (!%p556_p7)
}
  0x1c   : > { %s560_s6 = scalar_lea.vmem %s776_s22, 1024  ;;  %p568_p2 = scmp.lt.s32.totalorder %s776_s22, %s776_s22 }
  0x1d   : > { %p561_p9 = scmp.ne.s32.totalorder %s776_s22, %s560_s6  ;;  %p569_p12 = scmp.lt.s32.totalorder %s560_s6, %s560_s6 }
  0x1f   : > { %p563_p10 = pnand %p561_p9, %p549_p13  ;;  %p570_p0 = por %p569_p12, %p568_p2 }
  0x21   : > { %p564_p1 = pneg %p563_p10 }
  0x23   : > { %p571_p6 = pnand %p570_p0, %p564_p1 }
  0x25   : > { %574 = shalt.err (!%p571_p6)
}
  0x26   : > { %s707_s7 = smov 128   ;;  %s708_s8 = smov 8  }
  0x27   : > { %480 = dma.hbm_to_vmem [thread:$0]  (!%p783_p11), %s963_s1, 1024, %s776_s22, [#allocation6], %s707_s7, %s707_s7, %s708_s8  }
  0x28   : > { %s575_s21 = scalar_lea.hbm %s964_s2, 32 }
  0x29   : > { %p576_p2 = scmp.ne.s32.totalorder %s964_s2, %s575_s21  ;;  %p582_p10 = scmp.lt.u32.totalorder %s575_s21, %s964_s2 }
  0x2b   : > { %p578_p1 = pnand %p576_p2, %p549_p13 }
  0x2d   : > { %p579_p6 = pneg %p578_p1 }
  0x2f   : > { %p584_p3 = pnand %p582_p10, %p579_p6 }
  0x31   : > { %587 = shalt.err (!%p584_p3)
}
  0x32   : > { %s588_s22 = scalar_lea.vmem %s787_s25, 32  ;;  %p596_p12 = scmp.lt.s32.totalorder %s787_s25, %s787_s25 }
  0x33   : > { %p589_p5 = scmp.ne.s32.totalorder %s787_s25, %s588_s22  ;;  %p597_p0 = scmp.lt.s32.totalorder %s588_s22, %s588_s22 }
  0x35   : > { %p591_p7 = pnand %p589_p5, %p549_p13  ;;  %p598_p2 = por %p597_p0, %p596_p12 }
  0x37   : > { %p592_p9 = pneg %p591_p7 }
  0x39   : > { %p599_p1 = pnand %p598_p2, %p592_p9 }
  0x3b   : > { %602 = shalt.err (!%p599_p1)
}
  0x3c   : > { %483 = dma.hbm_to_vmem [thread:$0]  (!%p783_p11), %s964_s2, 32, %s787_s25, [#allocation6]  }
  0x3d   : > { %s842_s4 = sadd.s32 1, %s703_s15   ;;  %s27_s23 = sadd.s32 1, %s699_s14 }
  0x3e   : > { %s24_s5 = ssub.s32 %s703_s15, %s842_s4  ;;  %p34_p13 = scmp.ne.s32.totalorder %s699_s14, %s695_s13 }
  0x3f   : > { %p25_p6 = scmp.eq.s32.totalorder %s24_s5, 0  ;;  %p35_p10 = scmp.eq.s32.totalorder %s703_s15, 0 }
  0x40   : > { %p973_p3 = scmp.eq.s32.totalorder %s753_s16, 1  ;;  %p494_p7 = scmp.lt.s32.totalorder %s703_s15, 2 }
  0x41   : > { %s858_s7 = scalar_select %p25_p6, %s699_s14, %s27_s23  }
  0x42   : > { %p852_p5 = por %p973_p3, %p34_p13  ;;  %p36_p9 = por %p35_p10, %p34_p13 }
  0x43   : > { %s156_s8 = sand.u32 1, %s699_s14   ;;  %s442_s25 = sshll.u32 %s703_s15, 6 }
  0x44   : > { %s974_s6 = scalar_select %p852_p5, 1, 0 }
  0x45   : > { %s441_s9 = sshll.u32 %s156_s8, 2  ;;  %s865_s17 = scalar_lea.hbm %s962_s0, %s442_s25 }
  0x46   : > { %s160_s21 = scalar_lea.vmem [#allocation2], %s441_s9  ;;  %p869_p11 = pnand %p494_p7, %p36_p9 }
  0x47   : > { %s167_s24 = sshll.u32 %s160_s21, 4  ;;  %s157_s27 = scalar_lea.sflag [#allocation3], %s156_s8  ;;  %s867_s24 = int_to_ptr.vmem [resolvable:$true] %s167_s24 }
  0x48   : > { %s603_s28 = scalar_lea.hbm %s865_s17, 64  ;;  %p605_p0 = pneg %p869_p11 }
  0x49   : > { %p604_p12 = scmp.ne.s32.totalorder %s865_s17, %s603_s28  ;;  %s608_s30 = scalar_lea.hbm %s962_s0, 128 }
  0x4a   : > { %p609_p13 = scmp.lt.u32.totalorder %s865_s17, %s962_s0  ;;  %p610_p6 = scmp.lt.u32.totalorder %s608_s30, %s603_s28 }
  0x4b   : > { %p606_p2 = pnand %p605_p0, %p604_p12  ;;  %p612_p3 = scmp.lt.u32.totalorder %s603_s28, %s865_s17 }
  0x4c   : > { %p611_p10 = por %p610_p6, %p609_p13 }
  0x4d   : > { %p607_p1 = pneg %p606_p2 }
  0x4e   : > { %p613_p7 = por %p612_p3, %p611_p10 }
  0x50   : > { %p614_p9 = pnand %p613_p7, %p607_p1 }
  0x52   : > { %617 = shalt.err (!%p614_p9)
}
  0x53   : > { %s618_s8 = scalar_lea.vmem %s867_s24, 64  ;;  %s709_s9 = smov [#allocation2]  }
  0x54   : > { %p619_p12 = scmp.ne.s32.totalorder %s867_s24, %s618_s8  ;;  %s623_s25 = sshll.u32 %s709_s9, 4  ;;  %s624_s25 = int_to_ptr.vmem [resolvable:$false] %s623_s25 }
  0x55   : > { %s625_s10 = scalar_lea.vmem %s624_s25, 128  ;;  %p626_p4 = scmp.lt.s32.totalorder %s867_s24, %s624_s25 }
  0x56   : > { %p621_p2 = pnand %p619_p12, %p605_p0  ;;  %p627_p13 = scmp.lt.s32.totalorder %s625_s10, %s618_s8 }
  0x58   : > { %p622_p5 = pneg %p621_p2  ;;  %p628_p6 = por %p627_p13, %p626_p4 }
  0x5a   : > { %p629_p10 = pnand %p628_p6, %p622_p5 }
  0x5c   : > { %632 = shalt.err (!%p629_p10)
}
  0x5d   : > { %487 = dma.hbm_to_vmem [thread:$0]  (!%p869_p11), %s865_s17, 64, %s867_s24, %s157_s27  }
  0x5e   : > { %176 = sbr.rel (%p772_p8) target bundleno = 353 (0x161), region = 32  ;;  %s901_s11 = sand.u32 (!%p772_p8), 1, %s695_s13  }
  0x5f   : > { %s444_s21 = sshll.u32 (!%p772_p8), %s901_s11, 2  ;;  %s179_s28 = scalar_lea.sflag (!%p772_p8), [#allocation3], %s901_s11 }
  0x60   : > { %s182_s22 = scalar_lea.vmem (!%p772_p8), [#allocation2], %s444_s21  ;;  %p976_p4 = scmp.ne.s32.totalorder (!%p772_p8), %s969_s18, 0 }
  0x65   : > { %678 = dma.done.wait (%p976_p4), %s179_s28, 64  }
  0x66   : > { %680 = vsyncadd (%p976_p4), %s179_s28, 4294967232  ;;  %p977_p5 = scmp.eq.s32.totalorder %s753_s16, 0 }
  0x68   : > { %682 = dma.done.wait (%p977_p5), [#allocation6], 1056   ;;  %p978_p11 = pmov %p977_p5 }
  0x69   : > { %v710_v0 = vmov 0   ;;  %v535_v1 = vld [vmem:[#allocation5 + $0x4] ss:$8 sps:$4 sm:$0xff]   ;;  %v537_v2 = vld [vmem:[#allocation5] ss:$8 sps:$4 sm:$0xff]   ;;  %vm275_vm0 = vcmask 523264   ;;  %v225_v10 = vlaneseq }
  0x6a   : > { %684 = vsyncadd (%p978_p11), [#allocation6], 4294966240  ;;  %311 = vmatprep.mubr.bf16.mxu0 %v710_v0  ;;  %279 = vmatprep.subr.bf16.mxu0 %v535_v1  ;;  %v538_v3 = vld [vmem:[#allocation5 + $0x14] ss:$8 sps:$4 sm:$0xff]   ;;  %v540_v4 = vld [vmem:[#allocation5 + $0x10] ss:$8 sps:$4 sm:$0xff]  }
  0x6b   : > { %280 = vmatpush1.bf16.msra.mxu0 %v537_v2  ;;  %v541_v5 = vld [vmem:[#allocation5 + $0x24] ss:$8 sps:$4 sm:$0xff]   ;;  %v543_v6 = vld [vmem:[#allocation5 + $0x20] ss:$8 sps:$4 sm:$0xff]   ;;  %v544_v7 = vld [vmem:[#allocation5 + $0x34] ss:$8 sps:$4 sm:$0xff]  }
  0x6c   : > { %281 = vmatprep.subr.bf16.mxu0 %v538_v3  ;;  %v546_v8 = vld [vmem:[#allocation5 + $0x30] ss:$8 sps:$4 sm:$0xff]   ;;  %v226_v11 = vshrl.u32 %v225_v10, 7  ;;  %v223_v13 = vld [vmem:[#allocation7] sm:$0x3]  ;;  %s447_s18 = sshll.u32 %s901_s11, 3 }
  0x6d   : > { %v214_v9 = vld [vmem:[%s182_s22] sm:$0xf]  ;;  %vm328_vm1 = vcmask 1043456   ;;  %vm329_vm2 = vcmask 523268   ;;  %s464_s20 = sshll.u32 %s753_s16, 7  ;;  %s212_s17 = scalar_lea.vmem [#allocation8], %s447_s18 }
  0x6e   : > { %v227_v12 = vsub.s32 0, %v226_v11  ;;  %v231_v14 = vsub.s32 1, %v226_v11  ;;  %s347_s24 = sshll.u32 %s212_s17, 4  ;;  %vm330_vm3 = vmor %vm329_vm2, %vm328_vm1  ;;  %s918_s29 = scalar_lea.hbm %s965_s3, %s464_s20  ;;  %s920_s24 = int_to_ptr.vmem [resolvable:$true] %s347_s24 }
  0x6f   : > { %282 = vmatpush1.bf16.msra.mxu0 %v540_v4  ;;  %s333_s30 = scalar_lea.sflag [#allocation4], %s901_s11  ;;  %s633_s16 = scalar_lea.vmem %s920_s24, 128 }
  0x70   : > { %283 = vmatprep.subr.bf16.mxu0 %v541_v5  ;;  %v228_v15 = vrot.slane %v223_v13, %v227_v12  ;;  %v232_v16 = vrot.slane %v223_v13, %v231_v14  ;;  %p634_p8 = scmp.ne.s32.totalorder %s920_s24, %s633_s16  ;;  %p979_p0 = scmp.ne.s32.totalorder %s974_s6, 0 }
  0x71   : > { %s711_s23 = smov [#allocation8]  }
  0x72   : > { %p635_p1 = pnand %p634_p8, %p979_p0  ;;  %s637_s5 = sshll.u32 %s711_s23, 4  ;;  %s638_s5 = int_to_ptr.vmem [resolvable:$false] %s637_s5 }
  0x73   : > { %284 = vmatpush1.bf16.msra.mxu0 %v543_v6  ;;  %s639_s8 = scalar_lea.vmem %s638_s5, 256  ;;  %p640_p7 = scmp.lt.s32.totalorder %s920_s24, %s638_s5 }
  0x74   : > { %285 = vmatprep.subr.bf16.mxu0 %v544_v7  ;;  %p636_p3 = pneg %p635_p1  ;;  %p641_p9 = scmp.lt.s32.totalorder %s639_s8, %s633_s16 }
  0x76   : > { %p642_p12 = por %p641_p9, %p640_p7 }
  0x77   : > { %286 = vmatpush1.bf16.msra.mxu0 %v546_v8 }
  0x78   : > { %p643_p2 = pnand %p642_p12, %p636_p3 }
  0x7a   : > { %456 = vmatmul.mubr.msk.bf16.vlgmr.msra.gmra.mrb[0].mxu0 %vm275_vm0, %v214_v9 }
 0x14d   : > { %v313_v17 = vpop.f32.mrb[0].mxu0 }
 0x14e   : > { %v314_v18 = vadd.f32 %v313_v17, %v228_v15  ;;  %v315_v19 = vpop.f32.mrb[1].mxu0 }
 0x14f   : > { %v316_v20 = vadd.f32 %v315_v19, %v232_v16  ;;  %v317_v21 = vpop.f32.mrb[2].mxu0 }
 0x150   : > { %v318_v22 = vpop.f32.mrb[3].mxu0 }
 0x151   : > { %v463_v23 = vpack.c.bf16 %v316_v20, %v314_v18 }
 0x153   : > { %331 = vst.msk [vmem:[%s212_s17] sm:$0xff] %vm330_vm3, %v463_v23 }
 0x154   : > { %646 = shalt.err (!%p643_p2)
}
 0x155   : > { %s647_s9 = scalar_lea.hbm %s918_s29, 128  ;;  %s651_s11 = scalar_lea.hbm %s965_s3, 256 }
 0x156   : > { %p648_p13 = scmp.ne.s32.totalorder %s918_s29, %s647_s9  ;;  %p652_p4 = scmp.lt.u32.totalorder %s918_s29, %s965_s3 }
 0x157   : > { %p653_p5 = scmp.lt.u32.totalorder %s651_s11, %s647_s9  ;;  %p655_p8 = scmp.lt.u32.totalorder %s647_s9, %s918_s29 }
 0x158   : > { %p649_p6 = pnand %p648_p13, %p979_p0 }
 0x159   : > { %p654_p11 = por %p653_p5, %p652_p4 }
 0x15a   : > { %p650_p10 = pneg %p649_p6 }
 0x15b   : > { %p656_p1 = por %p655_p8, %p654_p11 }
 0x15d   : > { %p657_p3 = pnand %p656_p1, %p650_p10 }
 0x15f   : > { %660 = shalt.err (!%p657_p3)
}
 0x160   : > { %475 = dma.vmem_to_hbm [thread:$0]  (%p979_p0), %s920_s24, 128, %s918_s29, %s333_s30  }
 0x161 PF: > { %s359_s22 = sand.u32 1, %s691_s12   ;;  %p980_p7 = scmp.ne.s32.totalorder %s970_s19, 0 }
 0x162   : > { %p981_p9 = scmp.ge.s32.totalorder %s703_s15, 2  ;;  %s360_s18 = scalar_lea.sflag [#allocation4], %s359_s22 }
 0x164   : > { %p489_p12 = pnand %p981_p9, %p980_p7 }
 0x166   : > { %686 = dma.done.wait (!%p489_p12), %s360_s18, 128  }
 0x167   : > { %688 = vsyncadd (!%p489_p12), %s360_s18, 4294967168  ;;  %p17_p2 = scmp.ge.s32.totalorder %s842_s4, 4   ;;  %s982_s12 = smov %s695_s13 }
 0x168   : > { %s983_s13 = smov %s699_s14  ;;  %s984_s14 = smov %s858_s7 }
 0x169   : > { %s985_s15 = smov %s842_s4  ;;  %19 = sbr.rel (!%p17_p2) target bundleno = 6 (0x6), region = 85 }
 0x170   :  { %365 = vsyncpa [#allocation3], 1 }
 0x171   :  { %367 = vsyncpa [#allocation3 + $0x1], 1 }
 0x172   :  { %368 = vsyncpa [#allocation6], 1 }
 0x173   :  { %369 = vsyncpa [#allocation4], 1 }
 0x174   :  { %371 = vsyncpa [#allocation4 + $0x1], 1 }

// kernel: lxrt_model_forward.40
= control target key start
LH: loop header
LB: loop body
LE: loop exit
PB: predicated region body
PF: predicated region fallthrough
CT: control target
= control target key end

     0   :  { %7 = vsyncpa [#allocation4], 0  ;;  %s1424_s0 = inlined_call_operand.hbm [shape: bf16[2,8,192], index: 0, kind: input, shape index: {}]   ;;  %s1425_s1 = inlined_call_operand.hbm [shape: f32[2,1,8], index: 1, kind: input, shape index: {}]   ;;  %s1426_s2 = inlined_call_operand.hbm [shape: bf16[2,8,64], index: 2, kind: output, shape index: {}]  }
   0x1   :  { %9 = vsyncpa [#allocation4 + $0x1], 0 }
   0x2   :  { %10 = vsyncpa [#allocation7], 0 }
   0x3   :  { %12 = vsyncpa [#allocation7 + $0x1], 0 }
   0x4   :  { %13 = vsyncpa [#allocation5], 0 }
   0x5   :  { %15 = vsyncpa [#allocation5 + $0x1], 0  ;;  %s1142_s9 = smov 0   ;;  %s1144_s10 = smov 0  }
   0x6   :  { %s1146_s11 = smov 0   ;;  %s1148_s12 = smov 0  }
   0x7 LB: > { %s1163_s13 = sadd.s32 4294967295, %s1113_s12   ;;  %s805_s14 = sadd.s32 4294967294, %s1113_s12   ;;  %s1113_s12 = sphi %s1148_s12, %s1445_s12   ;;  %s1109_s11 = sphi %s1146_s11, %s1444_s11   ;;  %s1105_s10 = sphi %s1144_s10, %s1443_s10   ;;  %s1101_s9 = sphi %s1142_s9, %s1442_s9  }
   0x8   : > { %s1167_s15 = sadd.s32 1, %s1113_s12   ;;  %s28_s16 = sadd.s32 1, %s1109_s11 }
   0x9   : > { %s25_s17 = ssub.s32 %s1113_s12, %s1167_s15  ;;  %p35_p0 = scmp.ne.s32.totalorder %s1109_s11, %s1105_s10 }
   0xa   : > { %p26_p1 = scmp.eq.s32.totalorder %s25_s17, 0  ;;  %p36_p2 = scmp.eq.s32.totalorder %s1113_s12, 0 }
   0xb   : > { %p41_p3 = scmp.ne.s32.totalorder %s1105_s10, %s1101_s9  ;;  %p42_p4 = scmp.eq.s32.totalorder %s1163_s13, 0 }
   0xc   : > { %s1179_s18 = scalar_select %p26_p1, %s1109_s11, %s28_s16  }
   0xd   : > { %p1181_p5 = por %p36_p2, %p35_p0  ;;  %p1185_p6 = por %p42_p4, %p41_p3 }
   0xe   : > { %p91_p7 = scmp.eq.s32.totalorder %s1163_s13, 1  ;;  %p97_p8 = scmp.eq.s32.totalorder %s805_s14, 1 }
   0xf   : > { %s1430_s20 = scalar_select %p1185_p6, 1, 0 }
  0x10   : > { %p917_p10 = scmp.lt.s32.totalorder %s1113_s12, 2  ;;  %p1192_p11 = por %p91_p7, %p35_p0 }
  0x11   : > { %p1196_p12 = por %p97_p8, %p41_p3  ;;  %s1201_s23 = sand.u32 1, %s1109_s11  }
  0x12   : > { %s1431_s21 = scalar_select %p1192_p11, 1, 0 }
  0x13   : > { %s1432_s22 = scalar_select %p1196_p12, 1, 0 }
  0x14   : > { %s835_s24 = sshll.u32 %s1113_s12, 7  ;;  %s808_s25 = sshll.u32 %s1201_s23, 3 }
  0x15   : > { %s1208_s28 = scalar_lea.hbm %s1424_s0, %s835_s24  ;;  %s121_s29 = scalar_lea.vmem [#allocation3], %s808_s25 }
  0x16   : > { %s129_s30 = sshll.u32 %s121_s29, 4  ;;  %p1212_p13 = pnand %p917_p10, %p1181_p5  ;;  %s1216_s30 = int_to_ptr.vmem [resolvable:$true] %s129_s30 }
  0x17   : > { %s118_s4 = scalar_lea.sflag [#allocation4], %s1201_s23  ;;  %s983_s5 = scalar_lea.hbm %s1208_s28, 128 }
  0x18   : > { %p984_p2 = scmp.ne.s32.totalorder %s1208_s28, %s983_s5  ;;  %p985_p3 = pneg %p1212_p13 }
  0x19   : > { %s988_s8 = scalar_lea.hbm %s1424_s0, 256  ;;  %p989_p5 = scmp.lt.u32.totalorder %s1208_s28, %s1424_s0 }
  0x1a   : > { %p986_p4 = pnand %p985_p3, %p984_p2  ;;  %p990_p8 = scmp.lt.u32.totalorder %s988_s8, %s983_s5 }
  0x1b   : > { %p992_p9 = scmp.lt.u32.totalorder %s983_s5, %s1208_s28 }
  0x1c   : > { %p987_p7 = pneg %p986_p4  ;;  %p991_p10 = por %p990_p8, %p989_p5 }
  0x1e   : > { %p993_p0 = por %p992_p9, %p991_p10 }
  0x20   : > { %p994_p1 = pnand %p993_p0, %p987_p7 }
  0x22   : > { %997 = shalt.err (!%p994_p1)
}
  0x23   : > { %s998_s17 = scalar_lea.vmem %s1216_s30, 128  ;;  %s1115_s19 = smov [#allocation3]  }
  0x24   : > { %p999_p2 = scmp.ne.s32.totalorder %s1216_s30, %s998_s17  ;;  %s1003_s24 = sshll.u32 %s1115_s19, 4  ;;  %s1004_s24 = int_to_ptr.vmem [resolvable:$false] %s1003_s24 }
  0x25   : > { %s1005_s25 = scalar_lea.vmem %s1004_s24, 256  ;;  %p1006_p11 = scmp.lt.s32.totalorder %s1216_s30, %s1004_s24 }
  0x26   : > { %p1001_p4 = pnand %p999_p2, %p985_p3  ;;  %p1007_p5 = scmp.lt.s32.totalorder %s1005_s25, %s998_s17 }
  0x28   : > { %p1002_p12 = pneg %p1001_p4  ;;  %p1008_p8 = por %p1007_p5, %p1006_p11 }
  0x2a   : > { %p1009_p9 = pnand %p1008_p8, %p1002_p12 }
  0x2c   : > { %1012 = shalt.err (!%p1009_p9)
}
  0x2d   : > { %909 = dma.hbm_to_vmem [thread:$0]  (!%p1212_p13), %s1208_s28, 128, %s1216_s30, %s118_s4  }
  0x2e   : > { %p1434_p0 = scmp.lt.s32.totalorder %s1113_s12, 3  ;;  %p1435_p1 = scmp.ge.s32.totalorder %s1113_s12, 1 }
  0x2f   : > { %s811_s27 = sshll.u32 %s1113_s12, 4  ;;  %s139_s7 = scalar_lea.vmem [#allocation6], %s1201_s23 }
  0x30   : > { %p1250_p7 = pnand %p1435_p1, %p1434_p0  ;;  %s1258_s6 = scalar_lea.hbm %s1425_s1, %s811_s27 }
  0x31   : > { %s146_s8 = sshll.u32 %s139_s7, 4  ;;  %s137_s28 = scalar_lea.sflag [#allocation7], %s1201_s23  ;;  %s147_s8 = int_to_ptr.vmem [resolvable:$true] %s146_s8 }
  0x32   : > { %s1436_s26 = scalar_select %p1250_p7, 1, 0 }
  0x33   : > { %s1013_s30 = scalar_lea.hbm %s1258_s6, 16  ;;  %s1018_s16 = scalar_lea.hbm %s1425_s1, 32 }
  0x34   : > { %p1014_p11 = scmp.ne.s32.totalorder %s1258_s6, %s1013_s30  ;;  %p1019_p2 = scmp.lt.u32.totalorder %s1258_s6, %s1425_s1 }
  0x35   : > { %p1020_p4 = scmp.lt.u32.totalorder %s1018_s16, %s1013_s30  ;;  %p1022_p8 = scmp.lt.u32.totalorder %s1013_s30, %s1258_s6 }
  0x36   : > { %p1016_p12 = pnand %p1014_p11, %p985_p3 }
  0x37   : > { %p1021_p5 = por %p1020_p4, %p1019_p2 }
  0x38   : > { %p1017_p10 = pneg %p1016_p12 }
  0x39   : > { %p1023_p9 = por %p1022_p8, %p1021_p5 }
  0x3b   : > { %p1024_p0 = pnand %p1023_p9, %p1017_p10 }
  0x3d   : > { %1027 = shalt.err (!%p1024_p0)
}
  0x3e   : > { %s1028_s23 = scalar_lea.vmem %s147_s8, 16  ;;  %s1116_s24 = smov [#allocation6]  }
  0x3f   : > { %p1029_p1 = scmp.ne.s32.totalorder %s147_s8, %s1028_s23  ;;  %s1033_s25 = sshll.u32 %s1116_s24, 4  ;;  %s1034_s25 = int_to_ptr.vmem [resolvable:$false] %s1033_s25 }
  0x40   : > { %s1035_s27 = scalar_lea.vmem %s1034_s25, 32  ;;  %p1036_p6 = scmp.lt.s32.totalorder %s147_s8, %s1034_s25 }
  0x41   : > { %p1031_p11 = pnand %p1029_p1, %p985_p3  ;;  %p1037_p7 = scmp.lt.s32.totalorder %s1035_s27, %s1028_s23 }
  0x43   : > { %p1032_p12 = pneg %p1031_p11  ;;  %p1038_p2 = por %p1037_p7, %p1036_p6 }
  0x45   : > { %p1039_p4 = pnand %p1038_p2, %p1032_p12 }
  0x47   : > { %1042 = shalt.err (!%p1039_p4)
}
  0x48   : > { %912 = dma.hbm_to_vmem [thread:$0]  (!%p1212_p13), %s1258_s6, 16, %s147_s8, %s137_s28  }
  0x49   : > { %p1437_p10 = scmp.ne.s32.totalorder %s1436_s26, 0 }
  0x4a   : > { %s1284_s29 = sand.u32 (!%p1437_p10), 1, %s1105_s10   ;;  %p1438_p6 = scmp.ne.s32.totalorder (!%p1437_p10), %s1430_s20, 0 }
  0x4b   : > { %155 = sbr.rel (%p1437_p10) target bundleno = 1650 (0x672), region = 28  ;;  %s813_s5 = sshll.u32 (!%p1437_p10), %s1284_s29, 3 }
  0x4c   : > { %s158_s7 = scalar_lea.sflag (!%p1437_p10), [#allocation4], %s1284_s29  ;;  %s1288_s30 = scalar_lea.vmem (!%p1437_p10), [#allocation3], %s813_s5 }
  0x52   : > { %1088 = dma.done.wait (%p1438_p6), %s158_s7, 128  }
  0x53   : > { %1090 = vsyncadd (%p1438_p6), %s158_s7, 4294967168  ;;  %s167_s3 = scalar_lea.sflag [#allocation7], %s1284_s29  ;;  %s169_s26 = scalar_lea.vmem [#allocation6], %s1284_s29 }
  0x54   : > { %1092 = dma.done.wait (%p1438_p6), %s167_s3, 16  }
  0x55   : > { %1094 = vsyncadd (%p1438_p6), %s167_s3, 4294967280  ;;  %v1117_v0 = vmov 0.0   ;;  %vm1118_vm0 = vmmov 0   ;;  %v196_v1 = vld [vmem:[%s1288_s30] sm:$0xf]  ;;  %s1119_s6 = smov 64  }
  0x56   : > { %852 = vmatprep.subr.bf16.mxu0 %v1117_v0  ;;  %854 = vmatprep.mubr.msk.bf16.mxu0 %vm1118_vm0, %v1117_v0  ;;  %v815_v2 = vcombine.low %v196_v1, %v196_v1  ;;  %vm203_vm1 = vcmask 130048   ;;  %v961_v5 = vld [vmem:[%s1288_s30] ss:$0 sps:$4 sm:$0xff]   ;;  %s1120_s20 = smov 48   ;;  %v1314_v7 = vld [vmem:[%s169_s26] ss:$0 sm:$0xff] }
  0x57   : > { %858 = vmatprep.subr.bf16.mxu1 %v1117_v0  ;;  %860 = vmatprep.mubr.msk.bf16.mxu1 %vm1118_vm0, %v1117_v0  ;;  %vm258_vm2 = vcmask 64512   ;;  %v963_v14 = vld [vmem:[%s1288_s30] ss:$0 sps:$4 sm:$0xff]   ;;  %s1121_s8 = smov 80   ;;  %v197_v20 = vld [vmem:[%s1288_s30 + $0x4] sm:$0xf] }
  0x58   : > { %201 = vrot.lane.b32.xlu0 %v815_v2, %s1119_s6  ;;  %326 = vrot.lane.b32.xlu1 %v961_v5, %s1120_s20  ;;  %vm274_vm3 = vcmask 1043456   ;;  %s1122_s28 = smov 112   ;;  %v962_v22 = vld [vmem:[%s1288_s30] ss:$0 sps:$4 sm:$0xff]   ;;  %s1123_s4 = smov 32   ;;  %vm443_vm4 = vcmask 261248  }
  0x59   : > { %v276_v21 = vsel %vm274_vm3, %v197_v20, 0  ;;  %s1124_s14 = smov 96   ;;  %s1125_s16 = smov 16   ;;  %v964_v61 = vld [vmem:[%s1288_s30 + $0x4] ss:$0 sps:$4 sm:$0xff]   ;;  %vm569_vm5 = vcmask 392448  }
  0x5a   : > { %859 = vmatpush3.bf16.msra.mxu1 %v276_v21  ;;  %v965_v62 = vld [vmem:[%s1288_s30 + $0x4] ss:$0 sps:$4 sm:$0xff]   ;;  %vm695_vm6 = vcmask 523648   ;;  %s814_s17 = sshll.u32 %s1284_s29, 2  ;;  %s832_s19 = sshll.u32 %s1163_s13, 6  ;;  %vm699_vm7 = vcmask 519168  }
  0x5b   : > { %864 = vmatprep.subr.bf16.mxu1 %v1117_v0  ;;  %s193_s23 = scalar_lea.vmem [#allocation8], %s814_s17  ;;  %s1380_s5 = scalar_lea.hbm %s1426_s2, %s832_s19 }
  0x5c   : > { %s715_s24 = sshll.u32 %s193_s23, 4  ;;  %s702_s7 = scalar_lea.sflag [#allocation5], %s1284_s29  ;;  %s1382_s24 = int_to_ptr.vmem [resolvable:$true] %s715_s24 }
  0x5d   : > { %p1439_p3 = scmp.ne.s32.totalorder %s1431_s21, 0  ;;  %s1126_s13 = smov [#allocation8]  }
  0x5e   : > { %s1047_s3 = sshll.u32 %s1126_s13, 4  ;;  %s1048_s3 = int_to_ptr.vmem [resolvable:$false] %s1047_s3 }
  0x5f   : > { %s1049_s26 = scalar_lea.vmem %s1048_s3, 128  ;;  %p1050_p8 = scmp.lt.s32.totalorder %s1382_s24, %s1048_s3 }
  0xca   : > { %v202_v3 = vpop.permute.xlu0 %201  ;;  %v327_v23 = vpop.permute.xlu1 %326 }
  0xcb   : > { %v208_v4 = vsel %vm203_vm1, %v202_v3, 0  ;;  %v332_v30 = vsel %vm203_vm1, %v327_v23, 0 }
  0xcc   : > { %853 = vmatpush3.bf16.xpose.msra.mxu0 %v208_v4 }
  0xcd   : > { %870 = vmatprep.subr.bf16.mxu0 %v1117_v0 }
  0xd3   : > { %855 = vmatmul.mubr.msk.bf16.vlgmr.msra.gmra.mrb[0].mxu0 %vm203_vm1, %v196_v1 }
  0xd4   : > { %872 = vmatprep.mubr.msk.bf16.mxu0 %vm1118_vm0, %v1117_v0 }
 0x1a6   : > { %v244_v6 = vpop.f32.mrb[0].mxu0 }
 0x1a7   : > { %v250_v8 = vmul.f32 0.25, %v244_v6  ;;  %v856_v9 = vpop.f32.mrb[1].mxu0 }
 0x1a8   : > { %v247_v10 = vpop.f32.mrb[2].mxu0 }
 0x1a9   : > { %v857_v11 = vpop.f32.mrb[3].mxu0  ;;  %v257_v12 = vadd.f32 %v1314_v7, %v250_v8 }
 0x1ab   : > { %v259_v13 = vsel %vm258_vm2, %v257_v12, -inf }
 0x1ac   : > { %260 = vmax.xlane.f32.xlu0 %v259_v13 }
 0x1c2   : > { %576 = vrot.lane.b32.xlu0 %v963_v14, %s1121_s8 }
 0x239   : > { %v261_v15 = vpop.xlane.xlu0 %260 }
 0x23a   : > { %v262_v16 = vsub.f32 %v257_v12, %v261_v15 }
 0x23c   : > { %v263_v17 = vmul.f32 1.442695, %v262_v16 }
 0x23d   : > { %v577_v35 = vpop.permute.xlu0 %576 }
 0x23e   : > { %967 = vpow2.f32 %v263_v17  ;;  %v966_v17 = vld [vmem:[%s1288_s30 + $0x4] ss:$0 sps:$4 sm:$0xff]   ;;  %s1043_s30 = scalar_lea.vmem %s1382_s24, 64 }
 0x23f   : > { %p1044_p13 = scmp.ne.s32.totalorder %s1382_s24, %s1043_s30  ;;  %p1051_p9 = scmp.lt.s32.totalorder %s1049_s26, %s1043_s30 }
 0x241   : > { %p1045_p7 = pnand %p1044_p13, %p1439_p3  ;;  %p1052_p0 = por %p1051_p9, %p1050_p8 }
 0x243   : > { %p1046_p5 = pneg %p1045_p7 }
 0x245   : > { %p1053_p1 = pnand %p1052_p0, %p1046_p5 }
 0x248   : > { %v968_v18 = vpop.eup %967 }
 0x249   : > { %v265_v19 = vsel %vm258_vm2, %v968_v18, 0.0 }
 0x24a   : > { %266 = vadd.xlane.f32.xlu1 %v265_v19 }
 0x25b   : > { %324 = vrot.lane.b32.xlu1 %v961_v5, %s1122_s28 }
 0x25f   : > { %452 = vrot.lane.b32.xlu1 %v962_v22, %s1123_s4 }
 0x263   : > { %450 = vrot.lane.b32.xlu1 %v962_v22, %s1124_s14 }
 0x267   : > { %578 = vrot.lane.b32.xlu1 %v963_v14, %s1125_s16 }
 0x2d7   : > { %v267_v24 = vpop.xlane.xlu1 %266 }
 0x2d8   : > { %969 = vrcp.f32 %v267_v24 }
 0x2db   : > { %v325_v25 = vpop.permute.xlu1 %324 }
 0x2df   : > { %v453_v29 = vpop.permute.xlu1 %452 }
 0x2e0   : > { %v458_v32 = vsel %vm203_vm1, %v453_v29, 0 }
 0x2e2   : > { %v970_v26 = vpop.eup %969 }
 0x2e3   : > { %v269_v27 = vmul.f32 %v970_v26, %v968_v18  ;;  %v451_v31 = vpop.permute.xlu1 %450 }
 0x2e5   : > { %v270_v28 = vpack.c.bf16 %v269_v27, %v269_v27 }
 0x2e7   : > { %861 = vmatmul.mubr.msk.bf16.vlgmr.msra.gmra.mrb[0].mxu1 %vm258_vm2, %v270_v28  ;;  %v579_v33 = vpop.permute.xlu1 %578 }
 0x2e8   : > { %865 = vmatpush3.bf16.xpose.msra.mxu1 %v332_v30  ;;  %866 = vmatprep.mubr.msk.bf16.mxu1 %vm1118_vm0, %v1117_v0  ;;  %v584_v34 = vsel %vm203_vm1, %v579_v33, 0 }
 0x2e9   : > { %876 = vmatprep.subr.bf16.mxu1 %v1117_v0 }
 0x2ef   : > { %867 = vmatmul.mubr.msk.bf16.vlgmr.msra.gmra.mrb[4].mxu1 %vm203_vm1, %v325_v25 }
 0x2f0   : > { %877 = vmatpush3.bf16.xpose.msra.mxu1 %v458_v32  ;;  %878 = vmatprep.mubr.msk.bf16.mxu1 %vm1118_vm0, %v1117_v0 }
 0x2f1   : > { %888 = vmatprep.subr.bf16.mxu1 %v1117_v0 }
 0x2f7   : > { %879 = vmatmul.mubr.msk.bf16.vlgmr.msra.gmra.mrb[8].mxu1 %vm203_vm1, %v451_v31 }
 0x2f8   : > { %889 = vmatpush3.bf16.xpose.msra.mxu1 %v584_v34  ;;  %890 = vmatprep.mubr.msk.bf16.mxu1 %vm1118_vm0, %v1117_v0 }
 0x2ff   : > { %891 = vmatmul.mubr.msk.bf16.vlgmr.msra.gmra.mrb[12].mxu1 %vm203_vm1, %v577_v35 }
 0x3ba   : > { %v312_v36 = vpop.f32.mrb[0].mxu1 }
 0x3bb   : > { %318 = vst.msk [vmem:[#allocation2] sm:$0xff] %vm203_vm1, %v312_v36  ;;  %v862_v37 = vpop.f32.mrb[1].mxu1 }
 0x3bc   : > { %v315_v38 = vpop.f32.mrb[2].mxu1 }
 0x3bd   : > { %v863_v39 = vpop.f32.mrb[3].mxu1 }
 0x3c2   : > { %v368_v40 = vpop.f32.mrb[4].mxu1 }
 0x3c3   : > { %v374_v41 = vmul.f32 0.25, %v368_v40  ;;  %v868_v42 = vpop.f32.mrb[5].mxu1 }
 0x3c4   : > { %v371_v43 = vpop.f32.mrb[6].mxu1 }
 0x3c5   : > { %v869_v44 = vpop.f32.mrb[7].mxu1  ;;  %v375_v45 = vadd.f32 %v1314_v7, %v374_v41 }
 0x3c7   : > { %v376_v46 = vsel %vm258_vm2, %v375_v45, -inf }
 0x3c8   : > { %377 = vmax.xlane.f32.xlu1 %v376_v46 }
 0x3ca   : > { %v494_v47 = vpop.f32.mrb[8].mxu1 }
 0x3cb   : > { %v500_v48 = vmul.f32 0.25, %v494_v47  ;;  %v880_v49 = vpop.f32.mrb[9].mxu1 }
 0x3cc   : > { %v497_v50 = vpop.f32.mrb[10].mxu1 }
 0x3cd   : > { %v881_v51 = vpop.f32.mrb[11].mxu1  ;;  %v501_v52 = vadd.f32 %v1314_v7, %v500_v48 }
 0x3cf   : > { %v502_v53 = vsel %vm258_vm2, %v501_v52, -inf }
 0x3d0   : > { %503 = vmax.xlane.f32.xlu0 %v502_v53 }
 0x3d2   : > { %v620_v54 = vpop.f32.mrb[12].mxu1 }
 0x3d3   : > { %v626_v55 = vmul.f32 0.25, %v620_v54  ;;  %v892_v56 = vpop.f32.mrb[13].mxu1 }
 0x3d4   : > { %v623_v57 = vpop.f32.mrb[14].mxu1 }
 0x3d5   : > { %v893_v58 = vpop.f32.mrb[15].mxu1  ;;  %v627_v59 = vadd.f32 %v1314_v7, %v626_v55 }
 0x3d7   : > { %v628_v60 = vsel %vm258_vm2, %v627_v59, -inf }
 0x3d8   : > { %629 = vmax.xlane.f32.xlu1 %v628_v60 }
 0x3e6   : > { %391 = vrot.lane.b32.xlu0 %v965_v62, %s1122_s28 }
 0x3e9   : > { %517 = vrot.lane.b32.xlu1 %v964_v61, %s1124_s14 }
 0x455   : > { %v378_v63 = vpop.xlane.xlu1 %377 }
 0x456   : > { %v379_v1 = vsub.f32 %v375_v45, %v378_v63 }
 0x458   : > { %v380_v2 = vmul.f32 1.442695, %v379_v1 }
 0x45a   : > { %971 = vpow2.f32 %v380_v2 }
 0x45d   : > { %v504_v3 = vpop.xlane.xlu0 %503 }
 0x45e   : > { %v505_v4 = vsub.f32 %v501_v52, %v504_v3 }
 0x460   : > { %v506_v5 = vmul.f32 1.442695, %v505_v4 }
 0x461   : > { %v392_v15 = vpop.permute.xlu0 %391 }
 0x462   : > { %973 = vpow2.f32 %v506_v5  ;;  %v397_v16 = vsel %vm274_vm3, %v392_v15, 0 }
 0x463   : > { %871 = vmatpush3.bf16.msra.mxu0 %v397_v16 }
 0x464   : > { %v972_v6 = vpop.eup %971  ;;  %882 = vmatprep.subr.bf16.mxu0 %v1117_v0 }
 0x465   : > { %v630_v8 = vpop.xlane.xlu1 %629  ;;  %v382_v7 = vsel %vm258_vm2, %v972_v6, 0.0 }
 0x466   : > { %v631_v9 = vsub.f32 %v627_v59, %v630_v8  ;;  %383 = vadd.xlane.f32.xlu1 %v382_v7 }
 0x468   : > { %v632_v10 = vmul.f32 1.442695, %v631_v9 }
 0x469   : > { %v518_v18 = vpop.permute.xlu1 %517 }
 0x46a   : > { %975 = vpow2.f32 %v632_v10  ;;  %v523_v24 = vsel %vm274_vm3, %v518_v18, 0 }
 0x46c   : > { %v974_v11 = vpop.eup %973 }
 0x46d   : > { %v508_v12 = vsel %vm258_vm2, %v974_v11, 0.0 }
 0x46e   : > { %509 = vadd.xlane.f32.xlu1 %v508_v12 }
 0x474   : > { %v976_v13 = vpop.eup %975 }
 0x475   : > { %v634_v14 = vsel %vm258_vm2, %v976_v13, 0.0 }
 0x476   : > { %635 = vadd.xlane.f32.xlu1 %v634_v14 }
 0x487   : > { %643 = vrot.lane.b32.xlu1 %v966_v17, %s1121_s8 }
 0x4f3   : > { %v384_v19 = vpop.xlane.xlu1 %383 }
 0x4f4   : > { %977 = vrcp.f32 %v384_v19 }
 0x4fb   : > { %v510_v20 = vpop.xlane.xlu1 %509 }
 0x4fc   : > { %979 = vrcp.f32 %v510_v20 }
 0x4fe   : > { %v978_v21 = vpop.eup %977 }
 0x4ff   : > { %v386_v22 = vmul.f32 %v978_v21, %v972_v6 }
 0x501   : > { %v387_v23 = vpack.c.bf16 %v386_v22, %v386_v22 }
 0x503   : > { %v636_v25 = vpop.xlane.xlu1 %635  ;;  %873 = vmatmul.mubr.msk.bf16.vlgmr.msra.gmra.mrb[4].mxu0 %vm258_vm2, %v387_v23 }
 0x504   : > { %981 = vrcp.f32 %v636_v25  ;;  %883 = vmatpush3.bf16.msra.mxu0 %v523_v24  ;;  %884 = vmatprep.mubr.msk.bf16.mxu0 %vm1118_vm0, %v1117_v0 }
 0x505   : > { %894 = vmatprep.subr.bf16.mxu0 %v1117_v0 }
 0x506   : > { %v980_v26 = vpop.eup %979 }
 0x507   : > { %v512_v27 = vmul.f32 %v980_v26, %v974_v11  ;;  %v644_v28 = vpop.permute.xlu1 %643 }
 0x508   : > { %v649_v29 = vsel %vm274_vm3, %v644_v28, 0 }
 0x509   : > { %v513_v30 = vpack.c.bf16 %v512_v27, %v512_v27 }
 0x50b   : > { %885 = vmatmul.mubr.msk.bf16.vlgmr.msra.gmra.mrb[8].mxu0 %vm258_vm2, %v513_v30 }
 0x50c   : > { %895 = vmatpush3.bf16.msra.mxu0 %v649_v29  ;;  %896 = vmatprep.mubr.msk.bf16.mxu0 %vm1118_vm0, %v1117_v0 }
 0x50e   : > { %v982_v31 = vpop.eup %981 }
 0x50f   : > { %v638_v32 = vmul.f32 %v982_v31, %v976_v13 }
 0x511   : > { %v639_v33 = vpack.c.bf16 %v638_v32, %v638_v32 }
 0x513   : > { %897 = vmatmul.mubr.msk.bf16.vlgmr.msra.gmra.mrb[12].mxu0 %vm258_vm2, %v639_v33 }
 0x5d6   : > { %v433_v34 = vpop.f32.mrb[4].mxu0 }
 0x5d7   : > { %440 = vrot.lane.b32.xlu0 %v433_v34, %s1125_s16  ;;  %v874_v35 = vpop.f32.mrb[5].mxu0 }
 0x5d8   : > { %v436_v36 = vpop.f32.mrb[6].mxu0 }
 0x5d9   : > { %v875_v37 = vpop.f32.mrb[7].mxu0 }
 0x5de   : > { %v559_v38 = vpop.f32.mrb[8].mxu0 }
 0x5df   : > { %566 = vrot.lane.b32.xlu1 %v559_v38, %s1123_s4  ;;  %v886_v39 = vpop.f32.mrb[9].mxu0 }
 0x5e0   : > { %v562_v40 = vpop.f32.mrb[10].mxu0 }
 0x5e1   : > { %v887_v41 = vpop.f32.mrb[11].mxu0 }
 0x5e6   : > { %v685_v0 = vpop.f32.mrb[12].mxu0 }
 0x5e7   : > { %692 = vrot.lane.b32.xlu0 %v685_v0, %s1120_s20  ;;  %v898_v42 = vpop.f32.mrb[13].mxu0 }
 0x5e8   : > { %v688_v43 = vpop.f32.mrb[14].mxu0 }
 0x5e9   : > { %v899_v44 = vpop.f32.mrb[15].mxu0 }
 0x649   : > { %v441_v45 = vpop.permute.xlu0 %440 }
 0x64a   : > { %444 = vst.msk [vmem:[#allocation2] sm:$0xff] %vm443_vm4, %v441_v45 }
 0x651   : > { %v567_v46 = vpop.permute.xlu1 %566 }
 0x652   : > { %570 = vst.msk [vmem:[#allocation2] sm:$0xff] %vm569_vm5, %v567_v46 }
 0x659   : > { %v693_v47 = vpop.permute.xlu0 %692 }
 0x65a   : > { %696 = vst.msk [vmem:[#allocation2] sm:$0xff] %vm695_vm6, %v693_v47 }
 0x661   : > { %v697_v48 = vld [vmem:[#allocation2] sm:$0xff] }
 0x662   : > { %v698_v49 = vpack.c.bf16 %v697_v48, %v697_v48 }
 0x664   : > { %700 = vst.msk [vmem:[%s193_s23] sm:$0xf] %vm699_vm7, %v698_v49 }
 0x665   : > { %1056 = shalt.err (!%p1053_p1)
}
 0x666   : > { %s1057_s29 = scalar_lea.hbm %s1380_s5, 64  ;;  %s1061_s8 = scalar_lea.hbm %s1426_s2, 128 }
 0x667   : > { %p1058_p11 = scmp.ne.s32.totalorder %s1380_s5, %s1057_s29  ;;  %p1062_p4 = scmp.lt.u32.totalorder %s1380_s5, %s1426_s2 }
 0x668   : > { %p1063_p10 = scmp.lt.u32.totalorder %s1061_s8, %s1057_s29  ;;  %p1065_p13 = scmp.lt.u32.totalorder %s1057_s29, %s1380_s5 }
 0x669   : > { %p1059_p12 = pnand %p1058_p11, %p1439_p3 }
 0x66a   : > { %p1064_p6 = por %p1063_p10, %p1062_p4 }
 0x66b   : > { %p1060_p2 = pneg %p1059_p12 }
 0x66c   : > { %p1066_p7 = por %p1065_p13, %p1064_p6 }
 0x66e   : > { %p1067_p5 = pnand %p1066_p7, %p1060_p2 }
 0x670   : > { %1070 = shalt.err (!%p1067_p5)
}
 0x671   : > { %904 = dma.vmem_to_hbm [thread:$0]  (%p1439_p3), %s1382_s24, 64, %s1380_s5, %s702_s7  }
 0x672 PF: > { %s727_s14 = sand.u32 1, %s1101_s9   ;;  %p1440_p8 = scmp.ne.s32.totalorder %s1432_s22, 0 }
 0x673   : > { %p1441_p9 = scmp.ge.s32.totalorder %s1113_s12, 2  ;;  %s728_s16 = scalar_lea.sflag [#allocation5], %s727_s14 }
 0x675   : > { %p914_p0 = pnand %p1441_p9, %p1440_p8 }
 0x677   : > { %1096 = dma.done.wait (!%p914_p0), %s728_s16, 64  }
 0x678   : > { %1098 = vsyncadd (!%p914_p0), %s728_s16, 4294967232  ;;  %p18_p1 = scmp.ge.s32.totalorder %s1167_s15, 4   ;;  %s1442_s9 = smov %s1105_s10 }
 0x679   : > { %s1443_s10 = smov %s1109_s11  ;;  %s1444_s11 = smov %s1179_s18 }
 0x67a   : > { %s1445_s12 = smov %s1167_s15  ;;  %20 = sbr.rel (!%p18_p1) target bundleno = 7 (0x7), region = 86 }
 0x681   :  { %733 = vsyncpa [#allocation4], 1 }
 0x682   :  { %735 = vsyncpa [#allocation4 + $0x1], 1 }
 0x683   :  { %736 = vsyncpa [#allocation7], 1 }
 0x684   :  { %738 = vsyncpa [#allocation7 + $0x1], 1 }
 0x685   :  { %739 = vsyncpa [#allocation5], 1 }
 0x686   :  { %741 = vsyncpa [#allocation5 + $0x1], 1 }

// kernel: lxrt_model_forward.59
= control target key start
LH: loop header
LB: loop body
LE: loop exit
PB: predicated region body
PF: predicated region fallthrough
CT: control target
= control target key end

     0   :  { %8 = vsyncpa [#allocation3], 0  ;;  %s933_s0 = inlined_call_operand.hbm [shape: bf16[16,64], index: 0, kind: input, shape index: {}]   ;;  %s934_s1 = inlined_call_operand.hbm [shape: bf16[64,128], index: 1, kind: input, shape index: {}]   ;;  %s935_s2 = inlined_call_operand.hbm [shape: f32[1,128], index: 2, kind: input, shape index: {}]   ;;  %s936_s3 = inlined_call_operand.hbm [shape: bf16[16,128], index: 3, kind: output, shape index: {}]  }
   0x1   :  { %10 = vsyncpa [#allocation3 + $0x1], 0 }
   0x2   :  { %11 = vsyncpa [#allocation6], 0 }
   0x3   :  { %12 = vsyncpa [#allocation4], 0 }
   0x4   :  { %14 = vsyncpa [#allocation4 + $0x1], 0  ;;  %s703_s12 = smov 0   ;;  %s705_s13 = smov 0  }
   0x5   :  { %s707_s14 = smov 0   ;;  %s709_s15 = smov 0  }
   0x6 LB: > { %s724_s16 = sadd.s32 4294967295, %s673_s15   ;;  %s403_s17 = sadd.s32 4294967294, %s673_s15   ;;  %s673_s15 = sphi %s709_s15, %s956_s15   ;;  %s669_s14 = sphi %s707_s14, %s955_s14   ;;  %s665_s13 = sphi %s705_s13, %s954_s13   ;;  %s661_s12 = sphi %s703_s12, %s953_s12  }
   0x7   : > { %p40_p0 = scmp.ne.s32.totalorder %s665_s13, %s661_s12  ;;  %p937_p1 = scmp.eq.s32.totalorder %s724_s16, 0 }
   0x8   : > { %p112_p3 = scmp.eq.s32.totalorder %s403_s17, 1  ;;  %p404_p5 = scmp.ge.s32.totalorder %s673_s15, 1 }
   0x9   : > { %p733_p4 = por %p937_p1, %p40_p0  ;;  %p119_p7 = scmp.lt.s32.totalorder %s673_s15, 3 }
   0xa   : > { %p738_p6 = por %p112_p3, %p40_p0  ;;  %s675_s21 = smov [#allocation5]  }
   0xb   : > { %s940_s18 = scalar_select %p733_p4, 1, 0 }
   0xc   : > { %s941_s19 = scalar_select %p738_p6, 1, 0 }
   0xd   : > { %p743_p8 = pnand %p404_p5, %p119_p7  ;;  %s131_s22 = sshll.u32 %s675_s21, 4  ;;  %s747_s22 = int_to_ptr.vmem [resolvable:$true] %s131_s22 }
   0xe   : > { %s676_s24 = smov [#allocation7]   ;;  %s517_s28 = scalar_lea.hbm %s934_s1, 512 }
   0xf   : > { %p454_p9 = pneg %p743_p8  ;;  %s145_s25 = sshll.u32 %s676_s24, 4  ;;  %s758_s25 = int_to_ptr.vmem [resolvable:$true] %s145_s25 }
  0x10   : > { %p518_p12 = scmp.ne.s32.totalorder %s934_s1, %s517_s28  ;;  %p524_p5 = scmp.lt.u32.totalorder %s517_s28, %s934_s1 }
  0x11   : > { %p754_p11 = pnand %p454_p9, %p937_p1 }
  0x13   : > { %p519_p13 = pneg %p754_p11 }
  0x15   : > { %p520_p0 = pnand %p519_p13, %p518_p12 }
  0x17   : > { %p521_p3 = pneg %p520_p0 }
  0x19   : > { %p526_p7 = pnand %p524_p5, %p521_p3 }
  0x1b   : > { %529 = shalt.err (!%p526_p7)
}
  0x1c   : > { %s530_s6 = scalar_lea.vmem %s747_s22, 512  ;;  %p538_p2 = scmp.lt.s32.totalorder %s747_s22, %s747_s22 }
  0x1d   : > { %p531_p9 = scmp.ne.s32.totalorder %s747_s22, %s530_s6  ;;  %p539_p12 = scmp.lt.s32.totalorder %s530_s6, %s530_s6 }
  0x1f   : > { %p533_p10 = pnand %p531_p9, %p519_p13  ;;  %p540_p0 = por %p539_p12, %p538_p2 }
  0x21   : > { %p534_p1 = pneg %p533_p10 }
  0x23   : > { %p541_p6 = pnand %p540_p0, %p534_p1 }
  0x25   : > { %544 = shalt.err (!%p541_p6)
}
  0x26   : > { %s677_s7 = smov 64   ;;  %s678_s8 = smov 4  }
  0x27   : > { %457 = dma.hbm_to_vmem [thread:$0]  (!%p754_p11), %s934_s1, 512, %s747_s22, [#allocation6], %s677_s7, %s677_s7, %s678_s8  }
  0x28   : > { %s545_s21 = scalar_lea.hbm %s935_s2, 16 }
  0x29   : > { %p546_p2 = scmp.ne.s32.totalorder %s935_s2, %s545_s21  ;;  %p552_p10 = scmp.lt.u32.totalorder %s545_s21, %s935_s2 }
  0x2b   : > { %p548_p1 = pnand %p546_p2, %p519_p13 }
  0x2d   : > { %p549_p6 = pneg %p548_p1 }
  0x2f   : > { %p554_p3 = pnand %p552_p10, %p549_p6 }
  0x31   : > { %557 = shalt.err (!%p554_p3)
}
  0x32   : > { %s558_s22 = scalar_lea.vmem %s758_s25, 16  ;;  %s565_s29 = scalar_lea.vmem %s758_s25, 32 }
  0x33   : > { %p559_p5 = scmp.ne.s32.totalorder %s758_s25, %s558_s22  ;;  %p566_p12 = scmp.lt.s32.totalorder %s758_s25, %s758_s25 }
  0x34   : > { %p567_p0 = scmp.lt.s32.totalorder %s565_s29, %s558_s22 }
  0x35   : > { %p561_p7 = pnand %p559_p5, %p519_p13 }
  0x36   : > { %p568_p2 = por %p567_p0, %p566_p12 }
  0x37   : > { %p562_p9 = pneg %p561_p7 }
  0x39   : > { %p569_p1 = pnand %p568_p2, %p562_p9 }
  0x3b   : > { %572 = shalt.err (!%p569_p1)
}
  0x3c   : > { %460 = dma.hbm_to_vmem [thread:$0]  (!%p754_p11), %s935_s2, 16, %s758_s25, [#allocation6]  }
  0x3d   : > { %s814_s5 = sadd.s32 1, %s673_s15   ;;  %s27_s23 = sadd.s32 1, %s669_s14 }
  0x3e   : > { %s24_s6 = ssub.s32 %s673_s15, %s814_s5  ;;  %p34_p13 = scmp.ne.s32.totalorder %s669_s14, %s665_s13 }
  0x3f   : > { %p25_p6 = scmp.eq.s32.totalorder %s24_s6, 0  ;;  %p35_p10 = scmp.eq.s32.totalorder %s673_s15, 0 }
  0x40   : > { %p944_p3 = scmp.eq.s32.totalorder %s724_s16, 1  ;;  %p471_p7 = scmp.lt.s32.totalorder %s673_s15, 2 }
  0x41   : > { %s830_s8 = scalar_select %p25_p6, %s669_s14, %s27_s23  }
  0x42   : > { %p824_p5 = por %p944_p3, %p34_p13  ;;  %p36_p9 = por %p35_p10, %p34_p13 }
  0x43   : > { %s156_s9 = sand.u32 1, %s669_s14   ;;  %s409_s25 = sshll.u32 %s673_s15, 6 }
  0x44   : > { %s945_s7 = scalar_select %p824_p5, 1, 0 }
  0x45   : > { %s408_s10 = sshll.u32 %s156_s9, 2  ;;  %s837_s21 = scalar_lea.hbm %s933_s0, %s409_s25 }
  0x46   : > { %s160_s24 = scalar_lea.vmem [#allocation2], %s408_s10  ;;  %p841_p11 = pnand %p471_p7, %p36_p9 }
  0x47   : > { %s167_s26 = sshll.u32 %s160_s24, 4  ;;  %s157_s28 = scalar_lea.sflag [#allocation3], %s156_s9  ;;  %s839_s26 = int_to_ptr.vmem [resolvable:$true] %s167_s26 }
  0x48   : > { %s573_s22 = scalar_lea.hbm %s837_s21, 64  ;;  %p575_p0 = pneg %p841_p11 }
  0x49   : > { %p574_p12 = scmp.ne.s32.totalorder %s837_s21, %s573_s22  ;;  %s578_s4 = scalar_lea.hbm %s933_s0, 128 }
  0x4a   : > { %p579_p13 = scmp.lt.u32.totalorder %s837_s21, %s933_s0  ;;  %p580_p6 = scmp.lt.u32.totalorder %s578_s4, %s573_s22 }
  0x4b   : > { %p576_p2 = pnand %p575_p0, %p574_p12  ;;  %p582_p3 = scmp.lt.u32.totalorder %s573_s22, %s837_s21 }
  0x4c   : > { %p581_p10 = por %p580_p6, %p579_p13 }
  0x4d   : > { %p577_p1 = pneg %p576_p2 }
  0x4e   : > { %p583_p7 = por %p582_p3, %p581_p10 }
  0x50   : > { %p584_p9 = pnand %p583_p7, %p577_p1 }
  0x52   : > { %587 = shalt.err (!%p584_p9)
}
  0x53   : > { %s588_s9 = scalar_lea.vmem %s839_s26, 64  ;;  %s679_s10 = smov [#allocation2]  }
  0x54   : > { %p589_p12 = scmp.ne.s32.totalorder %s839_s26, %s588_s9  ;;  %s593_s25 = sshll.u32 %s679_s10, 4  ;;  %s594_s25 = int_to_ptr.vmem [resolvable:$false] %s593_s25 }
  0x55   : > { %s595_s11 = scalar_lea.vmem %s594_s25, 128  ;;  %p596_p4 = scmp.lt.s32.totalorder %s839_s26, %s594_s25 }
  0x56   : > { %p591_p2 = pnand %p589_p12, %p575_p0  ;;  %p597_p13 = scmp.lt.s32.totalorder %s595_s11, %s588_s9 }
  0x58   : > { %p592_p5 = pneg %p591_p2  ;;  %p598_p6 = por %p597_p13, %p596_p4 }
  0x5a   : > { %p599_p10 = pnand %p598_p6, %p592_p5 }
  0x5c   : > { %602 = shalt.err (!%p599_p10)
}
  0x5d   : > { %464 = dma.hbm_to_vmem [thread:$0]  (!%p841_p11), %s837_s21, 64, %s839_s26, %s157_s28  }
  0x5e   : > { %176 = sbr.rel (%p743_p8) target bundleno = 352 (0x160), region = 32  ;;  %s873_s17 = sand.u32 (!%p743_p8), 1, %s665_s13  }
  0x5f   : > { %s411_s24 = sshll.u32 (!%p743_p8), %s873_s17, 2  ;;  %s179_s22 = scalar_lea.sflag (!%p743_p8), [#allocation3], %s873_s17 }
  0x60   : > { %s182_s29 = scalar_lea.vmem (!%p743_p8), [#allocation2], %s411_s24  ;;  %p947_p4 = scmp.ne.s32.totalorder (!%p743_p8), %s940_s18, 0 }
  0x65   : > { %648 = dma.done.wait (%p947_p4), %s179_s22, 64  }
  0x66   : > { %650 = vsyncadd (%p947_p4), %s179_s22, 4294967232  ;;  %p948_p5 = scmp.eq.s32.totalorder %s724_s16, 0 }
  0x68   : > { %652 = dma.done.wait (%p948_p5), [#allocation6], 528   ;;  %p949_p11 = pmov %p948_p5 }
  0x69   : > { %v680_v0 = vmov 0.0   ;;  %vm681_vm0 = vmmov 0   ;;  %v513_v1 = vld [vmem:[#allocation5] sm:$0xff]   ;;  %v514_v2 = vld [vmem:[#allocation5 + $0x8] sm:$0xff]   ;;  %v515_v3 = vld [vmem:[#allocation5 + $0x10] sm:$0xff]   ;;  %vm254_vm1 = vcmask 523264  }
  0x6a   : > { %654 = vsyncadd (%p949_p11), [#allocation6], 4294966768  ;;  %430 = vmatprep.subr.bf16.mxu0 %v680_v0  ;;  %438 = vmatprep.mubr.msk.bf16.mxu0 %vm681_vm0, %v680_v0  ;;  %v516_v4 = vld [vmem:[#allocation5 + $0x18] sm:$0xff]   ;;  %v415_v6 = vld [vmem:[#allocation7] ss:$0 sm:$0xff]  ;;  %s422_s18 = sshll.u32 %s724_s16, 6 }
  0x6b   : > { %431 = vmatpush3.bf16.msra.mxu0 %v513_v1  ;;  %v214_v5 = vld [vmem:[%s182_s29] sm:$0xf]  ;;  %s212_s20 = scalar_lea.vmem [#allocation8], %s411_s24  ;;  %s889_s28 = scalar_lea.hbm %s936_s3, %s422_s18 }
  0x6c   : > { %432 = vmatprep.subr.bf16.mxu0 %v680_v0  ;;  %s314_s21 = sshll.u32 %s212_s20, 4  ;;  %s301_s30 = scalar_lea.sflag [#allocation4], %s873_s17  ;;  %s891_s21 = int_to_ptr.vmem [resolvable:$true] %s314_s21 }
  0x6d   : > { %s603_s16 = scalar_lea.vmem %s891_s21, 64  ;;  %p950_p0 = scmp.ne.s32.totalorder %s945_s7, 0 }
  0x6e   : > { %p604_p8 = scmp.ne.s32.totalorder %s891_s21, %s603_s16  ;;  %s682_s4 = smov [#allocation8]  }
  0x6f   : > { %433 = vmatpush3.bf16.msra.mxu0 %v514_v2  ;;  %s607_s23 = sshll.u32 %s682_s4, 4  ;;  %s608_s23 = int_to_ptr.vmem [resolvable:$false] %s607_s23 }
  0x70   : > { %434 = vmatprep.subr.bf16.mxu0 %v680_v0  ;;  %p605_p1 = pnand %p604_p8, %p950_p0  ;;  %s609_s6 = scalar_lea.vmem %s608_s23, 128 }
  0x71   : > { %p610_p7 = scmp.lt.s32.totalorder %s891_s21, %s608_s23  ;;  %p611_p9 = scmp.lt.s32.totalorder %s609_s6, %s603_s16 }
  0x72   : > { %p606_p3 = pneg %p605_p1 }
  0x73   : > { %435 = vmatpush3.bf16.msra.mxu0 %v515_v3  ;;  %p612_p12 = por %p611_p9, %p610_p7 }
  0x74   : > { %436 = vmatprep.subr.bf16.mxu0 %v680_v0 }
  0x75   : > { %p613_p2 = pnand %p612_p12, %p606_p3 }
  0x77   : > { %437 = vmatpush3.bf16.msra.mxu0 %v516_v4 }
  0x7a   : > { %439 = vmatmul.mubr.msk.bf16.vlgmr.msra.gmra.mrb[0].mxu0 %vm254_vm1, %v214_v5 }
 0x14d   : > { %v292_v7 = vpop.f32.mrb[0].mxu0 }
 0x14e   : > { %v293_v8 = vadd.f32 %v415_v6, %v292_v7  ;;  %v440_v9 = vpop.f32.mrb[1].mxu0 }
 0x14f   : > { %v295_v10 = vpop.f32.mrb[2].mxu0 }
 0x150   : > { %v298_v11 = vpack.c.bf16 %v293_v8, %v293_v8  ;;  %v441_v12 = vpop.f32.mrb[3].mxu0 }
 0x152   : > { %299 = vst [vmem:[%s212_s20] sm:$0xf] %v298_v11 }
 0x153   : > { %616 = shalt.err (!%p613_p2)
}
 0x154   : > { %s617_s9 = scalar_lea.hbm %s889_s28, 64  ;;  %s621_s11 = scalar_lea.hbm %s936_s3, 128 }
 0x155   : > { %p618_p13 = scmp.ne.s32.totalorder %s889_s28, %s617_s9  ;;  %p622_p4 = scmp.lt.u32.totalorder %s889_s28, %s936_s3 }
 0x156   : > { %p623_p5 = scmp.lt.u32.totalorder %s621_s11, %s617_s9  ;;  %p625_p8 = scmp.lt.u32.totalorder %s617_s9, %s889_s28 }
 0x157   : > { %p619_p6 = pnand %p618_p13, %p950_p0 }
 0x158   : > { %p624_p11 = por %p623_p5, %p622_p4 }
 0x159   : > { %p620_p10 = pneg %p619_p6 }
 0x15a   : > { %p626_p1 = por %p625_p8, %p624_p11 }
 0x15c   : > { %p627_p3 = pnand %p626_p1, %p620_p10 }
 0x15e   : > { %630 = shalt.err (!%p627_p3)
}
 0x15f   : > { %452 = dma.vmem_to_hbm [thread:$0]  (%p950_p0), %s891_s21, 64, %s889_s28, %s301_s30  }
 0x160 PF: > { %s326_s22 = sand.u32 1, %s661_s12   ;;  %p951_p7 = scmp.ne.s32.totalorder %s941_s19, 0 }
 0x161   : > { %p952_p9 = scmp.ge.s32.totalorder %s673_s15, 2  ;;  %s327_s29 = scalar_lea.sflag [#allocation4], %s326_s22 }
 0x163   : > { %p466_p12 = pnand %p952_p9, %p951_p7 }
 0x165   : > { %656 = dma.done.wait (!%p466_p12), %s327_s29, 64  }
 0x166   : > { %658 = vsyncadd (!%p466_p12), %s327_s29, 4294967232  ;;  %p17_p2 = scmp.ge.s32.totalorder %s814_s5, 4   ;;  %s953_s12 = smov %s665_s13 }
 0x167   : > { %s954_s13 = smov %s669_s14  ;;  %s955_s14 = smov %s830_s8 }
 0x168   : > { %s956_s15 = smov %s814_s5  ;;  %19 = sbr.rel (!%p17_p2) target bundleno = 6 (0x6), region = 85 }
 0x16f   :  { %332 = vsyncpa [#allocation3], 1 }
 0x170   :  { %334 = vsyncpa [#allocation3 + $0x1], 1 }
 0x171   :  { %335 = vsyncpa [#allocation6], 1 }
 0x172   :  { %336 = vsyncpa [#allocation4], 1 }
 0x173   :  { %338 = vsyncpa [#allocation4 + $0x1], 1 }

// kernel: lxrt_model_forward.42
= control target key start
LH: loop header
LB: loop body
LE: loop exit
PB: predicated region body
PF: predicated region fallthrough
CT: control target
= control target key end

     0   :  { %8 = vsyncpa [#allocation3], 0  ;;  %s945_s0 = inlined_call_operand.hbm [shape: bf16[16,64], index: 0, kind: input, shape index: {}]   ;;  %s946_s1 = inlined_call_operand.hbm [shape: bf16[64,32], index: 1, kind: input, shape index: {}]   ;;  %s947_s2 = inlined_call_operand.hbm [shape: f32[1,32], index: 2, kind: input, shape index: {}]   ;;  %s948_s3 = inlined_call_operand.hbm [shape: bf16[16,32], index: 3, kind: output, shape index: {}]  }
   0x1   :  { %10 = vsyncpa [#allocation3 + $0x1], 0 }
   0x2   :  { %11 = vsyncpa [#allocation6], 0 }
   0x3   :  { %12 = vsyncpa [#allocation4], 0 }
   0x4   :  { %14 = vsyncpa [#allocation4 + $0x1], 0  ;;  %s711_s12 = smov 0   ;;  %s713_s13 = smov 0  }
   0x5   :  { %s715_s14 = smov 0   ;;  %s717_s15 = smov 0  }
   0x6 LB: > { %s732_s16 = sadd.s32 4294967295, %s681_s15   ;;  %s409_s17 = sadd.s32 4294967294, %s681_s15   ;;  %s681_s15 = sphi %s717_s15, %s968_s15   ;;  %s677_s14 = sphi %s715_s14, %s967_s14   ;;  %s673_s13 = sphi %s713_s13, %s966_s13   ;;  %s669_s12 = sphi %s711_s12, %s965_s12  }
   0x7   : > { %p40_p0 = scmp.ne.s32.totalorder %s673_s13, %s669_s12  ;;  %p949_p1 = scmp.eq.s32.totalorder %s732_s16, 0 }
   0x8   : > { %p112_p3 = scmp.eq.s32.totalorder %s409_s17, 1  ;;  %p410_p5 = scmp.ge.s32.totalorder %s681_s15, 1 }
   0x9   : > { %p741_p4 = por %p949_p1, %p40_p0  ;;  %p119_p7 = scmp.lt.s32.totalorder %s681_s15, 3 }
   0xa   : > { %p746_p6 = por %p112_p3, %p40_p0  ;;  %s683_s21 = smov [#allocation5]  }
   0xb   : > { %s952_s18 = scalar_select %p741_p4, 1, 0 }
   0xc   : > { %s953_s19 = scalar_select %p746_p6, 1, 0 }
   0xd   : > { %p751_p8 = pnand %p410_p5, %p119_p7  ;;  %s131_s22 = sshll.u32 %s683_s21, 4  ;;  %s755_s22 = int_to_ptr.vmem [resolvable:$true] %s131_s22 }
   0xe   : > { %s684_s24 = smov [#allocation7]   ;;  %s525_s28 = scalar_lea.hbm %s946_s1, 512 }
   0xf   : > { %p460_p9 = pneg %p751_p8  ;;  %s145_s25 = sshll.u32 %s684_s24, 4  ;;  %s766_s25 = int_to_ptr.vmem [resolvable:$true] %s145_s25 }
  0x10   : > { %p526_p12 = scmp.ne.s32.totalorder %s946_s1, %s525_s28  ;;  %p532_p5 = scmp.lt.u32.totalorder %s525_s28, %s946_s1 }
  0x11   : > { %p762_p11 = pnand %p460_p9, %p949_p1 }
  0x13   : > { %p527_p13 = pneg %p762_p11 }
  0x15   : > { %p528_p0 = pnand %p527_p13, %p526_p12 }
  0x17   : > { %p529_p3 = pneg %p528_p0 }
  0x19   : > { %p534_p7 = pnand %p532_p5, %p529_p3 }
  0x1b   : > { %537 = shalt.err (!%p534_p7)
}
  0x1c   : > { %s538_s6 = scalar_lea.vmem %s755_s22, 512  ;;  %p546_p2 = scmp.lt.s32.totalorder %s755_s22, %s755_s22 }
  0x1d   : > { %p539_p9 = scmp.ne.s32.totalorder %s755_s22, %s538_s6  ;;  %p547_p12 = scmp.lt.s32.totalorder %s538_s6, %s538_s6 }
  0x1f   : > { %p541_p10 = pnand %p539_p9, %p527_p13  ;;  %p548_p0 = por %p547_p12, %p546_p2 }
  0x21   : > { %p542_p1 = pneg %p541_p10 }
  0x23   : > { %p549_p6 = pnand %p548_p0, %p542_p1 }
  0x25   : > { %552 = shalt.err (!%p549_p6)
}
  0x26   : > { %s685_s7 = smov 64   ;;  %s686_s8 = smov 4  }
  0x27   : > { %463 = dma.hbm_to_vmem [thread:$0]  (!%p762_p11), %s946_s1, 512, %s755_s22, [#allocation6], %s685_s7, %s685_s7, %s686_s8  }
  0x28   : > { %s553_s21 = scalar_lea.hbm %s947_s2, 16 }
  0x29   : > { %p554_p2 = scmp.ne.s32.totalorder %s947_s2, %s553_s21  ;;  %p560_p10 = scmp.lt.u32.totalorder %s553_s21, %s947_s2 }
  0x2b   : > { %p556_p1 = pnand %p554_p2, %p527_p13 }
  0x2d   : > { %p557_p6 = pneg %p556_p1 }
  0x2f   : > { %p562_p3 = pnand %p560_p10, %p557_p6 }
  0x31   : > { %565 = shalt.err (!%p562_p3)
}
  0x32   : > { %s566_s22 = scalar_lea.vmem %s766_s25, 16  ;;  %s573_s29 = scalar_lea.vmem %s766_s25, 32 }
  0x33   : > { %p567_p5 = scmp.ne.s32.totalorder %s766_s25, %s566_s22  ;;  %p574_p12 = scmp.lt.s32.totalorder %s766_s25, %s766_s25 }
  0x34   : > { %p575_p0 = scmp.lt.s32.totalorder %s573_s29, %s566_s22 }
  0x35   : > { %p569_p7 = pnand %p567_p5, %p527_p13 }
  0x36   : > { %p576_p2 = por %p575_p0, %p574_p12 }
  0x37   : > { %p570_p9 = pneg %p569_p7 }
  0x39   : > { %p577_p1 = pnand %p576_p2, %p570_p9 }
  0x3b   : > { %580 = shalt.err (!%p577_p1)
}
  0x3c   : > { %466 = dma.hbm_to_vmem [thread:$0]  (!%p762_p11), %s947_s2, 16, %s766_s25, [#allocation6]  }
  0x3d   : > { %s822_s5 = sadd.s32 1, %s681_s15   ;;  %s27_s23 = sadd.s32 1, %s677_s14 }
  0x3e   : > { %s24_s6 = ssub.s32 %s681_s15, %s822_s5  ;;  %p34_p13 = scmp.ne.s32.totalorder %s677_s14, %s673_s13 }
  0x3f   : > { %p25_p6 = scmp.eq.s32.totalorder %s24_s6, 0  ;;  %p35_p10 = scmp.eq.s32.totalorder %s681_s15, 0 }
  0x40   : > { %p956_p3 = scmp.eq.s32.totalorder %s732_s16, 1  ;;  %p477_p7 = scmp.lt.s32.totalorder %s681_s15, 2 }
  0x41   : > { %s838_s8 = scalar_select %p25_p6, %s677_s14, %s27_s23  }
  0x42   : > { %p832_p5 = por %p956_p3, %p34_p13  ;;  %p36_p9 = por %p35_p10, %p34_p13 }
  0x43   : > { %s156_s9 = sand.u32 1, %s677_s14   ;;  %s415_s25 = sshll.u32 %s681_s15, 6 }
  0x44   : > { %s957_s7 = scalar_select %p832_p5, 1, 0 }
  0x45   : > { %s414_s10 = sshll.u32 %s156_s9, 2  ;;  %s845_s21 = scalar_lea.hbm %s945_s0, %s415_s25 }
  0x46   : > { %s160_s24 = scalar_lea.vmem [#allocation2], %s414_s10  ;;  %p849_p11 = pnand %p477_p7, %p36_p9 }
  0x47   : > { %s167_s26 = sshll.u32 %s160_s24, 4  ;;  %s157_s28 = scalar_lea.sflag [#allocation3], %s156_s9  ;;  %s847_s26 = int_to_ptr.vmem [resolvable:$true] %s167_s26 }
  0x48   : > { %s581_s22 = scalar_lea.hbm %s845_s21, 64  ;;  %p583_p0 = pneg %p849_p11 }
  0x49   : > { %p582_p12 = scmp.ne.s32.totalorder %s845_s21, %s581_s22  ;;  %s586_s4 = scalar_lea.hbm %s945_s0, 128 }
  0x4a   : > { %p587_p13 = scmp.lt.u32.totalorder %s845_s21, %s945_s0  ;;  %p588_p6 = scmp.lt.u32.totalorder %s586_s4, %s581_s22 }
  0x4b   : > { %p584_p2 = pnand %p583_p0, %p582_p12  ;;  %p590_p3 = scmp.lt.u32.totalorder %s581_s22, %s845_s21 }
  0x4c   : > { %p589_p10 = por %p588_p6, %p587_p13 }
  0x4d   : > { %p585_p1 = pneg %p584_p2 }
  0x4e   : > { %p591_p7 = por %p590_p3, %p589_p10 }
  0x50   : > { %p592_p9 = pnand %p591_p7, %p585_p1 }
  0x52   : > { %595 = shalt.err (!%p592_p9)
}
  0x53   : > { %s596_s9 = scalar_lea.vmem %s847_s26, 64  ;;  %s687_s10 = smov [#allocation2]  }
  0x54   : > { %p597_p12 = scmp.ne.s32.totalorder %s847_s26, %s596_s9  ;;  %s601_s25 = sshll.u32 %s687_s10, 4  ;;  %s602_s25 = int_to_ptr.vmem [resolvable:$false] %s601_s25 }
  0x55   : > { %s603_s11 = scalar_lea.vmem %s602_s25, 128  ;;  %p604_p4 = scmp.lt.s32.totalorder %s847_s26, %s602_s25 }
  0x56   : > { %p599_p2 = pnand %p597_p12, %p583_p0  ;;  %p605_p13 = scmp.lt.s32.totalorder %s603_s11, %s596_s9 }
  0x58   : > { %p600_p5 = pneg %p599_p2  ;;  %p606_p6 = por %p605_p13, %p604_p4 }
  0x5a   : > { %p607_p10 = pnand %p606_p6, %p600_p5 }
  0x5c   : > { %610 = shalt.err (!%p607_p10)
}
  0x5d   : > { %470 = dma.hbm_to_vmem [thread:$0]  (!%p849_p11), %s845_s21, 64, %s847_s26, %s157_s28  }
  0x5e   : > { %176 = sbr.rel (%p751_p8) target bundleno = 369 (0x171), region = 32  ;;  %s881_s17 = sand.u32 (!%p751_p8), 1, %s673_s13  }
  0x5f   : > { %s417_s24 = sshll.u32 (!%p751_p8), %s881_s17, 2  ;;  %s179_s22 = scalar_lea.sflag (!%p751_p8), [#allocation3], %s881_s17 }
  0x60   : > { %s182_s29 = scalar_lea.vmem (!%p751_p8), [#allocation2], %s417_s24  ;;  %p959_p4 = scmp.ne.s32.totalorder (!%p751_p8), %s952_s18, 0 }
  0x65   : > { %656 = dma.done.wait (%p959_p4), %s179_s22, 64  }
  0x66   : > { %658 = vsyncadd (%p959_p4), %s179_s22, 4294967232  ;;  %p960_p5 = scmp.eq.s32.totalorder %s732_s16, 0 }
  0x68   : > { %660 = dma.done.wait (%p960_p5), [#allocation6], 528   ;;  %p961_p8 = pmov %p960_p5 }
  0x69   : > { %v688_v0 = vmov 0.0   ;;  %vm689_vm0 = vmmov 0   ;;  %v519_v1 = vld [vmem:[#allocation5] sm:$0xff]   ;;  %v520_v2 = vld [vmem:[#allocation5 + $0x8] sm:$0xff]   ;;  %v521_v3 = vld [vmem:[#allocation5 + $0x10] sm:$0xff]   ;;  %vm254_vm1 = vcmask 523264  }
  0x6a   : > { %662 = vsyncadd (%p961_p8), [#allocation6], 4294966768  ;;  %436 = vmatprep.subr.bf16.mxu0 %v688_v0  ;;  %444 = vmatprep.mubr.msk.bf16.mxu0 %vm689_vm0, %v688_v0  ;;  %v522_v4 = vld [vmem:[#allocation5 + $0x18] sm:$0xff]   ;;  %v421_v6 = vld [vmem:[#allocation7] ss:$0 sm:$0xff]  ;;  %s428_s18 = sshll.u32 %s732_s16, 6 }
  0x6b   : > { %437 = vmatpush3.bf16.msra.mxu0 %v519_v1  ;;  %v214_v5 = vld [vmem:[%s182_s29] sm:$0xf]  ;;  %s212_s20 = scalar_lea.vmem [#allocation8], %s417_s24  ;;  %vm304_vm2 = vcmask 257024   ;;  %s901_s28 = scalar_lea.hbm %s948_s3, %s428_s18 }
  0x6c   : > { %438 = vmatprep.subr.bf16.mxu0 %v688_v0  ;;  %s320_s21 = sshll.u32 %s212_s20, 4  ;;  %s307_s30 = scalar_lea.sflag [#allocation4], %s881_s17  ;;  %s903_s21 = int_to_ptr.vmem [resolvable:$true] %s320_s21 }
  0x6d   : > { %s611_s4 = scalar_lea.vmem %s903_s21, 64  ;;  %p962_p0 = scmp.ne.s32.totalorder %s957_s7, 0 }
  0x6e   : > { %p612_p11 = scmp.ne.s32.totalorder %s903_s21, %s611_s4  ;;  %s690_s16 = smov [#allocation8]  }
  0x6f   : > { %439 = vmatpush3.bf16.msra.mxu0 %v520_v2  ;;  %s615_s23 = sshll.u32 %s690_s16, 4  ;;  %s616_s23 = int_to_ptr.vmem [resolvable:$false] %s615_s23 }
  0x70   : > { %440 = vmatprep.subr.bf16.mxu0 %v688_v0  ;;  %p613_p1 = pnand %p612_p11, %p962_p0  ;;  %s617_s6 = scalar_lea.vmem %s616_s23, 128 }
  0x71   : > { %p618_p7 = scmp.lt.s32.totalorder %s903_s21, %s616_s23  ;;  %p619_p9 = scmp.lt.s32.totalorder %s617_s6, %s611_s4 }
  0x72   : > { %p614_p3 = pneg %p613_p1 }
  0x73   : > { %441 = vmatpush3.bf16.msra.mxu0 %v521_v3  ;;  %p620_p12 = por %p619_p9, %p618_p7 }
  0x74   : > { %442 = vmatprep.subr.bf16.mxu0 %v688_v0 }
  0x75   : > { %p621_p2 = pnand %p620_p12, %p614_p3 }
  0x77   : > { %443 = vmatpush3.bf16.msra.mxu0 %v522_v4 }
  0x7a   : > { %445 = vmatmul.mubr.msk.bf16.vlgmr.msra.gmra.mrb[0].mxu0 %vm254_vm1, %v214_v5 }
 0x14d   : > { %v292_v7 = vpop.f32.mrb[0].mxu0 }
 0x14e   : > { %v293_v8 = vadd.f32 %v421_v6, %v292_v7  ;;  %v446_v9 = vpop.f32.mrb[1].mxu0 }
 0x14f   : > { %v295_v10 = vpop.f32.mrb[2].mxu0 }
 0x150   : > { %v299_v11 = vmul.f32 0.70710677, %v293_v8  ;;  %v447_v12 = vpop.f32.mrb[3].mxu0  ;;  %v298_v14 = vmul.f32 0.5, %v293_v8 }
 0x152   : > { %523 = verf.f32 %v299_v11 }
 0x15c   : > { %v524_v13 = vpop.eup %523 }
 0x15d   : > { %v301_v15 = vadd.f32 1.0, %v524_v13 }
 0x15f   : > { %v302_v16 = vmul.f32 %v301_v15, %v298_v14 }
 0x161   : > { %v303_v17 = vpack.c.bf16 %v302_v16, %v302_v16 }
 0x163   : > { %305 = vst.msk [vmem:[%s212_s20] sm:$0xf] %vm304_vm2, %v303_v17 }
 0x164   : > { %624 = shalt.err (!%p621_p2)
}
 0x165   : > { %s625_s9 = scalar_lea.hbm %s901_s28, 64  ;;  %s629_s11 = scalar_lea.hbm %s948_s3, 128 }
 0x166   : > { %p626_p13 = scmp.ne.s32.totalorder %s901_s28, %s625_s9  ;;  %p630_p4 = scmp.lt.u32.totalorder %s901_s28, %s948_s3 }
 0x167   : > { %p631_p5 = scmp.lt.u32.totalorder %s629_s11, %s625_s9  ;;  %p633_p11 = scmp.lt.u32.totalorder %s625_s9, %s901_s28 }
 0x168   : > { %p627_p6 = pnand %p626_p13, %p962_p0 }
 0x169   : > { %p632_p8 = por %p631_p5, %p630_p4 }
 0x16a   : > { %p628_p10 = pneg %p627_p6 }
 0x16b   : > { %p634_p1 = por %p633_p11, %p632_p8 }
 0x16d   : > { %p635_p3 = pnand %p634_p1, %p628_p10 }
 0x16f   : > { %638 = shalt.err (!%p635_p3)
}
 0x170   : > { %458 = dma.vmem_to_hbm [thread:$0]  (%p962_p0), %s903_s21, 64, %s901_s28, %s307_s30  }
 0x171 PF: > { %s332_s22 = sand.u32 1, %s669_s12   ;;  %p963_p7 = scmp.ne.s32.totalorder %s953_s19, 0 }
 0x172   : > { %p964_p9 = scmp.ge.s32.totalorder %s681_s15, 2  ;;  %s333_s29 = scalar_lea.sflag [#allocation4], %s332_s22 }
 0x174   : > { %p472_p12 = pnand %p964_p9, %p963_p7 }
 0x176   : > { %664 = dma.done.wait (!%p472_p12), %s333_s29, 64  }
 0x177   : > { %666 = vsyncadd (!%p472_p12), %s333_s29, 4294967232  ;;  %p17_p2 = scmp.ge.s32.totalorder %s822_s5, 4   ;;  %s965_s12 = smov %s673_s13 }
 0x178   : > { %s966_s13 = smov %s677_s14  ;;  %s967_s14 = smov %s838_s8 }
 0x179   : > { %s968_s15 = smov %s822_s5  ;;  %19 = sbr.rel (!%p17_p2) target bundleno = 6 (0x6), region = 85 }
 0x180   :  { %338 = vsyncpa [#allocation3], 1 }
 0x181   :  { %340 = vsyncpa [#allocation3 + $0x1], 1 }
 0x182   :  { %341 = vsyncpa [#allocation6], 1 }
 0x183   :  { %342 = vsyncpa [#allocation4], 1 }
 0x184   :  { %344 = vsyncpa [#allocation4 + $0x1], 1 }

// kernel: lxrt_model_forward.43
= control target key start
LH: loop header
LB: loop body
LE: loop exit
PB: predicated region body
PF: predicated region fallthrough
CT: control target
= control target key end

     0   :  { %s1117_s0 = inlined_call_operand.hbm [shape: bf16[16,32], index: 0, kind: input, shape index: {}]   ;;  %s1118_s1 = inlined_call_operand.hbm [shape: bf16[32,64], index: 1, kind: input, shape index: {}]   ;;  %s1119_s2 = inlined_call_operand.hbm [shape: f32[3,64], index: 2, kind: input, shape index: {}]   ;;  %s1120_s3 = inlined_call_operand.hbm [shape: bf16[16,64], index: 3, kind: input, shape index: {}]   ;;  %s1121_s4 = inlined_call_operand.hbm [shape: bf16[16,64], index: 4, kind: output, shape index: {}]  }
   0x1   :  { %1127 = sst [smem:[#allocation15_spill]] %s1117_s0 }
   0x2   :  { %9 = vsyncpa [#allocation3], 0 }
   0x3   :  { %11 = vsyncpa [#allocation3 + $0x1], 0 }
   0x4   :  { %12 = vsyncpa [#allocation6], 0 }
   0x5   :  { %13 = vsyncpa [#allocation9], 0 }
   0x6   :  { %15 = vsyncpa [#allocation9 + $0x1], 0 }
   0x7   :  { %16 = vsyncpa [#allocation4], 0 }
   0x8   :  { %18 = vsyncpa [#allocation4 + $0x1], 0  ;;  %s845_s15 = smov 0   ;;  %s847_s16 = smov 0  }
   0x9   :  { %s849_s17 = smov 0   ;;  %s851_s18 = smov 0  }
   0xa LB: > { %s866_s19 = sadd.s32 4294967295, %s809_s18   ;;  %s503_s20 = sadd.s32 4294967294, %s809_s18   ;;  %s809_s18 = sphi %s851_s18, %s1147_s18   ;;  %s805_s17 = sphi %s849_s17, %s1146_s17   ;;  %s801_s16 = sphi %s847_s16, %s1145_s16   ;;  %s797_s15 = sphi %s845_s15, %s1144_s15  }
   0xb   : > { %p44_p0 = scmp.ne.s32.totalorder %s801_s16, %s797_s15  ;;  %p1122_p1 = scmp.eq.s32.totalorder %s866_s19, 0 }
   0xc   : > { %p142_p3 = scmp.eq.s32.totalorder %s503_s20, 1  ;;  %p504_p5 = scmp.ge.s32.totalorder %s809_s18, 1 }
   0xd   : > { %p875_p4 = por %p1122_p1, %p44_p0  ;;  %p149_p7 = scmp.lt.s32.totalorder %s809_s18, 3 }
   0xe   : > { %p880_p6 = por %p142_p3, %p44_p0  ;;  %s811_s24 = smov [#allocation5]  }
   0xf   : > { %s1128_s21 = scalar_select %p875_p4, 1, 0 }
  0x10   : > { %s1129_s22 = scalar_select %p880_p6, 1, 0 }
  0x11   : > { %p885_p8 = pnand %p504_p5, %p149_p7  ;;  %s161_s25 = sshll.u32 %s811_s24, 4  ;;  %s889_s25 = int_to_ptr.vmem [resolvable:$true] %s161_s25 }
  0x12   : > { %s812_s27 = smov [#allocation7]   ;;  %s619_s5 = scalar_lea.hbm %s1118_s1, 256 }
  0x13   : > { %s1130_s23 = scalar_select %p885_p8, 1, 0 }
  0x14   : > { %p553_p9 = pneg %p885_p8  ;;  %s175_s28 = sshll.u32 %s812_s27, 4  ;;  %s900_s28 = int_to_ptr.vmem [resolvable:$true] %s175_s28 }
  0x15   : > { %p620_p12 = scmp.ne.s32.totalorder %s1118_s1, %s619_s5  ;;  %p626_p5 = scmp.lt.u32.totalorder %s619_s5, %s1118_s1 }
  0x16   : > { %p896_p11 = pnand %p553_p9, %p1122_p1 }
  0x18   : > { %p621_p13 = pneg %p896_p11 }
  0x1a   : > { %p622_p0 = pnand %p621_p13, %p620_p12 }
  0x1c   : > { %p623_p3 = pneg %p622_p0 }
  0x1e   : > { %p628_p7 = pnand %p626_p5, %p623_p3 }
  0x20   : > { %631 = shalt.err (!%p628_p7)
}
  0x21   : > { %s632_s10 = scalar_lea.vmem %s889_s25, 256  ;;  %p640_p2 = scmp.lt.s32.totalorder %s889_s25, %s889_s25 }
  0x22   : > { %p633_p9 = scmp.ne.s32.totalorder %s889_s25, %s632_s10  ;;  %p641_p12 = scmp.lt.s32.totalorder %s632_s10, %s632_s10 }
  0x24   : > { %p635_p10 = pnand %p633_p9, %p621_p13  ;;  %p642_p0 = por %p641_p12, %p640_p2 }
  0x26   : > { %p636_p1 = pneg %p635_p10 }
  0x28   : > { %p643_p6 = pnand %p642_p0, %p636_p1 }
  0x2a   : > { %646 = shalt.err (!%p643_p6)
}
  0x2b   : > { %s813_s11 = smov 64   ;;  %s814_s12 = smov 4  }
  0x2c   : > { %556 = dma.hbm_to_vmem [thread:$0]  (!%p896_p11), %s1118_s1, 256, %s889_s25, [#allocation6], %s813_s11, %s813_s11, %s814_s12  }
  0x2d   : > { %s647_s27 = scalar_lea.hbm %s1119_s2, 64 }
  0x2e   : > { %p648_p2 = scmp.ne.s32.totalorder %s1119_s2, %s647_s27  ;;  %p654_p10 = scmp.lt.u32.totalorder %s647_s27, %s1119_s2 }
  0x30   : > { %p650_p1 = pnand %p648_p2, %p621_p13 }
  0x32   : > { %p651_p6 = pneg %p650_p1 }
  0x34   : > { %p656_p3 = pnand %p654_p10, %p651_p6 }
  0x36   : > { %659 = shalt.err (!%p656_p3)
}
  0x37   : > { %s660_s25 = scalar_lea.vmem %s900_s28, 64  ;;  %p668_p12 = scmp.lt.s32.totalorder %s900_s28, %s900_s28 }
  0x38   : > { %p661_p5 = scmp.ne.s32.totalorder %s900_s28, %s660_s25  ;;  %p669_p0 = scmp.lt.s32.totalorder %s660_s25, %s660_s25 }
  0x3a   : > { %p663_p7 = pnand %p661_p5, %p621_p13  ;;  %p670_p2 = por %p669_p0, %p668_p12 }
  0x3c   : > { %p664_p9 = pneg %p663_p7 }
  0x3e   : > { %p671_p1 = pnand %p670_p2, %p664_p9 }
  0x40   : > { %674 = shalt.err (!%p671_p1)
}
  0x41   : > { %559 = dma.hbm_to_vmem [thread:$0]  (!%p896_p11), %s1119_s2, 64, %s900_s28, [#allocation6]  }
  0x42   : > { %s955_s9 = sadd.s32 1, %s809_s18   ;;  %s31_s26 = sadd.s32 1, %s805_s17 }
  0x43   : > { %s28_s10 = ssub.s32 %s809_s18, %s955_s9  ;;  %p38_p13 = scmp.ne.s32.totalorder %s805_s17, %s801_s16 }
  0x44   : > { %p29_p6 = scmp.eq.s32.totalorder %s28_s10, 0  ;;  %p39_p10 = scmp.eq.s32.totalorder %s809_s18, 0 }
  0x45   : > { %p1132_p3 = scmp.eq.s32.totalorder %s866_s19, 1  ;;  %p573_p7 = scmp.lt.s32.totalorder %s809_s18, 2 }
  0x46   : > { %s971_s12 = scalar_select %p29_p6, %s805_s17, %s31_s26  }
  0x47   : > { %p965_p5 = por %p1132_p3, %p38_p13  ;;  %p40_p9 = por %p39_p10, %p38_p13 }
  0x48   : > { %s974_s13 = sand.u32 1, %s805_s17   ;;  %s509_s14 = sshll.u32 %s809_s18, 6 }
  0x49   : > { %s1133_s11 = scalar_select %p965_p5, 1, 0 }
  0x4a   : > { %s1123_s28 = sshll.u32 %s974_s13, 2  ;;  %s1134_s0 = sld [smem:[#allocation15_spill]] }
  0x4b   : > { %s190_s29 = scalar_lea.vmem [#allocation2], %s1123_s28  ;;  %p987_p11 = pnand %p573_p7, %p40_p9 }
  0x4c   : > { %s197_s30 = sshll.u32 %s190_s29, 4  ;;  %s994_s7 = scalar_lea.hbm %s1120_s3, %s509_s14  ;;  %s985_s30 = int_to_ptr.vmem [resolvable:$true] %s197_s30 }
  0x4d   : > { %s187_s8 = scalar_lea.sflag [#allocation3], %s974_s13  ;;  %p677_p0 = pneg %p987_p11 }
  0x50   : > { %s981_s27 = scalar_lea.hbm %s1134_s0, %s509_s14  ;;  %s680_s24 = scalar_lea.hbm %s1134_s0, 128 }
  0x51   : > { %s675_s26 = scalar_lea.hbm %s981_s27, 64  ;;  %p681_p13 = scmp.lt.u32.totalorder %s981_s27, %s1134_s0 }
  0x52   : > { %p676_p12 = scmp.ne.s32.totalorder %s981_s27, %s675_s26  ;;  %p682_p6 = scmp.lt.u32.totalorder %s680_s24, %s675_s26 }
  0x53   : > { %p684_p3 = scmp.lt.u32.totalorder %s675_s26, %s981_s27 }
  0x54   : > { %p678_p2 = pnand %p677_p0, %p676_p12  ;;  %p683_p10 = por %p682_p6, %p681_p13 }
  0x56   : > { %p679_p1 = pneg %p678_p2  ;;  %p685_p7 = por %p684_p3, %p683_p10 }
  0x58   : > { %p686_p9 = pnand %p685_p7, %p679_p1 }
  0x5a   : > { %689 = shalt.err (!%p686_p9)
}
  0x5b   : > { %s690_s14 = scalar_lea.vmem %s985_s30, 64  ;;  %s815_s6 = smov [#allocation2]  }
  0x5c   : > { %p691_p12 = scmp.ne.s32.totalorder %s985_s30, %s690_s14  ;;  %s695_s25 = sshll.u32 %s815_s6, 4  ;;  %s696_s25 = int_to_ptr.vmem [resolvable:$false] %s695_s25 }
  0x5d   : > { %s697_s28 = scalar_lea.vmem %s696_s25, 128  ;;  %p698_p4 = scmp.lt.s32.totalorder %s985_s30, %s696_s25 }
  0x5e   : > { %p693_p2 = pnand %p691_p12, %p677_p0  ;;  %p699_p13 = scmp.lt.s32.totalorder %s697_s28, %s690_s14 }
  0x60   : > { %p694_p5 = pneg %p693_p2  ;;  %p700_p6 = por %p699_p13, %p698_p4 }
  0x62   : > { %p701_p10 = pnand %p700_p6, %p694_p5 }
  0x64   : > { %704 = shalt.err (!%p701_p10)
}
  0x65   : > { %563 = dma.hbm_to_vmem [thread:$0]  (!%p987_p11), %s981_s27, 64, %s985_s30, %s187_s8  }
  0x66   : > { %s1136_s26 = sshll.u32 %s974_s13, 2  ;;  %s205_s24 = scalar_lea.sflag [#allocation9], %s974_s13 }
  0x67   : > { %s208_s10 = scalar_lea.vmem [#allocation8], %s1136_s26  ;;  %s705_s29 = scalar_lea.hbm %s994_s7, 64 }
  0x68   : > { %s215_s20 = sshll.u32 %s208_s10, 4  ;;  %p706_p4 = scmp.ne.s32.totalorder %s994_s7, %s705_s29  ;;  %s216_s20 = int_to_ptr.vmem [resolvable:$true] %s215_s20 }
  0x69   : > { %s710_s25 = scalar_lea.hbm %s1120_s3, 128  ;;  %p711_p3 = scmp.lt.u32.totalorder %s994_s7, %s1120_s3 }
  0x6a   : > { %p708_p5 = pnand %p706_p4, %p677_p0  ;;  %p712_p7 = scmp.lt.u32.totalorder %s710_s25, %s705_s29 }
  0x6b   : > { %p714_p12 = scmp.lt.u32.totalorder %s705_s29, %s994_s7 }
  0x6c   : > { %p709_p1 = pneg %p708_p5  ;;  %p713_p9 = por %p712_p7, %p711_p3 }
  0x6e   : > { %p715_p2 = por %p714_p12, %p713_p9 }
  0x70   : > { %p716_p13 = pnand %p715_p2, %p709_p1 }
  0x72   : > { %719 = shalt.err (!%p716_p13)
}
  0x73   : > { %s720_s13 = scalar_lea.vmem %s216_s20, 64  ;;  %s816_s27 = smov [#allocation8]  }
  0x74   : > { %p721_p6 = scmp.ne.s32.totalorder %s216_s20, %s720_s13  ;;  %s725_s30 = sshll.u32 %s816_s27, 4  ;;  %s726_s30 = int_to_ptr.vmem [resolvable:$false] %s725_s30 }
  0x75   : > { %s727_s8 = scalar_lea.vmem %s726_s30, 128  ;;  %p728_p5 = scmp.lt.s32.totalorder %s216_s20, %s726_s30 }
  0x76   : > { %p723_p10 = pnand %p721_p6, %p677_p0  ;;  %p729_p8 = scmp.lt.s32.totalorder %s727_s8, %s720_s13 }
  0x78   : > { %p724_p4 = pneg %p723_p10  ;;  %p730_p3 = por %p729_p8, %p728_p5 }
  0x7a   : > { %p731_p7 = pnand %p730_p3, %p724_p4 }
  0x7c   : > { %734 = shalt.err (!%p731_p7)
}
  0x7d   : > { %566 = dma.hbm_to_vmem [thread:$0]  (!%p987_p11), %s994_s7, 64, %s216_s20, %s205_s24  }
  0x7e   : > { %p1137_p1 = scmp.ne.s32.totalorder %s1130_s23, 0 }
  0x7f   : > { %s1047_s0 = sand.u32 (!%p1137_p1), 1, %s801_s16   ;;  %p1138_p8 = scmp.ne.s32.totalorder (!%p1137_p1), %s1128_s21, 0 }
  0x80   : > { %224 = sbr.rel (%p1137_p1) target bundleno = 696 (0x2b8), region = 36  ;;  %s1050_s26 = sshll.u32 (!%p1137_p1), %s1047_s0, 2 }
  0x81   : > { %s227_s10 = scalar_lea.sflag (!%p1137_p1), [#allocation3], %s1047_s0  ;;  %s230_s29 = scalar_lea.vmem (!%p1137_p1), [#allocation2], %s1050_s26 }
  0x87   : > { %780 = dma.done.wait (%p1138_p8), %s227_s10, 64  }
  0x88   : > { %782 = vsyncadd (%p1138_p8), %s227_s10, 4294967232  ;;  %p1139_p11 = scmp.eq.s32.totalorder %s866_s19, 0 }
  0x8a   : > { %784 = dma.done.wait (%p1139_p11), [#allocation6], 320   ;;  %p1140_p0 = pmov %p1139_p11 }
  0x8b   : > { %s244_s23 = scalar_lea.sflag [#allocation9], %s1047_s0  ;;  %s247_s5 = scalar_lea.vmem [#allocation8], %s1050_s26 }
  0x8c   : > { %786 = vsyncadd (%p1140_p0), [#allocation6], 4294966976 }
  0x8d   : > { %788 = dma.done.wait (%p1138_p8), %s244_s23, 64  }
  0x8e   : > { %790 = vsyncadd (%p1138_p8), %s244_s23, 4294967232  ;;  %v817_v0 = vmov 0.0   ;;  %vm818_vm0 = vmmov 0   ;;  %v615_v1 = vld [vmem:[#allocation5] sm:$0xff]   ;;  %v616_v2 = vld [vmem:[#allocation5 + $0x8] sm:$0xff]   ;;  %vm300_vm1 = vcmask 261120  }
  0x8f   : > { %531 = vmatprep.subr.bf16.mxu0 %v817_v0  ;;  %535 = vmatprep.mubr.msk.bf16.mxu0 %vm818_vm0, %v817_v0  ;;  %v278_v3 = vld [vmem:[%s230_s29] sm:$0xf]  ;;  %v344_v4 = vld [vmem:[%s247_s5] sm:$0xf]  ;;  %v518_v5 = vld [vmem:[#allocation7] ss:$0 sm:$0xff] }
  0x90   : > { %532 = vmatpush3.bf16.msra.mxu0 %v615_v1  ;;  %v345_v6 = vunpack.c.l.bf16 %v344_v4  ;;  %vm347_vm2 = vcmask 523264   ;;  %v522_v23 = vld [vmem:[#allocation7 + $0x1] ss:$0 sm:$0xff]  ;;  %v523_v25 = vld [vmem:[#allocation7 + $0x2] ss:$0 sm:$0xff]  ;;  %s525_s21 = sshll.u32 %s866_s19, 6 }
  0x91   : > { %533 = vmatprep.subr.bf16.mxu0 %v817_v0  ;;  %s276_s7 = scalar_lea.vmem [#allocation10], %s1050_s26  ;;  %vm375_vm3 = vcmask 519168   ;;  %s1073_s6 = scalar_lea.hbm %s1121_s4, %s525_s21 }
  0x92   : > { %s391_s20 = sshll.u32 %s276_s7, 4  ;;  %s378_s25 = scalar_lea.sflag [#allocation4], %s1047_s0  ;;  %s1075_s20 = int_to_ptr.vmem [resolvable:$true] %s391_s20 }
  0x93   : > { %s735_s28 = scalar_lea.vmem %s1075_s20, 64  ;;  %p1141_p12 = scmp.ne.s32.totalorder %s1133_s11, 0 }
  0x94   : > { %534 = vmatpush3.bf16.msra.mxu0 %v616_v2  ;;  %p736_p9 = scmp.ne.s32.totalorder %s1075_s20, %s735_s28  ;;  %s819_s19 = smov [#allocation10]  }
  0x95   : > { %s739_s13 = sshll.u32 %s819_s19, 4  ;;  %s740_s13 = int_to_ptr.vmem [resolvable:$false] %s739_s13 }
  0x96   : > { %p737_p2 = pnand %p736_p9, %p1141_p12  ;;  %s741_s27 = scalar_lea.vmem %s740_s13, 128 }
  0x97   : > { %536 = vmatmul.mubr.msk.bf16.vlgmr.msra.gmra.mrb[0].mxu0 %vm300_vm1, %v278_v3  ;;  %p742_p6 = scmp.lt.s32.totalorder %s1075_s20, %s740_s13  ;;  %p743_p10 = scmp.lt.s32.totalorder %s741_s27, %s735_s28 }
  0x98   : > { %p738_p13 = pneg %p737_p2 }
  0x99   : > { %p744_p4 = por %p743_p10, %p742_p6 }
  0x9b   : > { %p745_p5 = pnand %p744_p4, %p738_p13 }
 0x16a   : > { %v338_v7 = vpop.f32.mrb[0].mxu0 }
 0x16b   : > { %v339_v8 = vadd.f32 %v518_v5, %v338_v7  ;;  %v537_v9 = vpop.f32.mrb[1].mxu0 }
 0x16c   : > { %v341_v10 = vpop.f32.mrb[2].mxu0 }
 0x16d   : > { %v538_v11 = vpop.f32.mrb[3].mxu0  ;;  %v346_v12 = vadd.f32 %v345_v6, %v339_v8 }
 0x16f   : > { %v348_v13 = vsel %vm347_vm2, %v346_v12, 0.0 }
 0x170   : > { %349 = vadd.xlane.f32.xlu0 %v348_v13 }
 0x1fd   : > { %v350_v14 = vpop.xlane.xlu0 %349 }
 0x1fe   : > { %v352_v15 = vmul.f32 0.015625, %v350_v14 }
 0x200   : > { %v353_v16 = vsub.f32 %v346_v12, %v352_v15 }
 0x202   : > { %v354_v17 = vmul.f32 %v353_v16, %v353_v16 }
 0x204   : > { %v355_v18 = vsel %vm347_vm2, %v354_v17, 0.0 }
 0x205   : > { %356 = vadd.xlane.f32.xlu0 %v355_v18 }
 0x292   : > { %v357_v19 = vpop.xlane.xlu0 %356 }
 0x293   : > { %v358_v20 = vmul.f32 0.015625, %v357_v19 }
 0x295   : > { %v359_v21 = vadd.f32 1e-08, %v358_v20 }
 0x297   : > { %617 = vrsqrt.f32 %v359_v21 }
 0x2a1   : > { %v618_v22 = vpop.eup %617 }
 0x2a2   : > { %v361_v24 = vmul.f32 %v618_v22, %v353_v16 }
 0x2a4   : > { %v367_v26 = vmul.f32 %v522_v23, %v361_v24 }
 0x2a6   : > { %v373_v27 = vadd.f32 %v523_v25, %v367_v26 }
 0x2a8   : > { %v374_v28 = vpack.c.bf16 %v373_v27, %v373_v27 }
 0x2aa   : > { %376 = vst.msk [vmem:[%s276_s7] sm:$0xf] %vm375_vm3, %v374_v28 }
 0x2ab   : > { %748 = shalt.err (!%p745_p5)
}
 0x2ac   : > { %s749_s30 = scalar_lea.hbm %s1073_s6, 64  ;;  %s753_s26 = scalar_lea.hbm %s1121_s4, 128 }
 0x2ad   : > { %p750_p3 = scmp.ne.s32.totalorder %s1073_s6, %s749_s30  ;;  %p754_p8 = scmp.lt.u32.totalorder %s1073_s6, %s1121_s4 }
 0x2ae   : > { %p755_p11 = scmp.lt.u32.totalorder %s753_s26, %s749_s30  ;;  %p757_p9 = scmp.lt.u32.totalorder %s749_s30, %s1073_s6 }
 0x2af   : > { %p751_p7 = pnand %p750_p3, %p1141_p12 }
 0x2b0   : > { %p756_p0 = por %p755_p11, %p754_p8 }
 0x2b1   : > { %p752_p1 = pneg %p751_p7 }
 0x2b2   : > { %p758_p2 = por %p757_p9, %p756_p0 }
 0x2b4   : > { %p759_p13 = pnand %p758_p2, %p752_p1 }
 0x2b6   : > { %762 = shalt.err (!%p759_p13)
}
 0x2b7   : > { %551 = dma.vmem_to_hbm [thread:$0]  (%p1141_p12), %s1075_s20, 64, %s1073_s6, %s378_s25  }
 0x2b8 PF: > { %s403_s23 = sand.u32 1, %s797_s15   ;;  %p1142_p6 = scmp.ne.s32.totalorder %s1129_s22, 0 }
 0x2b9   : > { %p1143_p10 = scmp.ge.s32.totalorder %s809_s18, 2  ;;  %s404_s5 = scalar_lea.sflag [#allocation4], %s403_s23 }
 0x2bb   : > { %p568_p4 = pnand %p1143_p10, %p1142_p6 }
 0x2bd   : > { %792 = dma.done.wait (!%p568_p4), %s404_s5, 64  }
 0x2be   : > { %794 = vsyncadd (!%p568_p4), %s404_s5, 4294967232  ;;  %p21_p5 = scmp.ge.s32.totalorder %s955_s9, 4   ;;  %s1144_s15 = smov %s801_s16 }
 0x2bf   : > { %s1145_s16 = smov %s805_s17  ;;  %s1146_s17 = smov %s971_s12 }
 0x2c0   : > { %s1147_s18 = smov %s955_s9  ;;  %23 = sbr.rel (!%p21_p5) target bundleno = 10 (0xa), region = 102 }
 0x2c7   :  { %409 = vsyncpa [#allocation3], 1 }
 0x2c8   :  { %411 = vsyncpa [#allocation3 + $0x1], 1 }
 0x2c9   :  { %412 = vsyncpa [#allocation6], 1 }
 0x2ca   :  { %413 = vsyncpa [#allocation9], 1 }
 0x2cb   :  { %415 = vsyncpa [#allocation9 + $0x1], 1 }
 0x2cc   :  { %416 = vsyncpa [#allocation4], 1 }
 0x2cd   :  { %418 = vsyncpa [#allocation4 + $0x1], 1 }

// kernel: lxrt_model_forward.37
= control target key start
LH: loop header
LB: loop body
LE: loop exit
PB: predicated region body
PF: predicated region fallthrough
CT: control target
= control target key end

     0   :  { %8 = vsyncpa [#allocation3], 0  ;;  %s940_s0 = inlined_call_operand.hbm [shape: bf16[16,32], index: 0, kind: input, shape index: {}]   ;;  %s941_s1 = inlined_call_operand.hbm [shape: bf16[32,64], index: 1, kind: input, shape index: {}]   ;;  %s942_s2 = inlined_call_operand.hbm [shape: f32[3,64], index: 2, kind: input, shape index: {}]   ;;  %s943_s3 = inlined_call_operand.hbm [shape: bf16[16,64], index: 3, kind: output, shape index: {}]  }
   0x1   :  { %10 = vsyncpa [#allocation3 + $0x1], 0 }
   0x2   :  { %11 = vsyncpa [#allocation6], 0 }
   0x3   :  { %12 = vsyncpa [#allocation4], 0 }
   0x4   :  { %14 = vsyncpa [#allocation4 + $0x1], 0  ;;  %s707_s12 = smov 0   ;;  %s709_s13 = smov 0  }
   0x5   :  { %s711_s14 = smov 0   ;;  %s713_s15 = smov 0  }
   0x6 LB: > { %s728_s16 = sadd.s32 4294967295, %s677_s15   ;;  %s413_s17 = sadd.s32 4294967294, %s677_s15   ;;  %s677_s15 = sphi %s713_s15, %s963_s15   ;;  %s673_s14 = sphi %s711_s14, %s962_s14   ;;  %s669_s13 = sphi %s709_s13, %s961_s13   ;;  %s665_s12 = sphi %s707_s12, %s960_s12  }
   0x7   : > { %p40_p0 = scmp.ne.s32.totalorder %s669_s13, %s665_s12  ;;  %p944_p1 = scmp.eq.s32.totalorder %s728_s16, 0 }
   0x8   : > { %p112_p3 = scmp.eq.s32.totalorder %s413_s17, 1  ;;  %p414_p5 = scmp.ge.s32.totalorder %s677_s15, 1 }
   0x9   : > { %p737_p4 = por %p944_p1, %p40_p0  ;;  %p119_p7 = scmp.lt.s32.totalorder %s677_s15, 3 }
   0xa   : > { %p742_p6 = por %p112_p3, %p40_p0  ;;  %s679_s21 = smov [#allocation5]  }
   0xb   : > { %s947_s18 = scalar_select %p737_p4, 1, 0 }
   0xc   : > { %s948_s19 = scalar_select %p742_p6, 1, 0 }
   0xd   : > { %p747_p8 = pnand %p414_p5, %p119_p7  ;;  %s131_s22 = sshll.u32 %s679_s21, 4  ;;  %s751_s22 = int_to_ptr.vmem [resolvable:$true] %s131_s22 }
   0xe   : > { %s680_s24 = smov [#allocation7]   ;;  %s521_s28 = scalar_lea.hbm %s941_s1, 256 }
   0xf   : > { %p458_p9 = pneg %p747_p8  ;;  %s145_s25 = sshll.u32 %s680_s24, 4  ;;  %s762_s25 = int_to_ptr.vmem [resolvable:$true] %s145_s25 }
  0x10   : > { %p522_p12 = scmp.ne.s32.totalorder %s941_s1, %s521_s28  ;;  %p528_p5 = scmp.lt.u32.totalorder %s521_s28, %s941_s1 }
  0x11   : > { %p758_p11 = pnand %p458_p9, %p944_p1 }
  0x13   : > { %p523_p13 = pneg %p758_p11 }
  0x15   : > { %p524_p0 = pnand %p523_p13, %p522_p12 }
  0x17   : > { %p525_p3 = pneg %p524_p0 }
  0x19   : > { %p530_p7 = pnand %p528_p5, %p525_p3 }
  0x1b   : > { %533 = shalt.err (!%p530_p7)
}
  0x1c   : > { %s534_s6 = scalar_lea.vmem %s751_s22, 256  ;;  %p542_p2 = scmp.lt.s32.totalorder %s751_s22, %s751_s22 }
  0x1d   : > { %p535_p9 = scmp.ne.s32.totalorder %s751_s22, %s534_s6  ;;  %p543_p12 = scmp.lt.s32.totalorder %s534_s6, %s534_s6 }
  0x1f   : > { %p537_p10 = pnand %p535_p9, %p523_p13  ;;  %p544_p0 = por %p543_p12, %p542_p2 }
  0x21   : > { %p538_p1 = pneg %p537_p10 }
  0x23   : > { %p545_p6 = pnand %p544_p0, %p538_p1 }
  0x25   : > { %548 = shalt.err (!%p545_p6)
}
  0x26   : > { %s681_s7 = smov 64   ;;  %s682_s8 = smov 4  }
  0x27   : > { %461 = dma.hbm_to_vmem [thread:$0]  (!%p758_p11), %s941_s1, 256, %s751_s22, [#allocation6], %s681_s7, %s681_s7, %s682_s8  }
  0x28   : > { %s549_s21 = scalar_lea.hbm %s942_s2, 64 }
  0x29   : > { %p550_p2 = scmp.ne.s32.totalorder %s942_s2, %s549_s21  ;;  %p556_p10 = scmp.lt.u32.totalorder %s549_s21, %s942_s2 }
  0x2b   : > { %p552_p1 = pnand %p550_p2, %p523_p13 }
  0x2d   : > { %p553_p6 = pneg %p552_p1 }
  0x2f   : > { %p558_p3 = pnand %p556_p10, %p553_p6 }
  0x31   : > { %561 = shalt.err (!%p558_p3)
}
  0x32   : > { %s562_s22 = scalar_lea.vmem %s762_s25, 64  ;;  %p570_p12 = scmp.lt.s32.totalorder %s762_s25, %s762_s25 }
  0x33   : > { %p563_p5 = scmp.ne.s32.totalorder %s762_s25, %s562_s22  ;;  %p571_p0 = scmp.lt.s32.totalorder %s562_s22, %s562_s22 }
  0x35   : > { %p565_p7 = pnand %p563_p5, %p523_p13  ;;  %p572_p2 = por %p571_p0, %p570_p12 }
  0x37   : > { %p566_p9 = pneg %p565_p7 }
  0x39   : > { %p573_p1 = pnand %p572_p2, %p566_p9 }
  0x3b   : > { %576 = shalt.err (!%p573_p1)
}
  0x3c   : > { %464 = dma.hbm_to_vmem [thread:$0]  (!%p758_p11), %s942_s2, 64, %s762_s25, [#allocation6]  }
  0x3d   : > { %s817_s4 = sadd.s32 1, %s677_s15   ;;  %s27_s23 = sadd.s32 1, %s673_s14 }
  0x3e   : > { %s24_s5 = ssub.s32 %s677_s15, %s817_s4  ;;  %p34_p13 = scmp.ne.s32.totalorder %s673_s14, %s669_s13 }
  0x3f   : > { %p25_p6 = scmp.eq.s32.totalorder %s24_s5, 0  ;;  %p35_p10 = scmp.eq.s32.totalorder %s677_s15, 0 }
  0x40   : > { %p951_p3 = scmp.eq.s32.totalorder %s728_s16, 1  ;;  %p475_p7 = scmp.lt.s32.totalorder %s677_s15, 2 }
  0x41   : > { %s833_s7 = scalar_select %p25_p6, %s673_s14, %s27_s23  }
  0x42   : > { %p827_p5 = por %p951_p3, %p34_p13  ;;  %p36_p9 = por %p35_p10, %p34_p13 }
  0x43   : > { %s156_s8 = sand.u32 1, %s673_s14   ;;  %s419_s25 = sshll.u32 %s677_s15, 6 }
  0x44   : > { %s952_s6 = scalar_select %p827_p5, 1, 0 }
  0x45   : > { %s418_s9 = sshll.u32 %s156_s8, 2  ;;  %s840_s17 = scalar_lea.hbm %s940_s0, %s419_s25 }
  0x46   : > { %s160_s21 = scalar_lea.vmem [#allocation2], %s418_s9  ;;  %p844_p11 = pnand %p475_p7, %p36_p9 }
  0x47   : > { %s167_s24 = sshll.u32 %s160_s21, 4  ;;  %s157_s27 = scalar_lea.sflag [#allocation3], %s156_s8  ;;  %s842_s24 = int_to_ptr.vmem [resolvable:$true] %s167_s24 }
  0x48   : > { %s577_s28 = scalar_lea.hbm %s840_s17, 64  ;;  %p579_p0 = pneg %p844_p11 }
  0x49   : > { %p578_p12 = scmp.ne.s32.totalorder %s840_s17, %s577_s28  ;;  %s582_s30 = scalar_lea.hbm %s940_s0, 128 }
  0x4a   : > { %p583_p13 = scmp.lt.u32.totalorder %s840_s17, %s940_s0  ;;  %p584_p6 = scmp.lt.u32.totalorder %s582_s30, %s577_s28 }
  0x4b   : > { %p580_p2 = pnand %p579_p0, %p578_p12  ;;  %p586_p3 = scmp.lt.u32.totalorder %s577_s28, %s840_s17 }
  0x4c   : > { %p585_p10 = por %p584_p6, %p583_p13 }
  0x4d   : > { %p581_p1 = pneg %p580_p2 }
  0x4e   : > { %p587_p7 = por %p586_p3, %p585_p10 }
  0x50   : > { %p588_p9 = pnand %p587_p7, %p581_p1 }
  0x52   : > { %591 = shalt.err (!%p588_p9)
}
  0x53   : > { %s592_s8 = scalar_lea.vmem %s842_s24, 64  ;;  %s683_s9 = smov [#allocation2]  }
  0x54   : > { %p593_p12 = scmp.ne.s32.totalorder %s842_s24, %s592_s8  ;;  %s597_s25 = sshll.u32 %s683_s9, 4  ;;  %s598_s25 = int_to_ptr.vmem [resolvable:$false] %s597_s25 }
  0x55   : > { %s599_s10 = scalar_lea.vmem %s598_s25, 128  ;;  %p600_p4 = scmp.lt.s32.totalorder %s842_s24, %s598_s25 }
  0x56   : > { %p595_p2 = pnand %p593_p12, %p579_p0  ;;  %p601_p13 = scmp.lt.s32.totalorder %s599_s10, %s592_s8 }
  0x58   : > { %p596_p5 = pneg %p595_p2  ;;  %p602_p6 = por %p601_p13, %p600_p4 }
  0x5a   : > { %p603_p10 = pnand %p602_p6, %p596_p5 }
  0x5c   : > { %606 = shalt.err (!%p603_p10)
}
  0x5d   : > { %468 = dma.hbm_to_vmem [thread:$0]  (!%p844_p11), %s840_s17, 64, %s842_s24, %s157_s27  }
  0x5e   : > { %176 = sbr.rel (%p747_p8) target bundleno = 657 (0x291), region = 32  ;;  %s876_s11 = sand.u32 (!%p747_p8), 1, %s669_s13  }
  0x5f   : > { %s421_s21 = sshll.u32 (!%p747_p8), %s876_s11, 2  ;;  %s179_s28 = scalar_lea.sflag (!%p747_p8), [#allocation3], %s876_s11 }
  0x60   : > { %s182_s22 = scalar_lea.vmem (!%p747_p8), [#allocation2], %s421_s21  ;;  %p954_p4 = scmp.ne.s32.totalorder (!%p747_p8), %s947_s18, 0 }
  0x65   : > { %652 = dma.done.wait (%p954_p4), %s179_s28, 64  }
  0x66   : > { %654 = vsyncadd (%p954_p4), %s179_s28, 4294967232  ;;  %p955_p5 = scmp.eq.s32.totalorder %s728_s16, 0 }
  0x68   : > { %656 = dma.done.wait (%p955_p5), [#allocation6], 320   ;;  %p956_p8 = pmov %p955_p5 }
  0x69   : > { %v684_v0 = vmov 0.0   ;;  %vm685_vm0 = vmmov 0   ;;  %v517_v1 = vld [vmem:[#allocation5] sm:$0xff]   ;;  %v518_v2 = vld [vmem:[#allocation5 + $0x8] sm:$0xff]   ;;  %v214_v3 = vld [vmem:[%s182_s22] sm:$0xf] }
  0x6a   : > { %658 = vsyncadd (%p956_p8), [#allocation6], 4294966976  ;;  %438 = vmatprep.subr.bf16.mxu0 %v684_v0  ;;  %442 = vmatprep.mubr.msk.bf16.mxu0 %vm685_vm0, %v684_v0  ;;  %vm236_vm1 = vcmask 261120   ;;  %v425_v4 = vld [vmem:[#allocation7] ss:$0 sm:$0xff]  ;;  %vm280_vm2 = vcmask 523264  }
  0x6b   : > { %439 = vmatpush3.bf16.msra.mxu0 %v517_v1  ;;  %v429_v20 = vld [vmem:[#allocation7 + $0x1] ss:$0 sm:$0xff]  ;;  %v430_v22 = vld [vmem:[#allocation7 + $0x2] ss:$0 sm:$0xff]  ;;  %s432_s18 = sshll.u32 %s728_s16, 6  ;;  %s212_s20 = scalar_lea.vmem [#allocation8], %s421_s21 }
  0x6c   : > { %440 = vmatprep.subr.bf16.mxu0 %v684_v0  ;;  %s324_s17 = sshll.u32 %s212_s20, 4  ;;  %vm308_vm3 = vcmask 519168   ;;  %s896_s27 = scalar_lea.hbm %s943_s3, %s432_s18  ;;  %s898_s17 = int_to_ptr.vmem [resolvable:$true] %s324_s17 }
  0x6d   : > { %s311_s29 = scalar_lea.sflag [#allocation4], %s876_s11  ;;  %s607_s30 = scalar_lea.vmem %s898_s17, 64 }
  0x6e   : > { %p608_p11 = scmp.ne.s32.totalorder %s898_s17, %s607_s30  ;;  %p957_p0 = scmp.ne.s32.totalorder %s952_s6, 0 }
  0x6f   : > { %441 = vmatpush3.bf16.msra.mxu0 %v518_v2  ;;  %s686_s16 = smov [#allocation8]  }
  0x70   : > { %p609_p1 = pnand %p608_p11, %p957_p0  ;;  %s611_s23 = sshll.u32 %s686_s16, 4  ;;  %s612_s23 = int_to_ptr.vmem [resolvable:$false] %s611_s23 }
  0x71   : > { %s613_s5 = scalar_lea.vmem %s612_s23, 128  ;;  %p614_p7 = scmp.lt.s32.totalorder %s898_s17, %s612_s23 }
  0x72   : > { %443 = vmatmul.mubr.msk.bf16.vlgmr.msra.gmra.mrb[0].mxu0 %vm236_vm1, %v214_v3  ;;  %p610_p3 = pneg %p609_p1  ;;  %p615_p9 = scmp.lt.s32.totalorder %s613_s5, %s607_s30 }
  0x74   : > { %p616_p12 = por %p615_p9, %p614_p7 }
  0x76   : > { %p617_p2 = pnand %p616_p12, %p610_p3 }
 0x145   : > { %v274_v5 = vpop.f32.mrb[0].mxu0 }
 0x146   : > { %v275_v6 = vadd.f32 %v425_v4, %v274_v5  ;;  %v444_v7 = vpop.f32.mrb[1].mxu0 }
 0x147   : > { %v277_v8 = vpop.f32.mrb[2].mxu0 }
 0x148   : > { %v445_v9 = vpop.f32.mrb[3].mxu0  ;;  %v281_v10 = vsel %vm280_vm2, %v275_v6, 0.0 }
 0x149   : > { %282 = vadd.xlane.f32.xlu0 %v281_v10 }
 0x1d6   : > { %v283_v11 = vpop.xlane.xlu0 %282 }
 0x1d7   : > { %v285_v12 = vmul.f32 0.015625, %v283_v11 }
 0x1d9   : > { %v286_v13 = vsub.f32 %v275_v6, %v285_v12 }
 0x1db   : > { %v287_v14 = vmul.f32 %v286_v13, %v286_v13 }
 0x1dd   : > { %v288_v15 = vsel %vm280_vm2, %v287_v14, 0.0 }
 0x1de   : > { %289 = vadd.xlane.f32.xlu0 %v288_v15 }
 0x26b   : > { %v290_v16 = vpop.xlane.xlu0 %289 }
 0x26c   : > { %v291_v17 = vmul.f32 0.015625, %v290_v16 }
 0x26e   : > { %v292_v18 = vadd.f32 1e-09, %v291_v17 }
 0x270   : > { %519 = vrsqrt.f32 %v292_v18 }
 0x27a   : > { %v520_v19 = vpop.eup %519 }
 0x27b   : > { %v294_v21 = vmul.f32 %v520_v19, %v286_v13 }
 0x27d   : > { %v300_v23 = vmul.f32 %v429_v20, %v294_v21 }
 0x27f   : > { %v306_v24 = vadd.f32 %v430_v22, %v300_v23 }
 0x281   : > { %v307_v25 = vpack.c.bf16 %v306_v24, %v306_v24 }
 0x283   : > { %309 = vst.msk [vmem:[%s212_s20] sm:$0xf] %vm308_vm3, %v307_v25 }
 0x284   : > { %620 = shalt.err (!%p617_p2)
}
 0x285   : > { %s621_s8 = scalar_lea.hbm %s896_s27, 64  ;;  %s625_s10 = scalar_lea.hbm %s943_s3, 128 }
 0x286   : > { %p622_p13 = scmp.ne.s32.totalorder %s896_s27, %s621_s8  ;;  %p626_p4 = scmp.lt.u32.totalorder %s896_s27, %s943_s3 }
 0x287   : > { %p627_p5 = scmp.lt.u32.totalorder %s625_s10, %s621_s8  ;;  %p629_p11 = scmp.lt.u32.totalorder %s621_s8, %s896_s27 }
 0x288   : > { %p623_p6 = pnand %p622_p13, %p957_p0 }
 0x289   : > { %p628_p8 = por %p627_p5, %p626_p4 }
 0x28a   : > { %p624_p10 = pneg %p623_p6 }
 0x28b   : > { %p630_p1 = por %p629_p11, %p628_p8 }
 0x28d   : > { %p631_p3 = pnand %p630_p1, %p624_p10 }
 0x28f   : > { %634 = shalt.err (!%p631_p3)
}
 0x290   : > { %456 = dma.vmem_to_hbm [thread:$0]  (%p957_p0), %s898_s17, 64, %s896_s27, %s311_s29  }
 0x291 PF: > { %s336_s28 = sand.u32 1, %s665_s12   ;;  %p958_p7 = scmp.ne.s32.totalorder %s948_s19, 0 }
 0x292   : > { %p959_p9 = scmp.ge.s32.totalorder %s677_s15, 2  ;;  %s337_s22 = scalar_lea.sflag [#allocation4], %s336_s28 }
 0x294   : > { %p470_p12 = pnand %p959_p9, %p958_p7 }
 0x296   : > { %660 = dma.done.wait (!%p470_p12), %s337_s22, 64  }
 0x297   : > { %662 = vsyncadd (!%p470_p12), %s337_s22, 4294967232  ;;  %p17_p2 = scmp.ge.s32.totalorder %s817_s4, 4   ;;  %s960_s12 = smov %s669_s13 }
 0x298   : > { %s961_s13 = smov %s673_s14  ;;  %s962_s14 = smov %s833_s7 }
 0x299   : > { %s963_s15 = smov %s817_s4  ;;  %19 = sbr.rel (!%p17_p2) target bundleno = 6 (0x6), region = 85 }
 0x2a0   :  { %342 = vsyncpa [#allocation3], 1 }
 0x2a1   :  { %344 = vsyncpa [#allocation3 + $0x1], 1 }
 0x2a2   :  { %345 = vsyncpa [#allocation6], 1 }
 0x2a3   :  { %346 = vsyncpa [#allocation4], 1 }
 0x2a4   :  { %348 = vsyncpa [#allocation4 + $0x1], 1 }

// kernel: lxrt_model_forward.58
= control target key start
LH: loop header
LB: loop body
LE: loop exit
PB: predicated region body
PF: predicated region fallthrough
CT: control target
= control target key end

     0   :  { %8 = vsyncpa [#allocation3], 0  ;;  %s934_s0 = inlined_call_operand.hbm [shape: bf16[16,64], index: 0, kind: input, shape index: {}]   ;;  %s935_s1 = inlined_call_operand.hbm [shape: bf16[64,64], index: 1, kind: input, shape index: {}]   ;;  %s936_s2 = inlined_call_operand.hbm [shape: f32[1,64], index: 2, kind: input, shape index: {}]   ;;  %s937_s3 = inlined_call_operand.hbm [shape: bf16[16,64], index: 3, kind: output, shape index: {}]  }
   0x1   :  { %10 = vsyncpa [#allocation3 + $0x1], 0 }
   0x2   :  { %11 = vsyncpa [#allocation6], 0 }
   0x3   :  { %12 = vsyncpa [#allocation4], 0 }
   0x4   :  { %14 = vsyncpa [#allocation4 + $0x1], 0  ;;  %s704_s12 = smov 0   ;;  %s706_s13 = smov 0  }
   0x5   :  { %s708_s14 = smov 0   ;;  %s710_s15 = smov 0  }
   0x6 LB: > { %s725_s16 = sadd.s32 4294967295, %s674_s15   ;;  %s404_s17 = sadd.s32 4294967294, %s674_s15   ;;  %s674_s15 = sphi %s710_s15, %s957_s15   ;;  %s670_s14 = sphi %s708_s14, %s956_s14   ;;  %s666_s13 = sphi %s706_s13, %s955_s13   ;;  %s662_s12 = sphi %s704_s12, %s954_s12  }
   0x7   : > { %p40_p0 = scmp.ne.s32.totalorder %s666_s13, %s662_s12  ;;  %p938_p1 = scmp.eq.s32.totalorder %s725_s16, 0 }
   0x8   : > { %p112_p3 = scmp.eq.s32.totalorder %s404_s17, 1  ;;  %p405_p5 = scmp.ge.s32.totalorder %s674_s15, 1 }
   0x9   : > { %p734_p4 = por %p938_p1, %p40_p0  ;;  %p119_p7 = scmp.lt.s32.totalorder %s674_s15, 3 }
   0xa   : > { %p739_p6 = por %p112_p3, %p40_p0  ;;  %s676_s21 = smov [#allocation5]  }
   0xb   : > { %s941_s18 = scalar_select %p734_p4, 1, 0 }
   0xc   : > { %s942_s19 = scalar_select %p739_p6, 1, 0 }
   0xd   : > { %p744_p8 = pnand %p405_p5, %p119_p7  ;;  %s131_s22 = sshll.u32 %s676_s21, 4  ;;  %s748_s22 = int_to_ptr.vmem [resolvable:$true] %s131_s22 }
   0xe   : > { %s677_s24 = smov [#allocation7]   ;;  %s518_s28 = scalar_lea.hbm %s935_s1, 512 }
   0xf   : > { %p455_p9 = pneg %p744_p8  ;;  %s145_s25 = sshll.u32 %s677_s24, 4  ;;  %s759_s25 = int_to_ptr.vmem [resolvable:$true] %s145_s25 }
  0x10   : > { %p519_p12 = scmp.ne.s32.totalorder %s935_s1, %s518_s28  ;;  %p525_p5 = scmp.lt.u32.totalorder %s518_s28, %s935_s1 }
  0x11   : > { %p755_p11 = pnand %p455_p9, %p938_p1 }
  0x13   : > { %p520_p13 = pneg %p755_p11 }
  0x15   : > { %p521_p0 = pnand %p520_p13, %p519_p12 }
  0x17   : > { %p522_p3 = pneg %p521_p0 }
  0x19   : > { %p527_p7 = pnand %p525_p5, %p522_p3 }
  0x1b   : > { %530 = shalt.err (!%p527_p7)
}
  0x1c   : > { %s531_s6 = scalar_lea.vmem %s748_s22, 512  ;;  %p539_p2 = scmp.lt.s32.totalorder %s748_s22, %s748_s22 }
  0x1d   : > { %p532_p9 = scmp.ne.s32.totalorder %s748_s22, %s531_s6  ;;  %p540_p12 = scmp.lt.s32.totalorder %s531_s6, %s531_s6 }
  0x1f   : > { %p534_p10 = pnand %p532_p9, %p520_p13  ;;  %p541_p0 = por %p540_p12, %p539_p2 }
  0x21   : > { %p535_p1 = pneg %p534_p10 }
  0x23   : > { %p542_p6 = pnand %p541_p0, %p535_p1 }
  0x25   : > { %545 = shalt.err (!%p542_p6)
}
  0x26   : > { %s678_s7 = smov 64   ;;  %s679_s8 = smov 4  }
  0x27   : > { %458 = dma.hbm_to_vmem [thread:$0]  (!%p755_p11), %s935_s1, 512, %s748_s22, [#allocation6], %s678_s7, %s678_s7, %s679_s8  }
  0x28   : > { %s546_s21 = scalar_lea.hbm %s936_s2, 16 }
  0x29   : > { %p547_p2 = scmp.ne.s32.totalorder %s936_s2, %s546_s21  ;;  %p553_p10 = scmp.lt.u32.totalorder %s546_s21, %s936_s2 }
  0x2b   : > { %p549_p1 = pnand %p547_p2, %p520_p13 }
  0x2d   : > { %p550_p6 = pneg %p549_p1 }
  0x2f   : > { %p555_p3 = pnand %p553_p10, %p550_p6 }
  0x31   : > { %558 = shalt.err (!%p555_p3)
}
  0x32   : > { %s559_s22 = scalar_lea.vmem %s759_s25, 16  ;;  %s566_s29 = scalar_lea.vmem %s759_s25, 32 }
  0x33   : > { %p560_p5 = scmp.ne.s32.totalorder %s759_s25, %s559_s22  ;;  %p567_p12 = scmp.lt.s32.totalorder %s759_s25, %s759_s25 }
  0x34   : > { %p568_p0 = scmp.lt.s32.totalorder %s566_s29, %s559_s22 }
  0x35   : > { %p562_p7 = pnand %p560_p5, %p520_p13 }
  0x36   : > { %p569_p2 = por %p568_p0, %p567_p12 }
  0x37   : > { %p563_p9 = pneg %p562_p7 }
  0x39   : > { %p570_p1 = pnand %p569_p2, %p563_p9 }
  0x3b   : > { %573 = shalt.err (!%p570_p1)
}
  0x3c   : > { %461 = dma.hbm_to_vmem [thread:$0]  (!%p755_p11), %s936_s2, 16, %s759_s25, [#allocation6]  }
  0x3d   : > { %s815_s5 = sadd.s32 1, %s674_s15   ;;  %s27_s23 = sadd.s32 1, %s670_s14 }
  0x3e   : > { %s24_s6 = ssub.s32 %s674_s15, %s815_s5  ;;  %p34_p13 = scmp.ne.s32.totalorder %s670_s14, %s666_s13 }
  0x3f   : > { %p25_p6 = scmp.eq.s32.totalorder %s24_s6, 0  ;;  %p35_p10 = scmp.eq.s32.totalorder %s674_s15, 0 }
  0x40   : > { %p945_p3 = scmp.eq.s32.totalorder %s725_s16, 1  ;;  %p472_p7 = scmp.lt.s32.totalorder %s674_s15, 2 }
  0x41   : > { %s831_s8 = scalar_select %p25_p6, %s670_s14, %s27_s23  }
  0x42   : > { %p825_p5 = por %p945_p3, %p34_p13  ;;  %p36_p9 = por %p35_p10, %p34_p13 }
  0x43   : > { %s156_s9 = sand.u32 1, %s670_s14   ;;  %s410_s25 = sshll.u32 %s674_s15, 6 }
  0x44   : > { %s946_s7 = scalar_select %p825_p5, 1, 0 }
  0x45   : > { %s409_s10 = sshll.u32 %s156_s9, 2  ;;  %s838_s21 = scalar_lea.hbm %s934_s0, %s410_s25 }
  0x46   : > { %s160_s24 = scalar_lea.vmem [#allocation2], %s409_s10  ;;  %p842_p11 = pnand %p472_p7, %p36_p9 }
  0x47   : > { %s167_s26 = sshll.u32 %s160_s24, 4  ;;  %s157_s28 = scalar_lea.sflag [#allocation3], %s156_s9  ;;  %s840_s26 = int_to_ptr.vmem [resolvable:$true] %s167_s26 }
  0x48   : > { %s574_s22 = scalar_lea.hbm %s838_s21, 64  ;;  %p576_p0 = pneg %p842_p11 }
  0x49   : > { %p575_p12 = scmp.ne.s32.totalorder %s838_s21, %s574_s22  ;;  %s579_s4 = scalar_lea.hbm %s934_s0, 128 }
  0x4a   : > { %p580_p13 = scmp.lt.u32.totalorder %s838_s21, %s934_s0  ;;  %p581_p6 = scmp.lt.u32.totalorder %s579_s4, %s574_s22 }
  0x4b   : > { %p577_p2 = pnand %p576_p0, %p575_p12  ;;  %p583_p3 = scmp.lt.u32.totalorder %s574_s22, %s838_s21 }
  0x4c   : > { %p582_p10 = por %p581_p6, %p580_p13 }
  0x4d   : > { %p578_p1 = pneg %p577_p2 }
  0x4e   : > { %p584_p7 = por %p583_p3, %p582_p10 }
  0x50   : > { %p585_p9 = pnand %p584_p7, %p578_p1 }
  0x52   : > { %588 = shalt.err (!%p585_p9)
}
  0x53   : > { %s589_s9 = scalar_lea.vmem %s840_s26, 64  ;;  %s680_s10 = smov [#allocation2]  }
  0x54   : > { %p590_p12 = scmp.ne.s32.totalorder %s840_s26, %s589_s9  ;;  %s594_s25 = sshll.u32 %s680_s10, 4  ;;  %s595_s25 = int_to_ptr.vmem [resolvable:$false] %s594_s25 }
  0x55   : > { %s596_s11 = scalar_lea.vmem %s595_s25, 128  ;;  %p597_p4 = scmp.lt.s32.totalorder %s840_s26, %s595_s25 }
  0x56   : > { %p592_p2 = pnand %p590_p12, %p576_p0  ;;  %p598_p13 = scmp.lt.s32.totalorder %s596_s11, %s589_s9 }
  0x58   : > { %p593_p5 = pneg %p592_p2  ;;  %p599_p6 = por %p598_p13, %p597_p4 }
  0x5a   : > { %p600_p10 = pnand %p599_p6, %p593_p5 }
  0x5c   : > { %603 = shalt.err (!%p600_p10)
}
  0x5d   : > { %465 = dma.hbm_to_vmem [thread:$0]  (!%p842_p11), %s838_s21, 64, %s840_s26, %s157_s28  }
  0x5e   : > { %176 = sbr.rel (%p744_p8) target bundleno = 352 (0x160), region = 32  ;;  %s874_s17 = sand.u32 (!%p744_p8), 1, %s666_s13  }
  0x5f   : > { %s412_s24 = sshll.u32 (!%p744_p8), %s874_s17, 2  ;;  %s179_s22 = scalar_lea.sflag (!%p744_p8), [#allocation3], %s874_s17 }
  0x60   : > { %s182_s29 = scalar_lea.vmem (!%p744_p8), [#allocation2], %s412_s24  ;;  %p948_p4 = scmp.ne.s32.totalorder (!%p744_p8), %s941_s18, 0 }
  0x65   : > { %649 = dma.done.wait (%p948_p4), %s179_s22, 64  }
  0x66   : > { %651 = vsyncadd (%p948_p4), %s179_s22, 4294967232  ;;  %p949_p5 = scmp.eq.s32.totalorder %s725_s16, 0 }
  0x68   : > { %653 = dma.done.wait (%p949_p5), [#allocation6], 528   ;;  %p950_p11 = pmov %p949_p5 }
  0x69   : > { %v681_v0 = vmov 0.0   ;;  %vm682_vm0 = vmmov 0   ;;  %v514_v1 = vld [vmem:[#allocation5] sm:$0xff]   ;;  %v515_v2 = vld [vmem:[#allocation5 + $0x8] sm:$0xff]   ;;  %v516_v3 = vld [vmem:[#allocation5 + $0x10] sm:$0xff]   ;;  %vm254_vm1 = vcmask 523264  }
  0x6a   : > { %655 = vsyncadd (%p950_p11), [#allocation6], 4294966768  ;;  %431 = vmatprep.subr.bf16.mxu0 %v681_v0  ;;  %439 = vmatprep.mubr.msk.bf16.mxu0 %vm682_vm0, %v681_v0  ;;  %v517_v4 = vld [vmem:[#allocation5 + $0x18] sm:$0xff]   ;;  %v416_v6 = vld [vmem:[#allocation7] ss:$0 sm:$0xff]  ;;  %s423_s18 = sshll.u32 %s725_s16, 6 }
  0x6b   : > { %432 = vmatpush3.bf16.msra.mxu0 %v514_v1  ;;  %v214_v5 = vld [vmem:[%s182_s29] sm:$0xf]  ;;  %s212_s20 = scalar_lea.vmem [#allocation8], %s412_s24  ;;  %vm299_vm2 = vcmask 519168   ;;  %s890_s28 = scalar_lea.hbm %s937_s3, %s423_s18 }
  0x6c   : > { %433 = vmatprep.subr.bf16.mxu0 %v681_v0  ;;  %s315_s21 = sshll.u32 %s212_s20, 4  ;;  %s302_s16 = scalar_lea.sflag [#allocation4], %s874_s17  ;;  %s892_s21 = int_to_ptr.vmem [resolvable:$true] %s315_s21 }
  0x6d   : > { %s604_s30 = scalar_lea.vmem %s892_s21, 64  ;;  %p951_p0 = scmp.ne.s32.totalorder %s946_s7, 0 }
  0x6e   : > { %p605_p8 = scmp.ne.s32.totalorder %s892_s21, %s604_s30  ;;  %s683_s4 = smov [#allocation8]  }
  0x6f   : > { %434 = vmatpush3.bf16.msra.mxu0 %v515_v2  ;;  %s608_s23 = sshll.u32 %s683_s4, 4  ;;  %s609_s23 = int_to_ptr.vmem [resolvable:$false] %s608_s23 }
  0x70   : > { %435 = vmatprep.subr.bf16.mxu0 %v681_v0  ;;  %p606_p1 = pnand %p605_p8, %p951_p0  ;;  %s610_s6 = scalar_lea.vmem %s609_s23, 128 }
  0x71   : > { %p611_p7 = scmp.lt.s32.totalorder %s892_s21, %s609_s23  ;;  %p612_p9 = scmp.lt.s32.totalorder %s610_s6, %s604_s30 }
  0x72   : > { %p607_p3 = pneg %p606_p1 }
  0x73   : > { %436 = vmatpush3.bf16.msra.mxu0 %v516_v3  ;;  %p613_p12 = por %p612_p9, %p611_p7 }
  0x74   : > { %437 = vmatprep.subr.bf16.mxu0 %v681_v0 }
  0x75   : > { %p614_p2 = pnand %p613_p12, %p607_p3 }
  0x77   : > { %438 = vmatpush3.bf16.msra.mxu0 %v517_v4 }
  0x7a   : > { %440 = vmatmul.mubr.msk.bf16.vlgmr.msra.gmra.mrb[0].mxu0 %vm254_vm1, %v214_v5 }
 0x14d   : > { %v292_v7 = vpop.f32.mrb[0].mxu0 }
 0x14e   : > { %v293_v8 = vadd.f32 %v416_v6, %v292_v7  ;;  %v441_v9 = vpop.f32.mrb[1].mxu0 }
 0x14f   : > { %v295_v10 = vpop.f32.mrb[2].mxu0 }
 0x150   : > { %v298_v11 = vpack.c.bf16 %v293_v8, %v293_v8  ;;  %v442_v12 = vpop.f32.mrb[3].mxu0 }
 0x152   : > { %300 = vst.msk [vmem:[%s212_s20] sm:$0xf] %vm299_vm2, %v298_v11 }
 0x153   : > { %617 = shalt.err (!%p614_p2)
}
 0x154   : > { %s618_s9 = scalar_lea.hbm %s890_s28, 64  ;;  %s622_s11 = scalar_lea.hbm %s937_s3, 128 }
 0x155   : > { %p619_p13 = scmp.ne.s32.totalorder %s890_s28, %s618_s9  ;;  %p623_p4 = scmp.lt.u32.totalorder %s890_s28, %s937_s3 }
 0x156   : > { %p624_p5 = scmp.lt.u32.totalorder %s622_s11, %s618_s9  ;;  %p626_p8 = scmp.lt.u32.totalorder %s618_s9, %s890_s28 }
 0x157   : > { %p620_p6 = pnand %p619_p13, %p951_p0 }
 0x158   : > { %p625_p11 = por %p624_p5, %p623_p4 }
 0x159   : > { %p621_p10 = pneg %p620_p6 }
 0x15a   : > { %p627_p1 = por %p626_p8, %p625_p11 }
 0x15c   : > { %p628_p3 = pnand %p627_p1, %p621_p10 }
 0x15e   : > { %631 = shalt.err (!%p628_p3)
}
 0x15f   : > { %453 = dma.vmem_to_hbm [thread:$0]  (%p951_p0), %s892_s21, 64, %s890_s28, %s302_s16  }
 0x160 PF: > { %s327_s22 = sand.u32 1, %s662_s12   ;;  %p952_p7 = scmp.ne.s32.totalorder %s942_s19, 0 }
 0x161   : > { %p953_p9 = scmp.ge.s32.totalorder %s674_s15, 2  ;;  %s328_s29 = scalar_lea.sflag [#allocation4], %s327_s22 }
 0x163   : > { %p467_p12 = pnand %p953_p9, %p952_p7 }
 0x165   : > { %657 = dma.done.wait (!%p467_p12), %s328_s29, 64  }
 0x166   : > { %659 = vsyncadd (!%p467_p12), %s328_s29, 4294967232  ;;  %p17_p2 = scmp.ge.s32.totalorder %s815_s5, 4   ;;  %s954_s12 = smov %s666_s13 }
 0x167   : > { %s955_s13 = smov %s670_s14  ;;  %s956_s14 = smov %s831_s8 }
 0x168   : > { %s957_s15 = smov %s815_s5  ;;  %19 = sbr.rel (!%p17_p2) target bundleno = 6 (0x6), region = 85 }
 0x16f   :  { %333 = vsyncpa [#allocation3], 1 }
 0x170   :  { %335 = vsyncpa [#allocation3 + $0x1], 1 }
 0x171   :  { %336 = vsyncpa [#allocation6], 1 }
 0x172   :  { %337 = vsyncpa [#allocation4], 1 }
 0x173   :  { %339 = vsyncpa [#allocation4 + $0x1], 1 }

// kernel: lxrt_model_forward.38
= control target key start
LH: loop header
LB: loop body
LE: loop exit
PB: predicated region body
PF: predicated region fallthrough
CT: control target
= control target key end

     0   :  { %8 = vsyncpa [#allocation3], 0  ;;  %s912_s0 = inlined_call_operand.hbm [shape: bf16[16,8], index: 0, kind: input, shape index: {}]   ;;  %s913_s1 = inlined_call_operand.hbm [shape: bf16[8,64], index: 1, kind: input, shape index: {}]   ;;  %s914_s2 = inlined_call_operand.hbm [shape: f32[3,64], index: 2, kind: input, shape index: {}]   ;;  %s915_s3 = inlined_call_operand.hbm [shape: bf16[16,64], index: 3, kind: output, shape index: {}]  }
   0x1   :  { %10 = vsyncpa [#allocation3 + $0x1], 0 }
   0x2   :  { %11 = vsyncpa [#allocation6], 0 }
   0x3   :  { %12 = vsyncpa [#allocation4], 0 }
   0x4   :  { %14 = vsyncpa [#allocation4 + $0x1], 0  ;;  %s683_s12 = smov 0   ;;  %s685_s13 = smov 0  }
   0x5   :  { %s687_s14 = smov 0   ;;  %s689_s15 = smov 0  }
   0x6 LB: > { %s704_s16 = sadd.s32 4294967295, %s655_s15   ;;  %s400_s17 = sadd.s32 4294967294, %s655_s15   ;;  %s655_s15 = sphi %s689_s15, %s935_s15   ;;  %s651_s14 = sphi %s687_s14, %s934_s14   ;;  %s647_s13 = sphi %s685_s13, %s933_s13   ;;  %s643_s12 = sphi %s683_s12, %s932_s12  }
   0x7   : > { %p40_p0 = scmp.ne.s32.totalorder %s647_s13, %s643_s12  ;;  %p916_p1 = scmp.eq.s32.totalorder %s704_s16, 0 }
   0x8   : > { %p112_p3 = scmp.eq.s32.totalorder %s400_s17, 1  ;;  %p401_p5 = scmp.ge.s32.totalorder %s655_s15, 1 }
   0x9   : > { %p713_p4 = por %p916_p1, %p40_p0  ;;  %p119_p7 = scmp.lt.s32.totalorder %s655_s15, 3 }
   0xa   : > { %p718_p6 = por %p112_p3, %p40_p0  ;;  %s657_s21 = smov [#allocation5]  }
   0xb   : > { %s919_s18 = scalar_select %p713_p4, 1, 0 }
   0xc   : > { %s920_s19 = scalar_select %p718_p6, 1, 0 }
   0xd   : > { %p723_p8 = pnand %p401_p5, %p119_p7  ;;  %s132_s22 = sshll.u32 %s657_s21, 4  ;;  %s133_s22 = int_to_ptr.vmem [resolvable:$true] %s132_s22 }
   0xe   : > { %s658_s23 = smov [#allocation7]   ;;  %s739_s26 = sadd.s32 1, %s655_s15  }
   0xf   : > { %s921_s20 = scalar_select %p723_p8, 1, 0 }
  0x10   : > { %p440_p10 = pneg %p723_p8  ;;  %s143_s24 = sshll.u32 %s658_s23, 4  ;;  %s736_s24 = int_to_ptr.vmem [resolvable:$true] %s143_s24 }
  0x11   : > { %s24_s27 = ssub.s32 %s655_s15, %s739_s26  ;;  %s499_s30 = scalar_lea.hbm %s913_s1, 64 }
  0x12   : > { %p732_p11 = pnand %p440_p10, %p916_p1  ;;  %p500_p12 = scmp.ne.s32.totalorder %s913_s1, %s499_s30 }
  0x13   : > { %p506_p5 = scmp.lt.u32.totalorder %s499_s30, %s913_s1 }
  0x14   : > { %p501_p13 = pneg %p732_p11 }
  0x16   : > { %p502_p0 = pnand %p501_p13, %p500_p12 }
  0x18   : > { %p503_p3 = pneg %p502_p0 }
  0x1a   : > { %p508_p7 = pnand %p506_p5, %p503_p3 }
  0x1c   : > { %511 = shalt.err (!%p508_p7)
}
  0x1d   : > { %s512_s8 = scalar_lea.vmem %s133_s22, 64  ;;  %p520_p2 = scmp.lt.s32.totalorder %s133_s22, %s133_s22 }
  0x1e   : > { %p513_p10 = scmp.ne.s32.totalorder %s133_s22, %s512_s8  ;;  %p521_p6 = scmp.lt.s32.totalorder %s512_s8, %s512_s8 }
  0x20   : > { %p515_p9 = pnand %p513_p10, %p501_p13  ;;  %p522_p4 = por %p521_p6, %p520_p2 }
  0x22   : > { %p516_p1 = pneg %p515_p9 }
  0x24   : > { %p523_p8 = pnand %p522_p4, %p516_p1 }
  0x26   : > { %526 = shalt.err (!%p523_p8)
}
  0x27   : > { %443 = dma.hbm_to_vmem [thread:$0]  (!%p732_p11), %s913_s1, 64, %s133_s22, [#allocation6]  }
  0x28   : > { %s527_s21 = scalar_lea.hbm %s914_s2, 64 }
  0x29   : > { %p528_p9 = scmp.ne.s32.totalorder %s914_s2, %s527_s21  ;;  %p534_p4 = scmp.lt.u32.totalorder %s527_s21, %s914_s2 }
  0x2b   : > { %p530_p2 = pnand %p528_p9, %p501_p13 }
  0x2d   : > { %p531_p1 = pneg %p530_p2 }
  0x2f   : > { %p536_p6 = pnand %p534_p4, %p531_p1 }
  0x31   : > { %539 = shalt.err (!%p536_p6)
}
  0x32   : > { %s540_s22 = scalar_lea.vmem %s736_s24, 64  ;;  %p548_p3 = scmp.lt.s32.totalorder %s736_s24, %s736_s24 }
  0x33   : > { %p541_p8 = scmp.ne.s32.totalorder %s736_s24, %s540_s22  ;;  %p549_p5 = scmp.lt.s32.totalorder %s540_s22, %s540_s22 }
  0x35   : > { %p543_p12 = pnand %p541_p8, %p501_p13  ;;  %p550_p7 = por %p549_p5, %p548_p3 }
  0x37   : > { %p544_p0 = pneg %p543_p12 }
  0x39   : > { %p551_p10 = pnand %p550_p7, %p544_p0 }
  0x3b   : > { %554 = shalt.err (!%p551_p10)
}
  0x3c   : > { %446 = dma.hbm_to_vmem [thread:$0]  (!%p732_p11), %s914_s2, 64, %s736_s24, [#allocation6]  }
  0x3d   : > { %p25_p13 = scmp.eq.s32.totalorder %s24_s27, 0  ;;  %s27_s6 = sadd.s32 1, %s651_s14 }
  0x3e   : > { %p34_p9 = scmp.ne.s32.totalorder %s651_s14, %s647_s13  ;;  %p35_p2 = scmp.eq.s32.totalorder %s655_s15, 0 }
  0x3f   : > { %s798_s25 = scalar_select %p25_p13, %s651_s14, %s27_s6  }
  0x40   : > { %p36_p1 = por %p35_p2, %p34_p9  ;;  %p923_p4 = scmp.eq.s32.totalorder %s704_s16, 1 }
  0x41   : > { %p457_p8 = scmp.lt.s32.totalorder %s655_s15, 2  ;;  %s154_s8 = sand.u32 1, %s651_s14  }
  0x42   : > { %p802_p6 = por %p923_p4, %p34_p9  ;;  %s405_s9 = sshll.u32 %s154_s8, 2 }
  0x43   : > { %s406_s10 = sshll.u32 %s655_s15, 6  ;;  %s158_s27 = scalar_lea.vmem [#allocation2], %s405_s9 }
  0x44   : > { %s812_s24 = scalar_lea.hbm %s912_s0, %s406_s10  ;;  %s165_s21 = sshll.u32 %s158_s27, 4  ;;  %s814_s21 = int_to_ptr.vmem [resolvable:$true] %s165_s21 }
  0x45   : > { %p816_p11 = pnand %p457_p8, %p36_p1  ;;  %s155_s28 = scalar_lea.sflag [#allocation3], %s154_s8 }
  0x46   : > { %s555_s29 = scalar_lea.hbm %s812_s24, 64  ;;  %s560_s4 = scalar_lea.hbm %s912_s0, 128 }
  0x47   : > { %p556_p12 = scmp.ne.s32.totalorder %s812_s24, %s555_s29  ;;  %p557_p0 = pneg %p816_p11 }
  0x48   : > { %p561_p7 = scmp.lt.u32.totalorder %s812_s24, %s912_s0  ;;  %p562_p10 = scmp.lt.u32.totalorder %s560_s4, %s555_s29 }
  0x49   : > { %p558_p3 = pnand %p557_p0, %p556_p12  ;;  %p564_p9 = scmp.lt.u32.totalorder %s555_s29, %s812_s24 }
  0x4a   : > { %p563_p13 = por %p562_p10, %p561_p7 }
  0x4b   : > { %p559_p5 = pneg %p558_p3 }
  0x4c   : > { %p565_p2 = por %p564_p9, %p563_p13 }
  0x4e   : > { %p566_p1 = pnand %p565_p2, %p559_p5 }
  0x50   : > { %569 = shalt.err (!%p566_p1)
}
  0x51   : > { %s570_s8 = scalar_lea.vmem %s814_s21, 64  ;;  %s659_s9 = smov [#allocation2]  }
  0x52   : > { %p571_p4 = scmp.ne.s32.totalorder %s814_s21, %s570_s8  ;;  %s575_s10 = sshll.u32 %s659_s9, 4  ;;  %s576_s10 = int_to_ptr.vmem [resolvable:$false] %s575_s10 }
  0x53   : > { %s577_s11 = scalar_lea.vmem %s576_s10, 128  ;;  %p578_p3 = scmp.lt.s32.totalorder %s814_s21, %s576_s10 }
  0x54   : > { %p573_p8 = pnand %p571_p4, %p557_p0  ;;  %p579_p7 = scmp.lt.s32.totalorder %s577_s11, %s570_s8 }
  0x56   : > { %p574_p12 = pneg %p573_p8  ;;  %p580_p10 = por %p579_p7, %p578_p3 }
  0x58   : > { %p581_p13 = pnand %p580_p10, %p574_p12 }
  0x5a   : > { %584 = shalt.err (!%p581_p13)
}
  0x5b   : > { %450 = dma.hbm_to_vmem [thread:$0]  (!%p816_p11), %s812_s24, 64, %s814_s21, %s155_s28  }
  0x5c   : > { %p926_p5 = scmp.ne.s32.totalorder %s921_s20, 0 }
  0x5d   : > { %s848_s17 = sand.u32 (!%p926_p5), 1, %s647_s13   ;;  %p927_p0 = scmp.ne.s32.totalorder (!%p926_p5), %s919_s18, 0 }
  0x5e   : > { %174 = sbr.rel (%p926_p5) target bundleno = 653 (0x28d), region = 32  ;;  %s408_s27 = sshll.u32 (!%p926_p5), %s848_s17, 2 }
  0x5f   : > { %s177_s29 = scalar_lea.sflag (!%p926_p5), [#allocation3], %s848_s17  ;;  %s180_s30 = scalar_lea.vmem (!%p926_p5), [#allocation2], %s408_s27 }
  0x65   : > { %630 = dma.done.wait (%p927_p0), %s177_s29, 64  }
  0x66   : > { %632 = vsyncadd (%p927_p0), %s177_s29, 4294967232  ;;  %p928_p11 = scmp.eq.s32.totalorder %s704_s16, 0 }
  0x68   : > { %634 = dma.done.wait (%p928_p11), [#allocation6], 128   ;;  %p929_p9 = pmov %p928_p11 }
  0x69   : > { %v660_v0 = vmov 0.0   ;;  %vm661_vm0 = vmmov 0   ;;  %vm223_vm1 = vcmask 1043456   ;;  %v213_v1 = vld [vmem:[#allocation5] sm:$0xf]  ;;  %vm219_vm2 = vcmask 64512  }
  0x6a   : > { %636 = vsyncadd (%p929_p9), [#allocation6], 4294967168  ;;  %422 = vmatprep.subr.bf16.mxu0 %v660_v0  ;;  %424 = vmatprep.mubr.msk.bf16.mxu0 %vm661_vm0, %v660_v0  ;;  %v225_v2 = vsel %vm223_vm1, %v213_v1, 0  ;;  %v212_v3 = vld [vmem:[%s180_s30] sm:$0xf]  ;;  %vm267_vm3 = vcmask 523264  }
  0x6b   : > { %423 = vmatpush3.bf16.msra.mxu0 %v225_v2  ;;  %v412_v4 = vld [vmem:[#allocation7] ss:$0 sm:$0xff]  ;;  %v414_v20 = vld [vmem:[#allocation7 + $0x1] ss:$0 sm:$0xff]  ;;  %v415_v22 = vld [vmem:[#allocation7 + $0x2] ss:$0 sm:$0xff] }
  0x6c   : > { %s417_s18 = sshll.u32 %s704_s16, 6  ;;  %s210_s20 = scalar_lea.vmem [#allocation8], %s408_s27  ;;  %vm295_vm4 = vcmask 519168  }
  0x6d   : > { %s311_s24 = sshll.u32 %s210_s20, 4  ;;  %s868_s28 = scalar_lea.hbm %s915_s3, %s417_s18  ;;  %s870_s24 = int_to_ptr.vmem [resolvable:$true] %s311_s24 }
  0x6e   : > { %425 = vmatmul.mubr.msk.bf16.vlgmr.msra.gmra.mrb[0].mxu0 %vm219_vm2, %v212_v3  ;;  %s298_s22 = scalar_lea.sflag [#allocation4], %s848_s17  ;;  %s585_s4 = scalar_lea.vmem %s870_s24, 64 }
  0x6f   : > { %p586_p2 = scmp.ne.s32.totalorder %s870_s24, %s585_s4  ;;  %s662_s16 = smov [#allocation8]  }
  0x70   : > { %s589_s5 = sshll.u32 %s662_s16, 4  ;;  %s590_s5 = int_to_ptr.vmem [resolvable:$false] %s589_s5 }
  0x71   : > { %p587_p1 = pnand %p586_p2, %p802_p6  ;;  %s591_s6 = scalar_lea.vmem %s590_s5, 128 }
  0x72   : > { %p592_p8 = scmp.lt.s32.totalorder %s870_s24, %s590_s5  ;;  %p593_p12 = scmp.lt.s32.totalorder %s591_s6, %s585_s4 }
  0x73   : > { %p588_p4 = pneg %p587_p1 }
  0x74   : > { %p594_p3 = por %p593_p12, %p592_p8 }
  0x76   : > { %p595_p7 = pnand %p594_p3, %p588_p4 }
 0x141   : > { %v261_v5 = vpop.f32.mrb[0].mxu0 }
 0x142   : > { %v262_v6 = vadd.f32 %v412_v4, %v261_v5  ;;  %v426_v7 = vpop.f32.mrb[1].mxu0 }
 0x143   : > { %v264_v8 = vpop.f32.mrb[2].mxu0 }
 0x144   : > { %v427_v9 = vpop.f32.mrb[3].mxu0  ;;  %v268_v10 = vsel %vm267_vm3, %v262_v6, 0.0 }
 0x145   : > { %269 = vadd.xlane.f32.xlu0 %v268_v10 }
 0x1d2   : > { %v270_v11 = vpop.xlane.xlu0 %269 }
 0x1d3   : > { %v272_v12 = vmul.f32 0.015625, %v270_v11 }
 0x1d5   : > { %v273_v13 = vsub.f32 %v262_v6, %v272_v12 }
 0x1d7   : > { %v274_v14 = vmul.f32 %v273_v13, %v273_v13 }
 0x1d9   : > { %v275_v15 = vsel %vm267_vm3, %v274_v14, 0.0 }
 0x1da   : > { %276 = vadd.xlane.f32.xlu0 %v275_v15 }
 0x267   : > { %v277_v16 = vpop.xlane.xlu0 %276 }
 0x268   : > { %v278_v17 = vmul.f32 0.015625, %v277_v16 }
 0x26a   : > { %v279_v18 = vadd.f32 1e-09, %v278_v17 }
 0x26c   : > { %497 = vrsqrt.f32 %v279_v18 }
 0x276   : > { %v498_v19 = vpop.eup %497 }
 0x277   : > { %v281_v21 = vmul.f32 %v498_v19, %v273_v13 }
 0x279   : > { %v287_v23 = vmul.f32 %v414_v20, %v281_v21 }
 0x27b   : > { %v293_v24 = vadd.f32 %v415_v22, %v287_v23 }
 0x27d   : > { %v294_v25 = vpack.c.bf16 %v293_v24, %v293_v24 }
 0x27f   : > { %296 = vst.msk [vmem:[%s210_s20] sm:$0xf] %vm295_vm4, %v294_v25 }
 0x280   : > { %598 = shalt.err (!%p595_p7)
}
 0x281   : > { %s599_s8 = scalar_lea.hbm %s868_s28, 64  ;;  %s603_s11 = scalar_lea.hbm %s915_s3, 128 }
 0x282   : > { %p600_p10 = scmp.ne.s32.totalorder %s868_s28, %s599_s8  ;;  %p604_p0 = scmp.lt.u32.totalorder %s868_s28, %s915_s3 }
 0x283   : > { %p605_p11 = scmp.lt.u32.totalorder %s603_s11, %s599_s8  ;;  %p607_p2 = scmp.lt.u32.totalorder %s599_s8, %s868_s28 }
 0x284   : > { %p601_p13 = pnand %p600_p10, %p802_p6 }
 0x285   : > { %p606_p9 = por %p605_p11, %p604_p0 }
 0x286   : > { %p602_p5 = pneg %p601_p13 }
 0x287   : > { %p608_p1 = por %p607_p2, %p606_p9 }
 0x289   : > { %p609_p4 = pnand %p608_p1, %p602_p5 }
 0x28b   : > { %612 = shalt.err (!%p609_p4)
}
 0x28c   : > { %438 = dma.vmem_to_hbm [thread:$0]  (%p802_p6), %s870_s24, 64, %s868_s28, %s298_s22  }
 0x28d PF: > { %s323_s29 = sand.u32 1, %s643_s12   ;;  %p930_p8 = scmp.ne.s32.totalorder %s920_s19, 0 }
 0x28e   : > { %p931_p12 = scmp.ge.s32.totalorder %s655_s15, 2  ;;  %s324_s30 = scalar_lea.sflag [#allocation4], %s323_s29 }
 0x290   : > { %p452_p3 = pnand %p931_p12, %p930_p8 }
 0x292   : > { %638 = dma.done.wait (!%p452_p3), %s324_s30, 64  }
 0x293   : > { %640 = vsyncadd (!%p452_p3), %s324_s30, 4294967232  ;;  %p17_p7 = scmp.ge.s32.totalorder %s739_s26, 4   ;;  %s932_s12 = smov %s647_s13 }
 0x294   : > { %s933_s13 = smov %s651_s14  ;;  %s934_s14 = smov %s798_s25 }
 0x295   : > { %s935_s15 = smov %s739_s26  ;;  %19 = sbr.rel (!%p17_p7) target bundleno = 6 (0x6), region = 85 }
 0x29c   :  { %329 = vsyncpa [#allocation3], 1 }
 0x29d   :  { %331 = vsyncpa [#allocation3 + $0x1], 1 }
 0x29e   :  { %332 = vsyncpa [#allocation6], 1 }
 0x29f   :  { %333 = vsyncpa [#allocation4], 1 }
 0x2a0   :  { %335 = vsyncpa [#allocation4 + $0x1], 1 }

// kernel: lxrt_model_forward.60
= control target key start
LH: loop header
LB: loop body
LE: loop exit
PB: predicated region body
PF: predicated region fallthrough
CT: control target
= control target key end

     0   :  { %s1577_s0 = inlined_call_operand.hbm [shape: bf16[2,8,64], index: 0, kind: input, shape index: {}]   ;;  %s1578_s1 = inlined_call_operand.hbm [shape: bf16[2,8,128], index: 1, kind: input, shape index: {}]   ;;  %s1579_s2 = inlined_call_operand.hbm [shape: f32[2,1,8], index: 2, kind: input, shape index: {}]   ;;  %s1580_s3 = inlined_call_operand.hbm [shape: bf16[2,8,64], index: 3, kind: output, shape index: {}]  }
   0x1   :  { %1585 = sst [smem:[#allocation14_spill]] %s1577_s0 }
   0x2   :  { %1586 = sst [smem:[#allocation15_spill]] %s1578_s1 }
   0x3   :  { %8 = vsyncpa [#allocation4], 0 }
   0x4   :  { %10 = vsyncpa [#allocation4 + $0x1], 0 }
   0x5   :  { %11 = vsyncpa [#allocation7], 0 }
   0x6   :  { %13 = vsyncpa [#allocation7 + $0x1], 0 }
   0x7   :  { %14 = vsyncpa [#allocation5], 0 }
   0x8   :  { %16 = vsyncpa [#allocation5 + $0x1], 0  ;;  %s1264_s12 = smov 0   ;;  %s1266_s13 = smov 0  }
   0x9   :  { %s1268_s14 = smov 0   ;;  %s1270_s15 = smov 0  }
   0xa LB: > { %s1285_s16 = sadd.s32 4294967295, %s1229_s15   ;;  %s885_s17 = sadd.s32 4294967294, %s1229_s15   ;;  %s1229_s15 = sphi %s1270_s15, %s1608_s15   ;;  %s1225_s14 = sphi %s1268_s14, %s1607_s14   ;;  %s1221_s13 = sphi %s1266_s13, %s1606_s13   ;;  %s1217_s12 = sphi %s1264_s12, %s1605_s12  }
   0xb   : > { %s1289_s18 = sadd.s32 1, %s1229_s15   ;;  %s29_s19 = sadd.s32 1, %s1225_s14 }
   0xc   : > { %s26_s20 = ssub.s32 %s1229_s15, %s1289_s18  ;;  %p36_p0 = scmp.ne.s32.totalorder %s1225_s14, %s1221_s13 }
   0xd   : > { %p27_p1 = scmp.eq.s32.totalorder %s26_s20, 0  ;;  %p37_p2 = scmp.eq.s32.totalorder %s1229_s15, 0 }
   0xe   : > { %p42_p3 = scmp.ne.s32.totalorder %s1221_s13, %s1217_s12  ;;  %p43_p4 = scmp.eq.s32.totalorder %s1285_s16, 0 }
   0xf   : > { %s1301_s21 = scalar_select %p27_p1, %s1225_s14, %s29_s19  }
  0x10   : > { %p38_p5 = por %p37_p2, %p36_p0  ;;  %p1303_p6 = por %p43_p4, %p42_p3 }
  0x11   : > { %1587 = sst [smem:[#allocation13_spill]] %s1301_s21  ;;  %p118_p7 = scmp.eq.s32.totalorder %s1285_s16, 1 }
  0x12   : > { %s1588_s22 = scalar_select %p1303_p6, 1, 0 }
  0x13   : > { %p124_p8 = scmp.eq.s32.totalorder %s885_s17, 1  ;;  %p1003_p10 = scmp.lt.s32.totalorder %s1229_s15, 2 }
  0x14   : > { %p1310_p11 = por %p118_p7, %p36_p0  ;;  %s1319_s25 = sand.u32 1, %s1225_s14  }
  0x15   : > { %p1314_p12 = por %p124_p8, %p42_p3  ;;  %s889_s26 = sshll.u32 %s1229_s15, 6 }
  0x16   : > { %s1589_s23 = scalar_select %p1310_p11, 1, 0 }
  0x17   : > { %s1590_s24 = scalar_select %p1314_p12, 1, 0 }
  0x18   : > { %s888_s27 = sshll.u32 %s1319_s25, 2  ;;  %p1323_p13 = pnand %p1003_p10, %p38_p5 }
  0x19   : > { %s162_s29 = sand.u32 1, %s1229_s15   ;;  %s1592_s1 = sld [smem:[#allocation15_spill]] }
  0x1a   : > { %s1591_s28 = scalar_select %p1323_p13, 1, 0 }
  0x1b   : > { %s166_s6 = scalar_lea.vmem [#allocation6], %s888_s27  ;;  %s1340_s8 = scalar_lea.sflag [#allocation7], %s162_s29 }
  0x1c   : > { %s173_s7 = sshll.u32 %s166_s6, 4  ;;  %p1346_p2 = pneg %p1323_p13  ;;  %s1337_s7 = int_to_ptr.vmem [resolvable:$true] %s173_s7 }
  0x1f   : > { %s1333_s5 = scalar_lea.hbm %s1592_s1, %s889_s26  ;;  %s1074_s19 = scalar_lea.hbm %s1592_s1, 128 }
  0x20   : > { %s1069_s9 = scalar_lea.hbm %s1333_s5, 64  ;;  %p1075_p5 = scmp.lt.u32.totalorder %s1333_s5, %s1592_s1 }
  0x21   : > { %p1070_p1 = scmp.ne.s32.totalorder %s1333_s5, %s1069_s9  ;;  %p1076_p7 = scmp.lt.u32.totalorder %s1074_s19, %s1069_s9 }
  0x22   : > { %p1078_p10 = scmp.lt.u32.totalorder %s1069_s9, %s1333_s5 }
  0x23   : > { %p1072_p3 = pnand %p1346_p2, %p1070_p1  ;;  %p1077_p8 = por %p1076_p7, %p1075_p5 }
  0x25   : > { %p1073_p4 = pneg %p1072_p3  ;;  %p1079_p9 = por %p1078_p10, %p1077_p8 }
  0x27   : > { %p1080_p0 = pnand %p1079_p9, %p1073_p4 }
  0x29   : > { %1083 = shalt.err (!%p1080_p0)
}
  0x2a   : > { %s1084_s29 = scalar_lea.vmem %s1337_s7, 64  ;;  %s1231_s4 = smov [#allocation6]  }
  0x2b   : > { %p1085_p1 = scmp.ne.s32.totalorder %s1337_s7, %s1084_s29  ;;  %s1089_s6 = sshll.u32 %s1231_s4, 4  ;;  %s1090_s6 = int_to_ptr.vmem [resolvable:$false] %s1089_s6 }
  0x2c   : > { %s1091_s11 = scalar_lea.vmem %s1090_s6, 128  ;;  %p1092_p11 = scmp.lt.s32.totalorder %s1337_s7, %s1090_s6 }
  0x2d   : > { %p1087_p3 = pnand %p1085_p1, %p1346_p2  ;;  %p1093_p6 = scmp.lt.s32.totalorder %s1091_s11, %s1084_s29 }
  0x2f   : > { %p1088_p12 = pneg %p1087_p3  ;;  %p1094_p5 = por %p1093_p6, %p1092_p11 }
  0x31   : > { %p1095_p7 = pnand %p1094_p5, %p1088_p12 }
  0x33   : > { %1098 = shalt.err (!%p1095_p7)
}
  0x34   : > { %995 = dma.hbm_to_vmem [thread:$0]  (!%p1323_p13), %s1333_s5, 64, %s1337_s7, %s1340_s8  }
  0x35   : > { %p195_p9 = scmp.lt.s32.totalorder %s1229_s15, 3  ;;  %s1594_s0 = sld [smem:[#allocation14_spill]] }
  0x36   : > { %p1595_p6 = scmp.ge.s32.totalorder %s1229_s15, 1  ;;  %s148_s30 = scalar_lea.vmem [#allocation3], %s888_s27 }
  0x37   : > { %s155_s29 = sshll.u32 %s148_s30, 4  ;;  %s145_s5 = scalar_lea.sflag [#allocation4], %s1319_s25  ;;  %s156_s29 = int_to_ptr.vmem [resolvable:$true] %s155_s29 }
  0x38   : > { %p1380_p11 = pnand %p1595_p6, %p195_p9 }
  0x3a   : > { %s1596_s20 = scalar_select %p1380_p11, 1, 0 }
  0x3b   : > { %s1376_s19 = scalar_lea.hbm %s1594_s0, %s889_s26  ;;  %s1104_s6 = scalar_lea.hbm %s1594_s0, 128 }
  0x3c   : > { %s1099_s7 = scalar_lea.hbm %s1376_s19, 64  ;;  %p1105_p8 = scmp.lt.u32.totalorder %s1376_s19, %s1594_s0 }
  0x3d   : > { %p1100_p12 = scmp.ne.s32.totalorder %s1376_s19, %s1099_s7  ;;  %p1106_p10 = scmp.lt.u32.totalorder %s1104_s6, %s1099_s7 }
  0x3e   : > { %p1108_p3 = scmp.lt.u32.totalorder %s1099_s7, %s1376_s19 }
  0x3f   : > { %p1102_p0 = pnand %p1100_p12, %p1346_p2  ;;  %p1107_p1 = por %p1106_p10, %p1105_p8 }
  0x41   : > { %p1103_p4 = pneg %p1102_p0  ;;  %p1109_p5 = por %p1108_p3, %p1107_p1 }
  0x43   : > { %p1110_p7 = pnand %p1109_p5, %p1103_p4 }
  0x45   : > { %1113 = shalt.err (!%p1110_p7)
}
  0x46   : > { %s1114_s27 = scalar_lea.vmem %s156_s29, 64  ;;  %s1232_s17 = smov [#allocation3]  }
  0x47   : > { %p1115_p9 = scmp.ne.s32.totalorder %s156_s29, %s1114_s27  ;;  %s1119_s30 = sshll.u32 %s1232_s17, 4  ;;  %s1120_s30 = int_to_ptr.vmem [resolvable:$false] %s1119_s30 }
  0x48   : > { %s1121_s26 = scalar_lea.vmem %s1120_s30, 128  ;;  %p1122_p0 = scmp.lt.s32.totalorder %s156_s29, %s1120_s30 }
  0x49   : > { %p1117_p6 = pnand %p1115_p9, %p1346_p2  ;;  %p1123_p11 = scmp.lt.s32.totalorder %s1121_s26, %s1114_s27 }
  0x4b   : > { %p1118_p12 = pneg %p1117_p6  ;;  %p1124_p13 = por %p1123_p11, %p1122_p0 }
  0x4d   : > { %p1125_p8 = pnand %p1124_p13, %p1118_p12 }
  0x4f   : > { %1128 = shalt.err (!%p1125_p8)
}
  0x50   : > { %p1597_p10 = scmp.ne.s32.totalorder %s1591_s28, 0  ;;  %s892_s7 = sshll.u32 %s1229_s15, 4 }
  0x51   : > { %s183_s4 = scalar_lea.vmem [#allocation8], %s1319_s25  ;;  %s188_s17 = scalar_lea.hbm %s1579_s2, %s892_s7 }
  0x52   : > { %992 = dma.hbm_to_vmem [thread:$0]  (!%p1597_p10), %s1376_s19, 64, %s156_s29, %s145_s5  }
  0x53   : > { %s190_s6 = sshll.u32 %s183_s4, 4  ;;  %s1129_s30 = scalar_lea.hbm %s188_s17, 16  ;;  %s191_s6 = int_to_ptr.vmem [resolvable:$true] %s190_s6 }
  0x54   : > { %p1130_p4 = scmp.ne.s32.totalorder %s188_s17, %s1129_s30  ;;  %s1134_s0 = scalar_lea.hbm %s1579_s2, 32 }
  0x55   : > { %p1135_p1 = scmp.lt.u32.totalorder %s188_s17, %s1579_s2  ;;  %p1136_p3 = scmp.lt.u32.totalorder %s1134_s0, %s1129_s30 }
  0x56   : > { %p1132_p13 = pnand %p1130_p4, %p1346_p2  ;;  %p1138_p7 = scmp.lt.u32.totalorder %s1129_s30, %s188_s17 }
  0x57   : > { %p1137_p5 = por %p1136_p3, %p1135_p1 }
  0x58   : > { %p1133_p11 = pneg %p1132_p13 }
  0x59   : > { %p1139_p9 = por %p1138_p7, %p1137_p5 }
  0x5b   : > { %p1140_p6 = pnand %p1139_p9, %p1133_p11 }
  0x5d   : > { %1143 = shalt.err (!%p1140_p6)
}
  0x5e   : > { %s1144_s25 = scalar_lea.vmem %s191_s6, 16  ;;  %s1233_s19 = smov [#allocation8]  }
  0x5f   : > { %p1145_p12 = scmp.ne.s32.totalorder %s191_s6, %s1144_s25  ;;  %s1149_s29 = sshll.u32 %s1233_s19, 4  ;;  %s1150_s29 = int_to_ptr.vmem [resolvable:$false] %s1149_s29 }
  0x60   : > { %s1151_s5 = scalar_lea.vmem %s1150_s29, 32  ;;  %p1152_p4 = scmp.lt.s32.totalorder %s191_s6, %s1150_s29 }
  0x61   : > { %p1147_p0 = pnand %p1145_p12, %p1346_p2  ;;  %p1153_p13 = scmp.lt.s32.totalorder %s1151_s5, %s1144_s25 }
  0x63   : > { %p1148_p8 = pneg %p1147_p0  ;;  %p1154_p10 = por %p1153_p13, %p1152_p4 }
  0x65   : > { %p1155_p1 = pnand %p1154_p10, %p1148_p8 }
  0x67   : > { %1158 = shalt.err (!%p1155_p1)
}
  0x68   : > { %p1598_p3 = scmp.ne.s32.totalorder %s1591_s28, 0  ;;  %p1599_p11 = scmp.ne.s32.totalorder %s1596_s20, 0 }
  0x69   : > { %s1425_s0 = sand.u32 (!%p1599_p11), 1, %s1221_s13   ;;  %p1600_p2 = scmp.ne.s32.totalorder (!%p1599_p11), %s1588_s22, 0 }
  0x6a   : > { %998 = dma.hbm_to_vmem [thread:$0]  (!%p1598_p3), %s188_s17, 16, %s191_s6, %s1340_s8  }
  0x6b   : > { %199 = sbr.rel (%p1599_p11) target bundleno = 1568 (0x620), region = 32  ;;  %s1428_s1 = sshll.u32 (!%p1599_p11), %s1425_s0, 2 }
  0x6c   : > { %s202_s21 = scalar_lea.sflag (!%p1599_p11), [#allocation4], %s1425_s0  ;;  %s1432_s10 = scalar_lea.vmem (!%p1599_p11), [#allocation3], %s1428_s1 }
  0x72   : > { %1204 = dma.done.wait (%p1600_p2), %s202_s21, 64  }
  0x73   : > { %1206 = vsyncadd (%p1600_p2), %s202_s21, 4294967232  ;;  %s210_s28 = sand.u32 1, %s1285_s16   ;;  %s1440_s20 = scalar_lea.vmem [#allocation6], %s1428_s1 }
  0x74   : > { %s211_s8 = scalar_lea.sflag [#allocation7], %s210_s28 }
  0x75   : > { %1208 = dma.done.wait (%p1600_p2), %s211_s8, 80  }
  0x76   : > { %1210 = vsyncadd (%p1600_p2), %s211_s8, 4294967216  ;;  %v1234_v0 = vmov 0.0   ;;  %vm1235_vm0 = vmmov 0   ;;  %vm258_vm1 = vcmask 130048   ;;  %v257_v1 = vld [vmem:[%s1440_s20] sm:$0xf] }
  0x77   : > { %933 = vmatprep.subr.bf16.mxu0 %v1234_v0  ;;  %935 = vmatprep.mubr.msk.bf16.mxu0 %vm1235_vm0, %v1234_v0  ;;  %v263_v2 = vsel %vm258_vm1, %v257_v1, 0  ;;  %v256_v3 = vld [vmem:[%s1432_s10] sm:$0xf]  ;;  %s222_s22 = scalar_lea.vmem [#allocation8], %s1425_s0  ;;  %vm313_vm2 = vcmask 64512   ;;  %v899_v12 = vcombine.low %v257_v1, %v257_v1  ;;  %s1236_s7 = smov 64  }
  0x78   : > { %939 = vmatprep.subr.bf16.mxu1 %v1234_v0  ;;  %941 = vmatprep.mubr.msk.bf16.mxu1 %vm1235_vm0, %v1234_v0  ;;  %v1460_v5 = vld [vmem:[%s222_s22] ss:$0 sm:$0xff]  ;;  %v1465_v13 = vld [vmem:[%s1440_s20] ss:$0 sps:$4 sm:$0xff]   ;;  %s1237_s4 = smov 112   ;;  %s1238_s6 = smov 96  }
  0x79   : > { %934 = vmatpush3.bf16.xpose.msra.mxu0 %v263_v2  ;;  %329 = vrot.lane.b32.xlu1 %v899_v12, %s1236_s7  ;;  %v1469_v14 = vld [vmem:[%s1440_s20] ss:$0 sps:$4 sm:$0xff]   ;;  %v1050_v15 = vld [vmem:[%s1432_s10] ss:$0 sps:$4 sm:$0xff]   ;;  %s1239_s11 = smov 80   ;;  %vm334_vm3 = vcmask 1043456  }
  0x7a   : > { %951 = vmatprep.subr.bf16.mxu0 %v1234_v0  ;;  %v1474_v16 = vld [vmem:[%s1440_s20] ss:$0 sps:$4 sm:$0xff]   ;;  %v1052_v17 = vld [vmem:[%s1432_s10] ss:$0 sps:$4 sm:$0xff]   ;;  %s1240_s9 = smov 48   ;;  %s1241_s17 = smov 16  }
  0x7b   : > { %v1049_v25 = vld [vmem:[%s1432_s10] ss:$0 sps:$4 sm:$0xff]   ;;  %s1242_s30 = smov 32   ;;  %vm503_vm4 = vcmask 261248   ;;  %vm629_vm5 = vcmask 392448   ;;  %vm755_vm6 = vcmask 523648  }
  0x7c   : > { %s914_s27 = sshll.u32 %s1285_s16, 6  ;;  %s253_s26 = scalar_lea.vmem [#allocation9], %s1428_s1  ;;  %vm759_vm7 = vcmask 519168  }
  0x7d   : > { %389 = vrot.lane.b32.xlu1 %v1465_v13, %s1237_s4  ;;  %s775_s25 = sshll.u32 %s253_s26, 4  ;;  %s1533_s5 = scalar_lea.hbm %s1580_s3, %s914_s27  ;;  %s1535_s25 = int_to_ptr.vmem [resolvable:$true] %s775_s25 }
  0x7e   : > { %s762_s21 = scalar_lea.sflag [#allocation5], %s1425_s0  ;;  %s1159_s10 = scalar_lea.vmem %s1535_s25, 64 }
  0x7f   : > { %p1160_p10 = scmp.ne.s32.totalorder %s1535_s25, %s1159_s10  ;;  %p1601_p5 = scmp.ne.s32.totalorder %s1589_s23, 0 }
  0x80   : > { %936 = vmatmul.mubr.msk.bf16.vlgmr.msra.gmra.mrb[0].mxu0 %vm258_vm1, %v256_v3  ;;  %s1243_s16 = smov [#allocation9]  }
  0x81   : > { %953 = vmatprep.mubr.msk.bf16.mxu0 %vm1235_vm0, %v1234_v0  ;;  %515 = vrot.lane.b32.xlu1 %v1469_v14, %s1238_s6  ;;  %p1161_p7 = pnand %p1160_p10, %p1601_p5  ;;  %s1163_s1 = sshll.u32 %s1243_s16, 4  ;;  %s1164_s1 = int_to_ptr.vmem [resolvable:$false] %s1163_s1 }
  0x82   : > { %s1165_s28 = scalar_lea.vmem %s1164_s1, 128  ;;  %p1166_p6 = scmp.lt.s32.totalorder %s1535_s25, %s1164_s1 }
  0x83   : > { %p1162_p9 = pneg %p1161_p7  ;;  %p1167_p12 = scmp.lt.s32.totalorder %s1165_s28, %s1159_s10 }
  0x85   : > { %510 = vrot.lane.b32.xlu1 %v1050_v15, %s1238_s6  ;;  %p1168_p0 = por %p1167_p12, %p1166_p6 }
  0x87   : > { %p1169_p8 = pnand %p1168_p0, %p1162_p9 }
  0x89   : > { %641 = vrot.lane.b32.xlu1 %v1474_v16, %s1239_s11 }
  0x8d   : > { %636 = vrot.lane.b32.xlu1 %v1052_v17, %s1239_s11 }
  0xeb   : > { %v330_v23 = vpop.permute.xlu1 %329 }
  0xec   : > { %v336_v24 = vsel %vm334_vm3, %v330_v23, 0 }
  0xed   : > { %940 = vmatpush3.bf16.msra.mxu1 %v336_v24 }
  0xee   : > { %945 = vmatprep.subr.bf16.mxu1 %v1234_v0 }
  0xef   : > { %v390_v28 = vpop.permute.xlu1 %389 }
  0xf0   : > { %v395_v30 = vsel %vm258_vm1, %v390_v28, 0 }
  0xf3   : > { %v516_v32 = vpop.permute.xlu1 %515 }
  0xf4   : > { %v521_v35 = vsel %vm258_vm1, %v516_v32, 0 }
  0xf7   : > { %v511_v34 = vpop.permute.xlu1 %510 }
  0xfb   : > { %v642_v36 = vpop.permute.xlu1 %641 }
  0xfc   : > { %v647_v37 = vsel %vm258_vm1, %v642_v36, 0 }
  0xff   : > { %v637_v38 = vpop.permute.xlu1 %636 }
 0x153   : > { %v299_v4 = vpop.f32.mrb[0].mxu0 }
 0x154   : > { %v305_v6 = vmul.f32 0.25, %v299_v4  ;;  %v937_v7 = vpop.f32.mrb[1].mxu0 }
 0x155   : > { %v302_v8 = vpop.f32.mrb[2].mxu0 }
 0x156   : > { %v938_v9 = vpop.f32.mrb[3].mxu0  ;;  %v312_v10 = vadd.f32 %v1460_v5, %v305_v6 }
 0x158   : > { %v314_v11 = vsel %vm313_vm2, %v312_v10, -inf }
 0x159   : > { %315 = vmax.xlane.f32.xlu0 %v314_v11 }
 0x1e6   : > { %v316_v18 = vpop.xlane.xlu0 %315 }
 0x1e7   : > { %v317_v19 = vsub.f32 %v312_v10, %v316_v18 }
 0x1e9   : > { %v318_v20 = vmul.f32 1.442695, %v317_v19 }
 0x1eb   : > { %1053 = vpow2.f32 %v318_v20 }
 0x1f5   : > { %v1054_v21 = vpop.eup %1053 }
 0x1f6   : > { %v320_v22 = vsel %vm313_vm2, %v1054_v21, 0.0 }
 0x1f7   : > { %321 = vadd.xlane.f32.xlu0 %v320_v22 }
 0x20d   : > { %384 = vrot.lane.b32.xlu0 %v1049_v25, %s1237_s4 }
 0x284   : > { %v322_v26 = vpop.xlane.xlu0 %321 }
 0x285   : > { %1055 = vrcp.f32 %v322_v26 }
 0x288   : > { %v385_v33 = vpop.permute.xlu0 %384 }
 0x28f   : > { %v1056_v27 = vpop.eup %1055 }
 0x290   : > { %v324_v29 = vmul.f32 %v1056_v27, %v1054_v21 }
 0x292   : > { %v325_v31 = vpack.c.bf16 %v324_v29, %v324_v29 }
 0x294   : > { %942 = vmatmul.mubr.msk.bf16.vlgmr.msra.gmra.mrb[0].mxu1 %vm313_vm2, %v325_v31 }
 0x295   : > { %946 = vmatpush3.bf16.xpose.msra.mxu1 %v395_v30  ;;  %947 = vmatprep.mubr.msk.bf16.mxu1 %vm1235_vm0, %v1234_v0 }
 0x296   : > { %957 = vmatprep.subr.bf16.mxu1 %v1234_v0 }
 0x29c   : > { %948 = vmatmul.mubr.msk.bf16.vlgmr.msra.gmra.mrb[4].mxu1 %vm258_vm1, %v385_v33 }
 0x29d   : > { %958 = vmatpush3.bf16.xpose.msra.mxu1 %v521_v35  ;;  %959 = vmatprep.mubr.msk.bf16.mxu1 %vm1235_vm0, %v1234_v0 }
 0x29e   : > { %969 = vmatprep.subr.bf16.mxu1 %v1234_v0 }
 0x2a4   : > { %960 = vmatmul.mubr.msk.bf16.vlgmr.msra.gmra.mrb[8].mxu1 %vm258_vm1, %v511_v34 }
 0x2a5   : > { %970 = vmatpush3.bf16.xpose.msra.mxu1 %v647_v37  ;;  %971 = vmatprep.mubr.msk.bf16.mxu1 %vm1235_vm0, %v1234_v0 }
 0x2ac   : > { %972 = vmatmul.mubr.msk.bf16.vlgmr.msra.gmra.mrb[12].mxu1 %vm258_vm1, %v637_v38 }
 0x367   : > { %v372_v39 = vpop.f32.mrb[0].mxu1 }
 0x368   : > { %378 = vst.msk [vmem:[#allocation2] sm:$0xff] %vm258_vm1, %v372_v39  ;;  %v943_v40 = vpop.f32.mrb[1].mxu1 }
 0x369   : > { %v375_v41 = vpop.f32.mrb[2].mxu1 }
 0x36a   : > { %v944_v42 = vpop.f32.mrb[3].mxu1 }
 0x36f   : > { %v431_v43 = vpop.f32.mrb[4].mxu1 }
 0x370   : > { %v437_v44 = vmul.f32 0.25, %v431_v43  ;;  %v949_v45 = vpop.f32.mrb[5].mxu1 }
 0x371   : > { %v434_v46 = vpop.f32.mrb[6].mxu1 }
 0x372   : > { %v950_v47 = vpop.f32.mrb[7].mxu1  ;;  %v438_v48 = vadd.f32 %v1460_v5, %v437_v44 }
 0x374   : > { %v439_v49 = vsel %vm313_vm2, %v438_v48, -inf }
 0x375   : > { %440 = vmax.xlane.f32.xlu1 %v439_v49 }
 0x377   : > { %v557_v50 = vpop.f32.mrb[8].mxu1 }
 0x378   : > { %v563_v51 = vmul.f32 0.25, %v557_v50  ;;  %v961_v52 = vpop.f32.mrb[9].mxu1 }
 0x379   : > { %v560_v53 = vpop.f32.mrb[10].mxu1 }
 0x37a   : > { %v962_v54 = vpop.f32.mrb[11].mxu1  ;;  %v564_v55 = vadd.f32 %v1460_v5, %v563_v51 }
 0x37c   : > { %v565_v56 = vsel %vm313_vm2, %v564_v55, -inf }
 0x37d   : > { %566 = vmax.xlane.f32.xlu0 %v565_v56 }
 0x37f   : > { %v683_v57 = vpop.f32.mrb[12].mxu1 }
 0x380   : > { %v689_v58 = vmul.f32 0.25, %v683_v57  ;;  %v973_v59 = vpop.f32.mrb[13].mxu1 }
 0x381   : > { %v686_v60 = vpop.f32.mrb[14].mxu1 }
 0x382   : > { %v974_v61 = vpop.f32.mrb[15].mxu1  ;;  %v690_v62 = vadd.f32 %v1460_v5, %v689_v58 }
 0x384   : > { %v691_v63 = vsel %vm313_vm2, %v690_v62, -inf }
 0x385   : > { %692 = vmax.xlane.f32.xlu1 %v691_v63 }
 0x396   : > { %451 = vrot.lane.b32.xlu1 %v1465_v13, %s1240_s9 }
 0x402   : > { %v441_v1 = vpop.xlane.xlu1 %440 }
 0x403   : > { %v442_v2 = vsub.f32 %v438_v48, %v441_v1 }
 0x405   : > { %v443_v3 = vmul.f32 1.442695, %v442_v2 }
 0x407   : > { %1057 = vpow2.f32 %v443_v3 }
 0x40a   : > { %v567_v4 = vpop.xlane.xlu0 %566 }
 0x40b   : > { %v568_v6 = vsub.f32 %v564_v55, %v567_v4 }
 0x40d   : > { %v569_v7 = vmul.f32 1.442695, %v568_v6 }
 0x40f   : > { %1059 = vpow2.f32 %v569_v7 }
 0x411   : > { %v1058_v8 = vpop.eup %1057 }
 0x412   : > { %v693_v9 = vpop.xlane.xlu1 %692  ;;  %v445_v10 = vsel %vm313_vm2, %v1058_v8, 0.0 }
 0x413   : > { %v694_v5 = vsub.f32 %v690_v62, %v693_v9  ;;  %446 = vadd.xlane.f32.xlu0 %v445_v10 }
 0x415   : > { %v695_v11 = vmul.f32 1.442695, %v694_v5 }
 0x416   : > { %v452_v12 = vpop.permute.xlu1 %451 }
 0x417   : > { %1061 = vpow2.f32 %v695_v11  ;;  %v457_v15 = vsel %vm334_vm3, %v452_v12, 0 }
 0x418   : > { %952 = vmatpush3.bf16.msra.mxu0 %v457_v15 }
 0x419   : > { %v1060_v13 = vpop.eup %1059  ;;  %963 = vmatprep.subr.bf16.mxu0 %v1234_v0 }
 0x41a   : > { %v571_v17 = vsel %vm313_vm2, %v1060_v13, 0.0 }
 0x41b   : > { %572 = vadd.xlane.f32.xlu1 %v571_v17 }
 0x421   : > { %v1062_v18 = vpop.eup %1061 }
 0x422   : > { %v697_v19 = vsel %vm313_vm2, %v1062_v18, 0.0 }
 0x423   : > { %698 = vadd.xlane.f32.xlu0 %v697_v19 }
 0x42c   : > { %703 = vrot.lane.b32.xlu1 %v1474_v16, %s1241_s17 }
 0x439   : > { %577 = vrot.lane.b32.xlu0 %v1469_v14, %s1242_s30 }
 0x4a0   : > { %v447_v20 = vpop.xlane.xlu0 %446 }
 0x4a1   : > { %1063 = vrcp.f32 %v447_v20 }
 0x4a8   : > { %v573_v21 = vpop.xlane.xlu1 %572 }
 0x4a9   : > { %1065 = vrcp.f32 %v573_v21 }
 0x4ab   : > { %v1064_v22 = vpop.eup %1063 }
 0x4ac   : > { %v449_v23 = vmul.f32 %v1064_v22, %v1058_v8  ;;  %v704_v28 = vpop.permute.xlu1 %703 }
 0x4ad   : > { %v709_v30 = vsel %vm334_vm3, %v704_v28, 0 }
 0x4ae   : > { %v450_v24 = vpack.c.bf16 %v449_v23, %v449_v23 }
 0x4b0   : > { %v699_v25 = vpop.xlane.xlu0 %698  ;;  %954 = vmatmul.mubr.msk.bf16.vlgmr.msra.gmra.mrb[4].mxu0 %vm313_vm2, %v450_v24 }
 0x4b1   : > { %1067 = vrcp.f32 %v699_v25  ;;  %965 = vmatprep.mubr.msk.bf16.mxu0 %vm1235_vm0, %v1234_v0 }
 0x4b3   : > { %v1066_v26 = vpop.eup %1065 }
 0x4b4   : > { %v575_v16 = vmul.f32 %v1066_v26, %v1060_v13  ;;  %v578_v27 = vpop.permute.xlu0 %577 }
 0x4b5   : > { %v583_v14 = vsel %vm334_vm3, %v578_v27, 0 }
 0x4b6   : > { %964 = vmatpush3.bf16.msra.mxu0 %v583_v14  ;;  %v576_v29 = vpack.c.bf16 %v575_v16, %v575_v16 }
 0x4b7   : > { %975 = vmatprep.subr.bf16.mxu0 %v1234_v0 }
 0x4b9   : > { %966 = vmatmul.mubr.msk.bf16.vlgmr.msra.gmra.mrb[8].mxu0 %vm313_vm2, %v576_v29 }
 0x4ba   : > { %976 = vmatpush3.bf16.msra.mxu0 %v709_v30  ;;  %977 = vmatprep.mubr.msk.bf16.mxu0 %vm1235_vm0, %v1234_v0 }
 0x4bb   : > { %v1068_v31 = vpop.eup %1067 }
 0x4bc   : > { %v701_v32 = vmul.f32 %v1068_v31, %v1062_v18 }
 0x4be   : > { %v702_v33 = vpack.c.bf16 %v701_v32, %v701_v32 }
 0x4c1   : > { %978 = vmatmul.mubr.msk.bf16.vlgmr.msra.gmra.mrb[12].mxu0 %vm313_vm2, %v702_v33 }
 0x583   : > { %v493_v34 = vpop.f32.mrb[4].mxu0 }
 0x584   : > { %500 = vrot.lane.b32.xlu1 %v493_v34, %s1241_s17  ;;  %v955_v35 = vpop.f32.mrb[5].mxu0 }
 0x585   : > { %v496_v36 = vpop.f32.mrb[6].mxu0 }
 0x586   : > { %v956_v37 = vpop.f32.mrb[7].mxu0 }
 0x58c   : > { %v619_v38 = vpop.f32.mrb[8].mxu0 }
 0x58d   : > { %626 = vrot.lane.b32.xlu0 %v619_v38, %s1242_s30  ;;  %v967_v39 = vpop.f32.mrb[9].mxu0 }
 0x58e   : > { %v622_v40 = vpop.f32.mrb[10].mxu0 }
 0x58f   : > { %v968_v41 = vpop.f32.mrb[11].mxu0 }
 0x594   : > { %v745_v0 = vpop.f32.mrb[12].mxu0 }
 0x595   : > { %752 = vrot.lane.b32.xlu1 %v745_v0, %s1240_s9  ;;  %v979_v42 = vpop.f32.mrb[13].mxu0 }
 0x596   : > { %v748_v43 = vpop.f32.mrb[14].mxu0 }
 0x597   : > { %v980_v44 = vpop.f32.mrb[15].mxu0 }
 0x5f6   : > { %v501_v45 = vpop.permute.xlu1 %500 }
 0x5f7   : > { %504 = vst.msk [vmem:[#allocation2] sm:$0xff] %vm503_vm4, %v501_v45 }
 0x5ff   : > { %v627_v46 = vpop.permute.xlu0 %626 }
 0x600   : > { %630 = vst.msk [vmem:[#allocation2] sm:$0xff] %vm629_vm5, %v627_v46 }
 0x607   : > { %v753_v47 = vpop.permute.xlu1 %752 }
 0x608   : > { %756 = vst.msk [vmem:[#allocation2] sm:$0xff] %vm755_vm6, %v753_v47 }
 0x60f   : > { %v757_v48 = vld [vmem:[#allocation2] sm:$0xff] }
 0x610   : > { %v758_v49 = vpack.c.bf16 %v757_v48, %v757_v48 }
 0x612   : > { %760 = vst.msk [vmem:[%s253_s26] sm:$0xf] %vm759_vm7, %v758_v49 }
 0x613   : > { %1172 = shalt.err (!%p1169_p8)
}
 0x614   : > { %s1173_s0 = scalar_lea.hbm %s1533_s5, 64  ;;  %s1177_s22 = scalar_lea.hbm %s1580_s3, 128 }
 0x615   : > { %p1174_p4 = scmp.ne.s32.totalorder %s1533_s5, %s1173_s0  ;;  %p1178_p3 = scmp.lt.u32.totalorder %s1533_s5, %s1580_s3 }
 0x616   : > { %p1179_p11 = scmp.lt.u32.totalorder %s1177_s22, %s1173_s0  ;;  %p1181_p10 = scmp.lt.u32.totalorder %s1173_s0, %s1533_s5 }
 0x617   : > { %p1175_p13 = pnand %p1174_p4, %p1601_p5 }
 0x618   : > { %p1180_p2 = por %p1179_p11, %p1178_p3 }
 0x619   : > { %p1176_p1 = pneg %p1175_p13 }
 0x61a   : > { %p1182_p7 = por %p1181_p10, %p1180_p2 }
 0x61c   : > { %p1183_p9 = pnand %p1182_p7, %p1176_p1 }
 0x61e   : > { %1186 = shalt.err (!%p1183_p9)
}
 0x61f   : > { %987 = dma.vmem_to_hbm [thread:$0]  (%p1601_p5), %s1535_s25, 64, %s1533_s5, %s762_s21  }
 0x620 PF: > { %s787_s6 = sand.u32 1, %s1217_s12   ;;  %p1602_p6 = scmp.ne.s32.totalorder %s1590_s24, 0 }
 0x621   : > { %p1603_p12 = scmp.ge.s32.totalorder %s1229_s15, 2  ;;  %s788_s11 = scalar_lea.sflag [#allocation5], %s787_s6 }
 0x623   : > { %p1000_p0 = pnand %p1603_p12, %p1602_p6 }
 0x625   : > { %1212 = dma.done.wait (!%p1000_p0), %s788_s11, 64  }
 0x626   : > { %1214 = vsyncadd (!%p1000_p0), %s788_s11, 4294967232  ;;  %s1604_s9 = sld [smem:[#allocation13_spill]]  ;;  %p19_p8 = scmp.ge.s32.totalorder %s1289_s18, 4  }
 0x627   : > { %s1605_s12 = smov %s1221_s13  ;;  %s1606_s13 = smov %s1225_s14 }
 0x628   : > { %s1608_s15 = smov %s1289_s18  ;;  %21 = sbr.rel (!%p19_p8) target bundleno = 10 (0xa), region = 101 }
 0x62c   : > { %s1607_s14 = smov %s1604_s9 }
 0x62f   :  { %793 = vsyncpa [#allocation4], 1 }
 0x630   :  { %795 = vsyncpa [#allocation4 + $0x1], 1 }
 0x631   :  { %796 = vsyncpa [#allocation7], 1 }
 0x632   :  { %798 = vsyncpa [#allocation7 + $0x1], 1 }
 0x633   :  { %799 = vsyncpa [#allocation5], 1 }
 0x634   :  { %801 = vsyncpa [#allocation5 + $0x1], 1 }

</bundles_post_ra>
